<compile_context>
chip_gen: v7x
topology: tpu7x:2x2x1
jax: 0.10.0
libtpu: 0.0.40
codegen_flags: <defaults>
</compile_context>

<pallas_src>
import functools
import math

import jax
import jax.numpy as jnp
from jax import lax
from jax.experimental import pallas as pl
from jax.experimental.pallas import tpu as pltpu


def _round_up(x, m):
    return ((x + m - 1) // m) * m


def _attention_kernel(b_total, z_ref, w1_ref, b1_ref, w2_ref, out_ref, beta_ref):
    """One batch tile.

    z_ref   : (TB, N, D)  input views (true, un-padded D)
    w1_ref  : (D, Hp)     bf16, VMEM-resident across grid steps
    b1_ref  : (1, Hp)     f32
    w2_ref  : (1, Hp)     f32 (second Linear's weight row, zero-padded past H)
    out_ref : (TB, D)     f32
    beta_ref: (TB, N)     f32
    """
    z = z_ref[...]
    tb, n, d = z.shape
    zf = z.astype(jnp.float32)

    # ---- project[0]: Linear(in_size -> hidden) on the MXU (bf16 in, f32 acc) ----
    # (TB, N, D) -> (TB*N, D): layout-free leading-dim merge when N % 8 == 0.
    z2 = zf.reshape(tb * n, d).astype(jnp.bfloat16)
    s = jnp.dot(z2, w1_ref[...], preferred_element_type=jnp.float32)    # (TB*N, Hp) f32

    # ---- bias + tanh in f32 (VPU + EUP) ----
    s = jnp.tanh(s + b1_ref[...])                                       # (TB*N, Hp)

    # ---- project[2]: Linear(hidden -> 1, no bias) as mul + lane reduction ----
    s3 = s.reshape(tb, n, s.shape[-1])                                  # (TB, N, Hp)
    logits = jnp.sum(s3 * w2_ref[...], axis=-1)                         # (TB, N), views on lanes

    # ---- mask garbage rows of a partial tail tile (their writes are discarded,
    #      but keep the softmax free of inf/NaN) ----
    if b_total % tb != 0:
        row = lax.broadcasted_iota(jnp.int32, (tb, 1), 0)
        valid = (pl.program_id(0) * tb + row) < b_total                 # (TB, 1) bool
        logits = jnp.where(valid, logits, 0.0)

    # ---- softmax over the view axis (now the lane axis -> cheap lane reduce) ----
    m = jnp.max(logits, axis=-1, keepdims=True)                         # (TB, 1)
    e = jnp.exp(logits - m)                                             # (TB, N)
    denom = jnp.sum(e, axis=-1, keepdims=True)                          # (TB, 1)
    beta = e * pl.reciprocal(denom, approx=True)                        # EUP, not a VPU divide

    # ---- out = (beta * z).sum(dim=1): short unrolled accumulation over views ----
    out = beta[:, 0:1] * zf[:, 0, :]                                    # (TB, D)
    for k in range(1, n):
        out = out + beta[:, k:k + 1] * zf[:, k, :]

    out_ref[...] = out.astype(out_ref.dtype)
    beta_ref[...] = beta.astype(beta_ref.dtype)


def attention_forward(z, w1, b1, w2, *, block_b=512):
    """z: (B, N, D); w1: (D, H); b1: (H,); w2: (H, 1).
    Returns (out (B, D) f32, beta (B, N, 1) f32) matching the PyTorch Attention module."""
    B, N, D = z.shape
    H = w1.shape[1]
    Hp = _round_up(H, 128)            # MXU-output lane width; hidden cols >= H are zero

    # Row tile: the whole batch if it fits in one tile, otherwise a multiple of 8 rows.
    if B <= block_b:
        tb = B
    else:
        tb = max((block_b // 8) * 8, 8)
    grid = (pl.cdiv(B, tb),)

    # Only the small weights get padded; z is streamed un-padded / un-copied.
    w1_p = jnp.zeros((D, Hp), jnp.bfloat16).at[:, :H].set(w1.astype(jnp.bfloat16))
    b1_p = jnp.zeros((1, Hp), jnp.float32).at[0, :H].set(b1.astype(jnp.float32))
    w2_p = jnp.zeros((1, Hp), jnp.float32).at[0, :H].set(
        w2.reshape(-1).astype(jnp.float32))

    out, beta2 = pl.pallas_call(
        functools.partial(_attention_kernel, B),
        out_shape=(
            jax.ShapeDtypeStruct((B, D), jnp.float32),
            jax.ShapeDtypeStruct((B, N), jnp.float32),
        ),
        grid=grid,
        in_specs=[
            pl.BlockSpec((tb, N, D), lambda b: (b, 0, 0)),   # z rows, streamed per tile
            pl.BlockSpec((D, Hp), lambda b: (0, 0)),         # W1 (bf16), VMEM-resident
            pl.BlockSpec((1, Hp), lambda b: (0, 0)),         # b1
            pl.BlockSpec((1, Hp), lambda b: (0, 0)),         # w2 row
        ],
        out_specs=(
            pl.BlockSpec((tb, D), lambda b: (b, 0)),         # 2D, sublane-dense output slab
            pl.BlockSpec((tb, N), lambda b: (b, 0)),         # 2D beta (expanded in wrapper)
        ),
        compiler_params=pltpu.CompilerParams(
            dimension_semantics=("parallel",),               # split row tiles across TCs
            vmem_limit_bytes=48 << 20,                       # headroom on v7x's 64 MiB/TC
        ),
    )(z, w1_p, b1_p, w2_p)

    return out, beta2[:, :, None]


def reference_forward(z, w1, b1, w2):
    w = jnp.tanh(z @ w1 + b1) @ w2            # (B, N, 1)
    beta = jax.nn.softmax(w, axis=1)          # softmax over dim=1
    return (beta * z).sum(axis=1), beta


if __name__ == "__main__":
    # Small deterministic problem: 16 "nodes", 8 views, in_size=32, hidden=32.
    B, N, D, H = 16, 8, 32, 32
    key = jax.random.PRNGKey(0)
    kz, k1w, k1b, k2w, kz2 = jax.random.split(key, 5)

    z = jax.random.normal(kz, (B, N, D), jnp.float32)

    # nn.Linear default init: U(-1/sqrt(fan_in), 1/sqrt(fan_in)).
    lim1 = 1.0 / math.sqrt(D)
    w1 = jax.random.uniform(k1w, (D, H), jnp.float32, -lim1, lim1)
    b1 = jax.random.uniform(k1b, (H,), jnp.float32, -lim1, lim1)
    lim2 = 1.0 / math.sqrt(H)
    w2 = jax.random.uniform(k2w, (H, 1), jnp.float32, -lim2, lim2)

    # block_b=8 -> tb=8, grid=(2,): exercises a multi-step pipelined run.
    out, beta = attention_forward(z, w1, b1, w2, block_b=8)
    jax.block_until_ready((out, beta))

    ref_out, ref_beta = reference_forward(z, w1, b1, w2)
    assert out.shape == (B, D)
    assert beta.shape == (B, N, 1)
    # bf16 MXU inputs with f32 accumulation (+ approx reciprocal) => ~1e-3..1e-2 deviation.
    assert jnp.allclose(out, ref_out, atol=3e-2, rtol=3e-2)
    assert jnp.allclose(beta, ref_beta, atol=2e-2, rtol=2e-2)

    # Second case: B=20 with tb=8 -> grid=(3,), partial tail tile exercises in-kernel masking.
    B2 = 20
    z2 = jax.random.normal(kz2, (B2, N, D), jnp.float32)
    out2, beta2 = attention_forward(z2, w1, b1, w2, block_b=8)
    jax.block_until_ready((out2, beta2))
    ref_out2, ref_beta2 = reference_forward(z2, w1, b1, w2)
    assert out2.shape == (B2, D)
    assert beta2.shape == (B2, N, 1)
    assert jnp.allclose(out2, ref_out2, atol=3e-2, rtol=3e-2)
    assert jnp.allclose(beta2, ref_beta2, atol=2e-2, rtol=2e-2)

    print("KERNEL_OK")
</pallas_src>

<mosaic_0001>
module attributes {stable_mosaic.version = 11 : i64} {
  func.func @_attention_kernel(%arg0: i32, %arg1: memref<8x8x32xf32, #tpu.memory_space<vmem>>, %arg2: memref<32x128xbf16, #tpu.memory_space<vmem>>, %arg3: memref<1x128xf32, #tpu.memory_space<vmem>>, %arg4: memref<1x128xf32, #tpu.memory_space<vmem>>, %arg5: memref<8x32xf32, #tpu.memory_space<vmem>>, %arg6: memref<8x8xf32, #tpu.memory_space<vmem>>) attributes {dimension_semantics = [#tpu.dimension_semantics<parallel>], iteration_bounds = array<i64: 2>, scalar_prefetch = 0 : i64, scratch_operands = 0 : i64, tpu.core_type = #tpu.core_type<tc>, window_params = [{transform_indices = @transform_0, window_bounds = array<i64: 8, 8, 32>}, {pipeline_mode = #tpu.pipeline_mode<synchronous>, transform_indices = @transform_1, window_bounds = array<i64: 32, 128>}, {pipeline_mode = #tpu.pipeline_mode<synchronous>, transform_indices = @transform_2, window_bounds = array<i64: 1, 128>}, {pipeline_mode = #tpu.pipeline_mode<synchronous>, transform_indices = @transform_3, window_bounds = array<i64: 1, 128>}, {transform_indices = @transform_4, window_bounds = array<i64: 8, 32>}, {transform_indices = @transform_5, window_bounds = array<i64: 8, 8>}]} {
    %c0 = arith.constant 0 : index
    %c0_0 = arith.constant 0 : index
    %c0_1 = arith.constant 0 : index
    %0 = vector.load %arg1[%c0, %c0_0, %c0_1] : memref<8x8x32xf32, #tpu.memory_space<vmem>>, vector<8x8x32xf32>
    %1 = vector.shape_cast %0 : vector<8x8x32xf32> to vector<64x32xf32>
    %2 = arith.truncf %1 : vector<64x32xf32> to vector<64x32xbf16>
    %c0_2 = arith.constant 0 : index
    %c0_3 = arith.constant 0 : index
    %3 = vector.load %arg2[%c0_2, %c0_3] : memref<32x128xbf16, #tpu.memory_space<vmem>>, vector<32x128xbf16>
    %cst = arith.constant dense<0.000000e+00> : vector<64x128xf32>
    %4 = tpu.matmul %2, %3, %cst {dimension_numbers = #tpu.dot_dimension_numbers<[1], [0], [0], [1], [0, 0, 1, 1], [], []>} : vector<64x32xbf16>, vector<32x128xbf16>, vector<64x128xf32> -> vector<64x128xf32>
    %c0_4 = arith.constant 0 : index
    %c0_5 = arith.constant 0 : index
    %5 = vector.load %arg3[%c0_4, %c0_5] : memref<1x128xf32, #tpu.memory_space<vmem>>, vector<1x128xf32>
    %6 = vector.broadcast %5 : vector<1x128xf32> to vector<64x128xf32>
    %7 = arith.addf %4, %6 : vector<64x128xf32>
    %8 = math.tanh %7 : vector<64x128xf32>
    %9 = vector.shape_cast %8 : vector<64x128xf32> to vector<8x8x128xf32>
    %c0_6 = arith.constant 0 : index
    %c0_7 = arith.constant 0 : index
    %10 = vector.load %arg4[%c0_6, %c0_7] : memref<1x128xf32, #tpu.memory_space<vmem>>, vector<1x128xf32>
    %11 = vector.shape_cast %10 : vector<1x128xf32> to vector<1x1x128xf32>
    %12 = vector.broadcast %11 : vector<1x1x128xf32> to vector<8x8x128xf32>
    %13 = arith.mulf %9, %12 : vector<8x8x128xf32>
    %cst_8 = arith.constant dense<0.000000e+00> : vector<8x8xf32>
    %14 = vector.multi_reduction <add>, %13, %cst_8 [2] : vector<8x8x128xf32> to vector<8x8xf32>
    %cst_9 = arith.constant dense<0xFF800000> : vector<8xf32>
    %15 = vector.multi_reduction <maximumf>, %14, %cst_9 [1] : vector<8x8xf32> to vector<8xf32>
    %16 = vector.shape_cast %15 : vector<8xf32> to vector<8x1xf32>
    %17 = vector.broadcast %16 : vector<8x1xf32> to vector<8x8xf32>
    %18 = arith.subf %14, %17 : vector<8x8xf32>
    %19 = math.exp %18 : vector<8x8xf32>
    %cst_10 = arith.constant dense<0.000000e+00> : vector<8xf32>
    %20 = vector.multi_reduction <add>, %19, %cst_10 [1] : vector<8x8xf32> to vector<8xf32>
    %21 = vector.shape_cast %20 : vector<8xf32> to vector<8x1xf32>
    %22 = tpu.reciprocal %21 {approx = true} : vector<8x1xf32> -> vector<8x1xf32>
    %23 = vector.broadcast %22 : vector<8x1xf32> to vector<8x8xf32>
    %24 = arith.mulf %19, %23 : vector<8x8xf32>
    %25 = vector.extract_strided_slice %24 {offsets = [0, 0], sizes = [8, 1], strides = [1, 1]} : vector<8x8xf32> to vector<8x1xf32>
    %26 = vector.extract_strided_slice %0 {offsets = [0, 0, 0], sizes = [8, 1, 32], strides = [1, 1, 1]} : vector<8x8x32xf32> to vector<8x1x32xf32>
    %27 = vector.shape_cast %26 : vector<8x1x32xf32> to vector<8x32xf32>
    %28 = vector.broadcast %25 : vector<8x1xf32> to vector<8x32xf32>
    %29 = arith.mulf %28, %27 : vector<8x32xf32>
    %30 = vector.extract_strided_slice %24 {offsets = [0, 1], sizes = [8, 1], strides = [1, 1]} : vector<8x8xf32> to vector<8x1xf32>
    %31 = vector.extract_strided_slice %0 {offsets = [0, 1, 0], sizes = [8, 1, 32], strides = [1, 1, 1]} : vector<8x8x32xf32> to vector<8x1x32xf32>
    %32 = vector.shape_cast %31 : vector<8x1x32xf32> to vector<8x32xf32>
    %33 = vector.broadcast %30 : vector<8x1xf32> to vector<8x32xf32>
    %34 = arith.mulf %33, %32 : vector<8x32xf32>
    %35 = arith.addf %29, %34 : vector<8x32xf32>
    %36 = vector.extract_strided_slice %24 {offsets = [0, 2], sizes = [8, 1], strides = [1, 1]} : vector<8x8xf32> to vector<8x1xf32>
    %37 = vector.extract_strided_slice %0 {offsets = [0, 2, 0], sizes = [8, 1, 32], strides = [1, 1, 1]} : vector<8x8x32xf32> to vector<8x1x32xf32>
    %38 = vector.shape_cast %37 : vector<8x1x32xf32> to vector<8x32xf32>
    %39 = vector.broadcast %36 : vector<8x1xf32> to vector<8x32xf32>
    %40 = arith.mulf %39, %38 : vector<8x32xf32>
    %41 = arith.addf %35, %40 : vector<8x32xf32>
    %42 = vector.extract_strided_slice %24 {offsets = [0, 3], sizes = [8, 1], strides = [1, 1]} : vector<8x8xf32> to vector<8x1xf32>
    %43 = vector.extract_strided_slice %0 {offsets = [0, 3, 0], sizes = [8, 1, 32], strides = [1, 1, 1]} : vector<8x8x32xf32> to vector<8x1x32xf32>
    %44 = vector.shape_cast %43 : vector<8x1x32xf32> to vector<8x32xf32>
    %45 = vector.broadcast %42 : vector<8x1xf32> to vector<8x32xf32>
    %46 = arith.mulf %45, %44 : vector<8x32xf32>
    %47 = arith.addf %41, %46 : vector<8x32xf32>
    %48 = vector.extract_strided_slice %24 {offsets = [0, 4], sizes = [8, 1], strides = [1, 1]} : vector<8x8xf32> to vector<8x1xf32>
    %49 = vector.extract_strided_slice %0 {offsets = [0, 4, 0], sizes = [8, 1, 32], strides = [1, 1, 1]} : vector<8x8x32xf32> to vector<8x1x32xf32>
    %50 = vector.shape_cast %49 : vector<8x1x32xf32> to vector<8x32xf32>
    %51 = vector.broadcast %48 : vector<8x1xf32> to vector<8x32xf32>
    %52 = arith.mulf %51, %50 : vector<8x32xf32>
    %53 = arith.addf %47, %52 : vector<8x32xf32>
    %54 = vector.extract_strided_slice %24 {offsets = [0, 5], sizes = [8, 1], strides = [1, 1]} : vector<8x8xf32> to vector<8x1xf32>
    %55 = vector.extract_strided_slice %0 {offsets = [0, 5, 0], sizes = [8, 1, 32], strides = [1, 1, 1]} : vector<8x8x32xf32> to vector<8x1x32xf32>
    %56 = vector.shape_cast %55 : vector<8x1x32xf32> to vector<8x32xf32>
    %57 = vector.broadcast %54 : vector<8x1xf32> to vector<8x32xf32>
    %58 = arith.mulf %57, %56 : vector<8x32xf32>
    %59 = arith.addf %53, %58 : vector<8x32xf32>
    %60 = vector.extract_strided_slice %24 {offsets = [0, 6], sizes = [8, 1], strides = [1, 1]} : vector<8x8xf32> to vector<8x1xf32>
    %61 = vector.extract_strided_slice %0 {offsets = [0, 6, 0], sizes = [8, 1, 32], strides = [1, 1, 1]} : vector<8x8x32xf32> to vector<8x1x32xf32>
    %62 = vector.shape_cast %61 : vector<8x1x32xf32> to vector<8x32xf32>
    %63 = vector.broadcast %60 : vector<8x1xf32> to vector<8x32xf32>
    %64 = arith.mulf %63, %62 : vector<8x32xf32>
    %65 = arith.addf %59, %64 : vector<8x32xf32>
    %66 = vector.extract_strided_slice %24 {offsets = [0, 7], sizes = [8, 1], strides = [1, 1]} : vector<8x8xf32> to vector<8x1xf32>
    %67 = vector.extract_strided_slice %0 {offsets = [0, 7, 0], sizes = [8, 1, 32], strides = [1, 1, 1]} : vector<8x8x32xf32> to vector<8x1x32xf32>
    %68 = vector.shape_cast %67 : vector<8x1x32xf32> to vector<8x32xf32>
    %69 = vector.broadcast %66 : vector<8x1xf32> to vector<8x32xf32>
    %70 = arith.mulf %69, %68 : vector<8x32xf32>
    %71 = arith.addf %65, %70 : vector<8x32xf32>
    %c0_11 = arith.constant 0 : index
    %c0_12 = arith.constant 0 : index
    %72 = vector.load %arg5[%c0_11, %c0_12] : memref<8x32xf32, #tpu.memory_space<vmem>>, vector<8x32xf32>
    tpu.vector_store %arg5[%c0_11, %c0_12], %71 {strides = array<i32>} : memref<8x32xf32, #tpu.memory_space<vmem>>, vector<8x32xf32>,
    %c0_13 = arith.constant 0 : index
    %c0_14 = arith.constant 0 : index
    %73 = vector.load %arg6[%c0_13, %c0_14] : memref<8x8xf32, #tpu.memory_space<vmem>>, vector<8x8xf32>
    tpu.vector_store %arg6[%c0_13, %c0_14], %24 {strides = array<i32>} : memref<8x8xf32, #tpu.memory_space<vmem>>, vector<8x8xf32>,
    return
  }
  func.func @transform_0(%arg0: i32) -> (i32, i32, i32) {
    %c0_i32 = arith.constant 0 : i32
    %c0_i32_0 = arith.constant 0 : i32
    %c0_i32_1 = arith.constant 0 : i32
    return %arg0, %c0_i32, %c0_i32_0 : i32, i32, i32
  }
  func.func @transform_1(%arg0: i32) -> (i32, i32) {
    %c0_i32 = arith.constant 0 : i32
    %c0_i32_0 = arith.constant 0 : i32
    %c0_i32_1 = arith.constant 0 : i32
    return %c0_i32, %c0_i32_0 : i32, i32
  }
  func.func @transform_2(%arg0: i32) -> (i32, i32) {
    %c0_i32 = arith.constant 0 : i32
    %c0_i32_0 = arith.constant 0 : i32
    %c0_i32_1 = arith.constant 0 : i32
    return %c0_i32, %c0_i32_0 : i32, i32
  }
  func.func @transform_3(%arg0: i32) -> (i32, i32) {
    %c0_i32 = arith.constant 0 : i32
    %c0_i32_0 = arith.constant 0 : i32
    %c0_i32_1 = arith.constant 0 : i32
    return %c0_i32, %c0_i32_0 : i32, i32
  }
  func.func @transform_4(%arg0: i32) -> (i32, i32) {
    %c0_i32 = arith.constant 0 : i32
    %c0_i32_0 = arith.constant 0 : i32
    return %arg0, %c0_i32 : i32, i32
  }
  func.func @transform_5(%arg0: i32) -> (i32, i32) {
    %c0_i32 = arith.constant 0 : i32
    %c0_i32_0 = arith.constant 0 : i32
    return %arg0, %c0_i32 : i32, i32
  }
}

</mosaic_0001>

<bundles_post_ra>
// kernel: tpu_custom_call.1
= control target key start
LH: loop header
LB: loop body
LE: loop exit
PB: predicated region body
PF: predicated region fallthrough
CT: control target
= control target key end

     0   :  { %11 = vsyncpa [#allocation3], 0  ;;  %s5658_s0 = inlined_call_operand.hbm [shape: f32[16,8,32], index: 0, kind: input, shape index: {}]   ;;  %s5659_s1 = inlined_call_operand.hbm [shape: bf16[32,128], index: 1, kind: input, shape index: {}]   ;;  %s5660_s2 = inlined_call_operand.vmem [shape: f32[1,128], index: 2, kind: input, shape index: {}]   ;;  %s5661_s3 = inlined_call_operand.vmem [shape: f32[1,128], index: 3, kind: input, shape index: {}]   ;;  %s5662_s4 = inlined_call_operand.hbm [shape: f32[16,32], index: 4, kind: output, shape index: {0}]   ;;  %s5663_s5 = inlined_call_operand.vmem [shape: f32[16,8], index: 5, kind: output, shape index: {1}]  }
   0x1   :  { %13 = vsyncpa [#allocation3 + $0x1], 0 }
   0x2   :  { %14 = vsyncpa [#allocation6], 0 }
   0x3   :  { %15 = vsyncpa [#allocation4], 0 }
   0x4   :  { %17 = vsyncpa [#allocation4 + $0x1], 0  ;;  %s3706_s18 = smov 0   ;;  %s3708_s19 = smov 0  }
   0x5   :  { %s3710_s20 = smov 0   ;;  %s3712_s21 = smov 0  }
   0x6 LB: > { %s3727_s22 = sadd.s32 4294967295, %s3666_s21   ;;  %s3383_s23 = sadd.s32 4294967294, %s3666_s21   ;;  %s3666_s21 = sphi %s3712_s21, %s6187_s21   ;;  %s3662_s20 = sphi %s3710_s20, %s6186_s20   ;;  %s3658_s19 = sphi %s3708_s19, %s6185_s19   ;;  %s3654_s18 = sphi %s3706_s18, %s6184_s18  }
   0x7   : > { %p43_p0 = scmp.ne.s32.totalorder %s3658_s19, %s3654_s18  ;;  %p5664_p1 = scmp.eq.s32.totalorder %s3727_s22, 0 }
   0x8   : > { %p136_p3 = scmp.eq.s32.totalorder %s3383_s23, 1  ;;  %p3384_p5 = scmp.ge.s32.totalorder %s3666_s21, 1 }
   0x9   : > { %p3736_p4 = por %p5664_p1, %p43_p0  ;;  %p169_p7 = scmp.lt.s32.totalorder %s3666_s21, 3 }
   0xa   : > { %p3741_p6 = por %p136_p3, %p43_p0  ;;  %s3668_s27 = smov [#allocation5]  }
   0xb   : > { %s5692_s24 = scalar_select %p3736_p4, 1, 0 }
   0xc   : > { %s5693_s25 = scalar_select %p3741_p6, 1, 0 }
   0xd   : > { %p3746_p8 = pnand %p3384_p5, %p169_p7  ;;  %s181_s28 = sshll.u32 %s3668_s27, 4  ;;  %s3750_s28 = int_to_ptr.vmem [resolvable:$true] %s181_s28 }
   0xe   : > { %s3762_s30 = sadd.s32 1, %s3666_s21   ;;  %s30_s6 = sadd.s32 1, %s3662_s20 }
   0xf   : > { %s5694_s26 = scalar_select %p3746_p8, 1, 0 }
  0x10   : > { %p3438_p9 = pneg %p3746_p8  ;;  %s27_s7 = ssub.s32 %s3666_s21, %s3762_s30 }
  0x11   : > { %s3538_s10 = scalar_lea.hbm %s5659_s1, 256 }
  0x12   : > { %p3757_p11 = pnand %p3438_p9, %p5664_p1  ;;  %p3539_p12 = scmp.ne.s32.totalorder %s5659_s1, %s3538_s10 }
  0x13   : > { %p3545_p5 = scmp.lt.u32.totalorder %s3538_s10, %s5659_s1 }
  0x14   : > { %p3540_p13 = pneg %p3757_p11 }
  0x16   : > { %p3541_p0 = pnand %p3540_p13, %p3539_p12 }
  0x18   : > { %p3542_p3 = pneg %p3541_p0 }
  0x1a   : > { %p3547_p7 = pnand %p3545_p5, %p3542_p3 }
  0x1c   : > { %3550 = shalt.err (!%p3547_p7)
}
  0x1d   : > { %s3551_s15 = scalar_lea.vmem %s3750_s28, 256  ;;  %p3559_p2 = scmp.lt.s32.totalorder %s3750_s28, %s3750_s28 }
  0x1e   : > { %p3552_p9 = scmp.ne.s32.totalorder %s3750_s28, %s3551_s15  ;;  %p3560_p6 = scmp.lt.s32.totalorder %s3551_s15, %s3551_s15 }
  0x20   : > { %p3554_p10 = pnand %p3552_p9, %p3540_p13  ;;  %p3561_p4 = por %p3560_p6, %p3559_p2 }
  0x22   : > { %p3555_p1 = pneg %p3554_p10 }
  0x24   : > { %p3562_p8 = pnand %p3561_p4, %p3555_p1 }
  0x26   : > { %3565 = shalt.err (!%p3562_p8)
}
  0x27   : > { %s3669_s16 = smov 64   ;;  %s3670_s17 = smov 4  }
  0x28   : > { %3441 = dma.hbm_to_vmem [thread:$0]  (!%p3757_p11), %s5659_s1, 256, %s3750_s28, [#allocation6], %s3669_s16, %s3669_s16, %s3670_s17  }
  0x29   : > { %p28_p2 = scmp.eq.s32.totalorder %s27_s7, 0  ;;  %p37_p1 = scmp.ne.s32.totalorder %s3662_s20, %s3658_s19 }
  0x2a   : > { %p38_p4 = scmp.eq.s32.totalorder %s3666_s21, 0  ;;  %p3451_p6 = scmp.lt.s32.totalorder %s3666_s21, 2 }
  0x2b   : > { %s3793_s8 = scalar_select %p28_p2, %s3662_s20, %s30_s6  }
  0x2c   : > { %p39_p8 = por %p38_p4, %p37_p1  ;;  %p5696_p10 = scmp.eq.s32.totalorder %s3727_s22, 1 }
  0x2d   : > { %s201_s10 = sand.u32 1, %s3662_s20   ;;  %s3407_s11 = sshll.u32 %s3666_s21, 10 }
  0x2e   : > { %p3797_p12 = por %p5696_p10, %p37_p1  ;;  %s3387_s12 = sshll.u32 %s201_s10, 6 }
  0x2f   : > { %s3806_s14 = scalar_lea.hbm %s5658_s0, %s3407_s11  ;;  %s205_s28 = scalar_lea.vmem [#allocation2], %s3387_s12 }
  0x30   : > { %s212_s6 = sshll.u32 %s205_s28, 4  ;;  %p3808_p11 = pnand %p3451_p6, %p39_p8  ;;  %s3812_s6 = int_to_ptr.vmem [resolvable:$true] %s212_s6 }
  0x31   : > { %s3814_s15 = scalar_lea.sflag [#allocation3], %s201_s10  ;;  %s3566_s16 = scalar_lea.hbm %s3806_s14, 1024 }
  0x32   : > { %p3567_p13 = scmp.ne.s32.totalorder %s3806_s14, %s3566_s16  ;;  %p3568_p0 = pneg %p3808_p11 }
  0x33   : > { %s3571_s27 = scalar_lea.hbm %s5658_s0, 2048  ;;  %p3572_p7 = scmp.lt.u32.totalorder %s3806_s14, %s5658_s0 }
  0x34   : > { %p3569_p3 = pnand %p3568_p0, %p3567_p13  ;;  %p3573_p9 = scmp.lt.u32.totalorder %s3571_s27, %s3566_s16 }
  0x35   : > { %p3575_p1 = scmp.lt.u32.totalorder %s3566_s16, %s3806_s14 }
  0x36   : > { %p3570_p5 = pneg %p3569_p3  ;;  %p3574_p2 = por %p3573_p9, %p3572_p7 }
  0x38   : > { %p3576_p4 = por %p3575_p1, %p3574_p2 }
  0x3a   : > { %p3577_p6 = pnand %p3576_p4, %p3570_p5 }
  0x3c   : > { %3580 = shalt.err (!%p3577_p6)
}
  0x3d   : > { %s3581_s10 = scalar_lea.vmem %s3812_s6, 1024  ;;  %s3671_s29 = smov [#allocation2]  }
  0x3e   : > { %p3582_p8 = scmp.ne.s32.totalorder %s3812_s6, %s3581_s10  ;;  %s3586_s13 = sshll.u32 %s3671_s29, 4  ;;  %s3587_s13 = int_to_ptr.vmem [resolvable:$false] %s3586_s13 }
  0x3f   : > { %s3588_s28 = scalar_lea.vmem %s3587_s13, 2048  ;;  %p3589_p3 = scmp.lt.s32.totalorder %s3812_s6, %s3587_s13 }
  0x40   : > { %p3584_p10 = pnand %p3582_p8, %p3568_p0  ;;  %p3590_p7 = scmp.lt.s32.totalorder %s3588_s28, %s3581_s10 }
  0x42   : > { %p3585_p13 = pneg %p3584_p10  ;;  %p3591_p9 = por %p3590_p7, %p3589_p3 }
  0x44   : > { %p3592_p2 = pnand %p3591_p9, %p3585_p13 }
  0x46   : > { %3595 = shalt.err (!%p3592_p2)
}
  0x47   : > { %s3672_s16 = smov 128   ;;  %s3673_s17 = smov 8  }
  0x48   : > { %3445 = dma.hbm_to_vmem [thread:$0]  (!%p3808_p11), %s3806_s14, 1024, %s3812_s6, %s3814_s15, %s3672_s16, %s3672_s16, %s3673_s17  }
  0x49   : > { %p5699_p0 = scmp.ne.s32.totalorder %s5694_s26, 0 }
  0x4b   : > { %224 = sbr.rel (%p5699_p0) target bundleno = 1380 (0x564), region = 36 }
  0x52   : > { %s3845_s23 = sand.u32 1, %s3658_s19   ;;  %p5700_p5 = scmp.ne.s32.totalorder %s5692_s24, 0 }
  0x53   : > { %s3391_s27 = sshll.u32 %s3845_s23, 6  ;;  %s227_s11 = scalar_lea.sflag [#allocation3], %s3845_s23 }
  0x54   : > { %s3849_s12 = scalar_lea.vmem [#allocation2], %s3391_s27 }
  0x55   : > { %3641 = dma.done.wait (%p5700_p5), %s227_s11, 1024  }
  0x56   : > { %3643 = vsyncadd (%p5700_p5), %s227_s11, 4294966272  ;;  %p5701_p11 = scmp.eq.s32.totalorder %s3727_s22, 0 }
  0x58   : > { %3645 = dma.done.wait (%p5701_p11), [#allocation6], 256   ;;  %p5702_p1 = pmov %p5701_p11 }
  0x59   : > { %v5667_v0 = vlaneseq  ;;  %v3494_v3 = vld [vmem:[#allocation5] sm:$0xff]   ;;  %v3495_v6 = vld [vmem:[#allocation5 + $0x8] sm:$0xff]   ;;  %v3871_v7 = vld [vmem:[%s3849_s12 + $0x10] sm:$0xff]  ;;  %vm306_vm0 = vcmask 261120   ;;  %vm465_vm1 = vcmask 1041409   ;;  %vm467_vm2 = vcmask 1042434  }
  0x5a   : > { %3647 = vsyncadd (%p5702_p1), [#allocation6], 4294967040  ;;  %v3866_v4 = vld [vmem:[%s3849_s12] sm:$0xff]  ;;  %3414 = vmatprep.subr.bf16.mxu0 %v3494_v3  ;;  %3426 = vmatprep.subr.bf16.mxu1 %v3494_v3  ;;  %v3874_v8 = vld [vmem:[%s3849_s12 + $0x8] sm:$0xff]  ;;  %vm469_vm3 = vcmask 1043459   ;;  %vm471_vm4 = vcmask 1044484  }
  0x5b   : > { %v3860_v1 = vshrl.u32 %v5667_v0, 7  ;;  %3415 = vmatpush3.bf16.msra.mxu0 %v3494_v3  ;;  %3428 = vmatpush3.bf16.msra.mxu1 %v3494_v3  ;;  %v279_v10 = vpack.c.bf16 %v3874_v8, %v3866_v4  ;;  %v3881_v11 = vld [vmem:[%s3849_s12 + $0x18] sm:$0xff]  ;;  %v3884_v12 = vld [vmem:[%s3849_s12 + $0x20] sm:$0xff]  ;;  %v3887_v13 = vld [vmem:[%s3849_s12 + $0x28] sm:$0xff]  ;;  %vm473_vm5 = vcmask 1045509   ;;  %vm475_vm6 = vcmask 1046534  }
  0x5c   : > { %3416 = vmatprep.subr.bf16.mxu0 %v3495_v6  ;;  %v281_v14 = vpack.c.bf16 %v3887_v13, %v3884_v12  ;;  %v3892_v15 = vld [vmem:[%s3849_s12 + $0x30] sm:$0xff]  ;;  %v3895_v16 = vld [vmem:[%s3849_s12 + $0x38] sm:$0xff]  ;;  %3427 = vmatprep.subr.bf16.mxu1 %v3495_v6  ;;  %v280_v18 = vpack.c.bf16 %v3881_v11, %v3871_v7  ;;  %vm477_vm7 = vcmask 1047559   ;;  %vm480_vm8 = vcmask 64512   ;;  %p266_p4 = scmp.lt.s32.totalorder %s3727_s22, 1  ;;  %s3393_s7 = sshll.u32 %s3845_s23, 3 }
  0x5d   : > { %5703 = vst [vmem:[#allocation11_spill] sm:$0xff] %v3860_v1  ;;  %v3863_v2 = vsub.s32 0, %v3860_v1  ;;  %3418 = vmatprep.mubr.msk.bf16.mxu0 %vm306_vm0, %v279_v10  ;;  %v282_v19 = vpack.c.bf16 %v3895_v16, %v3892_v15  ;;  %v3918_v25 = vsub.s32 1, %v3860_v1  ;;  %v3937_v34 = vsub.s32 2, %v3860_v1  ;;  %s3404_s10 = sshll.u32 %s3727_s22, 7  ;;  %s258_s29 = scalar_lea.vmem [#allocation7], %s3393_s7 }
  0x5e   : > { %3422 = vmatprep.mubr.msk.bf16.mxu1 %vm306_vm0, %v281_v14  ;;  %vm3027_vm9 = vcmask 130112   ;;  %vm3034_vm10 = vcmask 195712   ;;  %vm3041_vm11 = vcmask 261312   ;;  %s267_s15 = scalar_select %p266_p4, %s3727_s22, 1 }
  0x5f   : > { %v717_v5 = vrot.slane %v3866_v4, %v3863_v2  ;;  %v755_v9 = vrot.slane %v3871_v7, %v3863_v2  ;;  %v774_v17 = vrot.slane %v3881_v11, %v3863_v2  ;;  %3417 = vmatpush3.bf16.msra.mxu0 %v3495_v6  ;;  %3429 = vmatpush3.bf16.msra.mxu1 %v3495_v6  ;;  %v4002_v6 = vsub.s32 3, %v3860_v1  ;;  %s3276_s13 = sshll.u32 %s258_s29, 4  ;;  %s5600_s17 = scalar_lea.hbm %s5662_s4, %s3404_s10  ;;  %s5602_s13 = int_to_ptr.vmem [resolvable:$true] %s3276_s13 }
  0x60   : > { %v793_v20 = vrot.slane %v3884_v12, %v3863_v2  ;;  %v736_v21 = vrot.slane %v3874_v8, %v3863_v2  ;;  %v812_v22 = vrot.slane %v3887_v13, %v3863_v2  ;;  %v831_v23 = vrot.slane %v3892_v15, %v3863_v2  ;;  %s3394_s28 = sshll.u32 %s267_s15, 3  ;;  %s3259_s24 = scalar_lea.sflag [#allocation4], %s3845_s23 }
  0x61   : > { %719 = vbcast.lane.b32.xlu0 %v717_v5, 256  ;;  %757 = vbcast.lane.b32.xlu1 %v755_v9, 256  ;;  %v850_v24 = vrot.slane %v3895_v16, %v3863_v2  ;;  %v965_v26 = vrot.slane %v3866_v4, %v3918_v25  ;;  %v984_v27 = vrot.slane %v3874_v8, %v3918_v25  ;;  %s3596_s26 = scalar_lea.vmem %s5602_s13, 128  ;;  %s3675_s14 = smov [#allocation7]  }
  0x62   : > { %3419 = vmatmul.mubr.msk.bf16.vlgmr.msra.gmra.mrb[0].mxu0 %vm306_vm0, %v280_v18  ;;  %3423 = vmatmul.mubr.msk.bf16.vlgmr.msra.gmra.mrb[0].mxu1 %vm306_vm0, %v282_v19  ;;  %v1003_v28 = vrot.slane %v3871_v7, %v3918_v25  ;;  %v1022_v29 = vrot.slane %v3881_v11, %v3918_v25  ;;  %v1041_v30 = vrot.slane %v3884_v12, %v3918_v25  ;;  %p3597_p6 = scmp.ne.s32.totalorder %s5602_s13, %s3596_s26  ;;  %s3600_s6 = sshll.u32 %s3675_s14, 4  ;;  %s3601_s6 = int_to_ptr.vmem [resolvable:$false] %s3600_s6 }
  0x63   : > { %v1060_v31 = vrot.slane %v3887_v13, %v3918_v25  ;;  %v1079_v32 = vrot.slane %v3892_v15, %v3918_v25  ;;  %v1098_v33 = vrot.slane %v3895_v16, %v3918_v25  ;;  %v1245_v35 = vrot.slane %v3866_v4, %v3937_v34  ;;  %s3602_s7 = scalar_lea.vmem %s3601_s6, 256  ;;  %p3603_p13 = scmp.lt.s32.totalorder %s5602_s13, %s3601_s6 }
  0x64   : > { %v1264_v36 = vrot.slane %v3874_v8, %v3937_v34  ;;  %v1283_v41 = vrot.slane %v3871_v7, %v3937_v34  ;;  %v1302_v46 = vrot.slane %v3881_v11, %v3937_v34  ;;  %v1321_v50 = vrot.slane %v3884_v12, %v3937_v34  ;;  %p3598_p8 = pnand %p3597_p6, %p3797_p12  ;;  %p3604_p3 = scmp.lt.s32.totalorder %s3602_s7, %s3596_s26 }
  0x65   : > { %723 = vbcast.lane.b32.xlu0 %v717_v5, 264  ;;  %780 = vbcast.lane.b32.xlu1 %v774_v17, 264  ;;  %v1340_v55 = vrot.slane %v3887_v13, %v3937_v34  ;;  %v1359_v59 = vrot.slane %v3892_v15, %v3937_v34  ;;  %v1378_v63 = vrot.slane %v3895_v16, %v3937_v34 }
  0x66   : > { %v1525_v14 = vrot.slane %v3866_v4, %v4002_v6  ;;  %p3599_p10 = pneg %p3598_p8  ;;  %p3605_p7 = por %p3604_p3, %p3603_p13 }
  0x68   : > { %p3606_p9 = pnand %p3605_p7, %p3599_p10 }
  0x69   : > { %727 = vbcast.lane.b32.xlu0 %v717_v5, 272  ;;  %788 = vbcast.lane.b32.xlu1 %v774_v17, 280 }
  0x6d   : > { %731 = vbcast.lane.b32.xlu0 %v717_v5, 280  ;;  %799 = vbcast.lane.b32.xlu1 %v793_v20, 264 }
  0x71   : > { %738 = vbcast.lane.b32.xlu0 %v736_v21, 256  ;;  %807 = vbcast.lane.b32.xlu1 %v793_v20, 280 }
  0x75   : > { %742 = vbcast.lane.b32.xlu0 %v736_v21, 264  ;;  %818 = vbcast.lane.b32.xlu1 %v812_v22, 264 }
  0x79   : > { %746 = vbcast.lane.b32.xlu0 %v736_v21, 272  ;;  %826 = vbcast.lane.b32.xlu1 %v812_v22, 280 }
  0x7d   : > { %750 = vbcast.lane.b32.xlu0 %v736_v21, 280  ;;  %837 = vbcast.lane.b32.xlu1 %v831_v23, 264 }
  0x81   : > { %761 = vbcast.lane.b32.xlu0 %v755_v9, 264  ;;  %845 = vbcast.lane.b32.xlu1 %v831_v23, 280 }
  0x85   : > { %765 = vbcast.lane.b32.xlu0 %v755_v9, 272  ;;  %856 = vbcast.lane.b32.xlu1 %v850_v24, 264 }
  0x89   : > { %769 = vbcast.lane.b32.xlu0 %v755_v9, 280  ;;  %864 = vbcast.lane.b32.xlu1 %v850_v24, 280 }
  0x8d   : > { %776 = vbcast.lane.b32.xlu0 %v774_v17, 256  ;;  %971 = vbcast.lane.b32.xlu1 %v965_v26, 264 }
  0x91   : > { %784 = vbcast.lane.b32.xlu0 %v774_v17, 272  ;;  %979 = vbcast.lane.b32.xlu1 %v965_v26, 280 }
  0x95   : > { %795 = vbcast.lane.b32.xlu0 %v793_v20, 256  ;;  %990 = vbcast.lane.b32.xlu1 %v984_v27, 264 }
  0x99   : > { %803 = vbcast.lane.b32.xlu0 %v793_v20, 272  ;;  %998 = vbcast.lane.b32.xlu1 %v984_v27, 280  ;;  %v1544_v20 = vrot.slane %v3874_v8, %v4002_v6 }
  0x9d   : > { %814 = vbcast.lane.b32.xlu0 %v812_v22, 256  ;;  %1009 = vbcast.lane.b32.xlu1 %v1003_v28, 264 }
  0xa1   : > { %822 = vbcast.lane.b32.xlu0 %v812_v22, 272  ;;  %1017 = vbcast.lane.b32.xlu1 %v1003_v28, 280 }
  0xa5   : > { %833 = vbcast.lane.b32.xlu0 %v831_v23, 256  ;;  %1028 = vbcast.lane.b32.xlu1 %v1022_v29, 264 }
  0xa9   : > { %841 = vbcast.lane.b32.xlu0 %v831_v23, 272  ;;  %1036 = vbcast.lane.b32.xlu1 %v1022_v29, 280 }
  0xad   : > { %852 = vbcast.lane.b32.xlu0 %v850_v24, 256  ;;  %1047 = vbcast.lane.b32.xlu1 %v1041_v30, 264 }
  0xb1   : > { %860 = vbcast.lane.b32.xlu0 %v850_v24, 272  ;;  %1055 = vbcast.lane.b32.xlu1 %v1041_v30, 280  ;;  %v1563_v24 = vrot.slane %v3871_v7, %v4002_v6 }
  0xb5   : > { %967 = vbcast.lane.b32.xlu0 %v965_v26, 256  ;;  %1066 = vbcast.lane.b32.xlu1 %v1060_v31, 264 }
  0xb9   : > { %975 = vbcast.lane.b32.xlu0 %v965_v26, 272  ;;  %1074 = vbcast.lane.b32.xlu1 %v1060_v31, 280 }
  0xbd   : > { %986 = vbcast.lane.b32.xlu0 %v984_v27, 256  ;;  %1085 = vbcast.lane.b32.xlu1 %v1079_v32, 264 }
  0xc1   : > { %994 = vbcast.lane.b32.xlu0 %v984_v27, 272  ;;  %1093 = vbcast.lane.b32.xlu1 %v1079_v32, 280 }
  0xc5   : > { %1005 = vbcast.lane.b32.xlu0 %v1003_v28, 256  ;;  %1104 = vbcast.lane.b32.xlu1 %v1098_v33, 264 }
  0xc9   : > { %1013 = vbcast.lane.b32.xlu0 %v1003_v28, 272  ;;  %1112 = vbcast.lane.b32.xlu1 %v1098_v33, 280 }
  0xcd   : > { %1024 = vbcast.lane.b32.xlu0 %v1022_v29, 256  ;;  %1251 = vbcast.lane.b32.xlu1 %v1245_v35, 264 }
  0xd1   : > { %1032 = vbcast.lane.b32.xlu0 %v1022_v29, 272  ;;  %1259 = vbcast.lane.b32.xlu1 %v1245_v35, 280 }
  0xd3   : > { %v3943_v37 = vpop.permute.xlu0 %719  ;;  %v3945_v38 = vpop.permute.xlu1 %757 }
  0xd4   : > { %5704 = vst [vmem:[#allocation12_spill] sm:$0xff] %v3943_v37  ;;  %5705 = vst [vmem:[#allocation13_spill] sm:$0xff] %v3945_v38 }
  0xd5   : > { %1043 = vbcast.lane.b32.xlu0 %v1041_v30, 256  ;;  %1270 = vbcast.lane.b32.xlu1 %v1264_v36, 264 }
  0xd7   : > { %v3947_v39 = vpop.permute.xlu0 %723  ;;  %v3949_v40 = vpop.permute.xlu1 %780 }
  0xd8   : > { %5706 = vst [vmem:[#allocation14_spill] sm:$0xff] %v3947_v39  ;;  %5707 = vst [vmem:[#allocation15_spill] sm:$0xff] %v3949_v40 }
  0xd9   : > { %1051 = vbcast.lane.b32.xlu0 %v1041_v30, 272  ;;  %1278 = vbcast.lane.b32.xlu1 %v1264_v36, 280 }
  0xdb   : > { %v3953_v42 = vpop.permute.xlu0 %727  ;;  %v3955_v43 = vpop.permute.xlu1 %788 }
  0xdc   : > { %5708 = vst [vmem:[#allocation16_spill] sm:$0xff] %v3953_v42  ;;  %5709 = vst [vmem:[#allocation17_spill] sm:$0xff] %v3955_v43 }
  0xdd   : > { %1062 = vbcast.lane.b32.xlu0 %v1060_v31, 256  ;;  %1289 = vbcast.lane.b32.xlu1 %v1283_v41, 264 }
  0xdf   : > { %v3957_v44 = vpop.permute.xlu0 %731  ;;  %v3959_v45 = vpop.permute.xlu1 %799 }
  0xe0   : > { %5710 = vst [vmem:[#allocation18_spill] sm:$0xff] %v3957_v44  ;;  %5711 = vst [vmem:[#allocation19_spill] sm:$0xff] %v3959_v45 }
  0xe1   : > { %1070 = vbcast.lane.b32.xlu0 %v1060_v31, 272  ;;  %1297 = vbcast.lane.b32.xlu1 %v1283_v41, 280 }
  0xe3   : > { %v3963_v47 = vpop.permute.xlu0 %738  ;;  %v3965_v48 = vpop.permute.xlu1 %807 }
  0xe4   : > { %5712 = vst [vmem:[#allocation20_spill] sm:$0xff] %v3963_v47  ;;  %5713 = vst [vmem:[#allocation21_spill] sm:$0xff] %v3965_v48 }
  0xe5   : > { %1081 = vbcast.lane.b32.xlu0 %v1079_v32, 256  ;;  %1308 = vbcast.lane.b32.xlu1 %v1302_v46, 264 }
  0xe7   : > { %v3967_v49 = vpop.permute.xlu0 %742  ;;  %v3971_v51 = vpop.permute.xlu1 %818 }
  0xe8   : > { %5714 = vst [vmem:[#allocation22_spill] sm:$0xff] %v3967_v49  ;;  %5715 = vst [vmem:[#allocation23_spill] sm:$0xff] %v3971_v51 }
  0xe9   : > { %1089 = vbcast.lane.b32.xlu0 %v1079_v32, 272  ;;  %1316 = vbcast.lane.b32.xlu1 %v1302_v46, 280 }
  0xeb   : > { %v3973_v52 = vpop.permute.xlu0 %746  ;;  %v3977_v54 = vpop.permute.xlu1 %826 }
  0xec   : > { %5716 = vst [vmem:[#allocation24_spill] sm:$0xff] %v3973_v52  ;;  %5718 = vst [vmem:[#allocation26_spill] sm:$0xff] %v3977_v54 }
  0xed   : > { %1100 = vbcast.lane.b32.xlu0 %v1098_v33, 256  ;;  %1327 = vbcast.lane.b32.xlu1 %v1321_v50, 264 }
  0xef   : > { %v3975_v53 = vpop.permute.xlu0 %750  ;;  %v3983_v57 = vpop.permute.xlu1 %837 }
  0xf0   : > { %5717 = vst [vmem:[#allocation25_spill] sm:$0xff] %v3975_v53  ;;  %5720 = vst [vmem:[#allocation28_spill] sm:$0xff] %v3983_v57  ;;  %v4210_v53 = vsub.s32 5, %v3860_v1 }
  0xf1   : > { %1108 = vbcast.lane.b32.xlu0 %v1098_v33, 272  ;;  %1335 = vbcast.lane.b32.xlu1 %v1321_v50, 280 }
  0xf3   : > { %v3981_v56 = vpop.permute.xlu0 %761  ;;  %v3991_v61 = vpop.permute.xlu1 %845 }
  0xf4   : > { %5719 = vst [vmem:[#allocation27_spill] sm:$0xff] %v3981_v56  ;;  %5723 = vst [vmem:[#allocation31_spill] sm:$0xff] %v3991_v61 }
  0xf5   : > { %1247 = vbcast.lane.b32.xlu0 %v1245_v35, 256  ;;  %1346 = vbcast.lane.b32.xlu1 %v1340_v55, 264 }
  0xf7   : > { %v3985_v58 = vpop.permute.xlu0 %765  ;;  %v3997_v3 = vpop.permute.xlu1 %856 }
  0xf8   : > { %5721 = vst [vmem:[#allocation29_spill] sm:$0xff] %v3985_v58  ;;  %5725 = vst [vmem:[#allocation33_spill] sm:$0xff] %v3997_v3 }
  0xf9   : > { %1255 = vbcast.lane.b32.xlu0 %v1245_v35, 272  ;;  %1354 = vbcast.lane.b32.xlu1 %v1340_v55, 280 }
  0xfb   : > { %v3989_v60 = vpop.permute.xlu0 %769  ;;  %v4006_v10 = vpop.permute.xlu1 %864 }
  0xfc   : > { %5722 = vst [vmem:[#allocation30_spill] sm:$0xff] %v3989_v60 }
  0xfd   : > { %1266 = vbcast.lane.b32.xlu0 %v1264_v36, 256  ;;  %1365 = vbcast.lane.b32.xlu1 %v1359_v59, 264 }
  0xff   : > { %v3993_v62 = vpop.permute.xlu0 %776  ;;  %v4012_v18 = vpop.permute.xlu1 %971 }
 0x100   : > { %5724 = vst [vmem:[#allocation32_spill] sm:$0xff] %v3993_v62  ;;  %5729 = vst [vmem:[#allocation37_spill] sm:$0xff] %v4012_v18 }
 0x101   : > { %1274 = vbcast.lane.b32.xlu0 %v1264_v36, 272  ;;  %1373 = vbcast.lane.b32.xlu1 %v1359_v59, 280 }
 0x103   : > { %v3999_v5 = vpop.permute.xlu0 %784  ;;  %v4020_v22 = vpop.permute.xlu1 %979 }
 0x104   : > { %5726 = vst [vmem:[#allocation34_spill] sm:$0xff] %v3999_v5  ;;  %5731 = vst [vmem:[#allocation39_spill] sm:$0xff] %v4020_v22 }
 0x105   : > { %1285 = vbcast.lane.b32.xlu0 %v1283_v41, 256  ;;  %1384 = vbcast.lane.b32.xlu1 %v1378_v63, 264 }
 0x107   : > { %v4004_v9 = vpop.permute.xlu0 %795  ;;  %v4026_v26 = vpop.permute.xlu1 %990 }
 0x108   : > { %5727 = vst [vmem:[#allocation35_spill] sm:$0xff] %v4004_v9  ;;  %5732 = vst [vmem:[#allocation40_spill] sm:$0xff] %v4026_v26 }
 0x109   : > { %1293 = vbcast.lane.b32.xlu0 %v1283_v41, 272  ;;  %1392 = vbcast.lane.b32.xlu1 %v1378_v63, 280 }
 0x10b   : > { %v4010_v17 = vpop.permute.xlu0 %803  ;;  %v4032_v29 = vpop.permute.xlu1 %998 }
 0x10c   : > { %5728 = vst [vmem:[#allocation36_spill] sm:$0xff] %v4010_v17  ;;  %5733 = vst [vmem:[#allocation41_spill] sm:$0xff] %v4032_v29 }
 0x10d   : > { %1304 = vbcast.lane.b32.xlu0 %v1302_v46, 256  ;;  %1531 = vbcast.lane.b32.xlu1 %v1525_v14, 264 }
 0x10f   : > { %v4014_v19 = vpop.permute.xlu0 %814  ;;  %v4036_v31 = vpop.permute.xlu1 %1009 }
 0x110   : > { %5730 = vst [vmem:[#allocation38_spill] sm:$0xff] %v4014_v19  ;;  %5734 = vst [vmem:[#allocation42_spill] sm:$0xff] %v4036_v31 }
 0x111   : > { %1312 = vbcast.lane.b32.xlu0 %v1302_v46, 272  ;;  %1539 = vbcast.lane.b32.xlu1 %v1525_v14, 280 }
 0x113   : > { %v4018_v21 = vpop.permute.xlu0 %822  ;;  %v4042_v35 = vpop.permute.xlu1 %1017 }
 0x114   : > { %5737 = vst [vmem:[#allocation45_spill] sm:$0xff] %v4042_v35 }
 0x115   : > { %1323 = vbcast.lane.b32.xlu0 %v1321_v50, 256  ;;  %1550 = vbcast.lane.b32.xlu1 %v1544_v20, 264 }
 0x117   : > { %v4022_v23 = vpop.permute.xlu0 %833  ;;  %v4046_v41 = vpop.permute.xlu1 %1028 }
 0x118   : > { %5739 = vst [vmem:[#allocation47_spill] sm:$0xff] %v4046_v41 }
 0x119   : > { %1331 = vbcast.lane.b32.xlu0 %v1321_v50, 272  ;;  %1558 = vbcast.lane.b32.xlu1 %v1544_v20, 280  ;;  %v3395_v50 = vld [vmem:[%s5660_s2] ss:$0 sm:$0xff] }
 0x11b   : > { %v4028_v27 = vpop.permute.xlu0 %841 }
 0x11d   : > { %1342 = vbcast.lane.b32.xlu0 %v1340_v55, 256  ;;  %1569 = vbcast.lane.b32.xlu1 %v1563_v24, 264 }
 0x11f   : > { %v4030_v28 = vpop.permute.xlu0 %852 }
 0x121   : > { %1350 = vbcast.lane.b32.xlu0 %v1340_v55, 272  ;;  %1577 = vbcast.lane.b32.xlu1 %v1563_v24, 280 }
 0x123   : > { %v4034_v30 = vpop.permute.xlu0 %860 }
 0x125   : > { %1361 = vbcast.lane.b32.xlu0 %v1359_v59, 256 }
 0x127   : > { %v4038_v32 = vpop.permute.xlu0 %967 }
 0x128   : > { %5735 = vst [vmem:[#allocation43_spill] sm:$0xff] %v4038_v32 }
 0x129   : > { %1369 = vbcast.lane.b32.xlu0 %v1359_v59, 272  ;;  %v4055_v59 = vpop.permute.xlu1 %1036 }
 0x12a   : > { %5742 = vst [vmem:[#allocation50_spill] sm:$0xff] %v4055_v59 }
 0x12b   : > { %v4040_v33 = vpop.permute.xlu0 %975 }
 0x12c   : > { %5736 = vst [vmem:[#allocation44_spill] sm:$0xff] %v4040_v33 }
 0x12d   : > { %1380 = vbcast.lane.b32.xlu0 %v1378_v63, 256  ;;  %v4059_v59 = vpop.permute.xlu1 %1047 }
 0x12e   : > { %5744 = vst [vmem:[#allocation52_spill] sm:$0xff] %v4059_v59 }
 0x12f   : > { %v4044_v36 = vpop.permute.xlu0 %986 }
 0x130   : > { %5738 = vst [vmem:[#allocation46_spill] sm:$0xff] %v4044_v36 }
 0x131   : > { %1388 = vbcast.lane.b32.xlu0 %v1378_v63, 272 }
 0x133   : > { %v4048_v46 = vpop.permute.xlu0 %994 }
 0x134   : > { %5740 = vst [vmem:[#allocation48_spill] sm:$0xff] %v4048_v46 }
 0x135   : > { %1527 = vbcast.lane.b32.xlu0 %v1525_v14, 256  ;;  %v3420_v0 = vpop.f32.mrb[0].mxu0  ;;  %v3424_v61 = vpop.f32.mrb[0].mxu1 }
 0x136   : > { %v362_v3 = vadd.f32 %v3420_v0, %v3395_v50  ;;  %v353_v54 = vpop.f32.mrb[1].mxu0  ;;  %v369_v57 = vpop.f32.mrb[1].mxu1  ;;  %v3402_v0 = vld [vmem:[%s5661_s3] ss:$0 sm:$0xff] }
 0x137   : > { %v4053_v55 = vpop.permute.xlu0 %1005  ;;  %v3421_v63 = vpop.f32.mrb[2].mxu0 }
 0x138   : > { %5741 = vst [vmem:[#allocation49_spill] sm:$0xff] %v4053_v55  ;;  %v3425_v19 = vpop.f32.mrb[2].mxu1  ;;  %3496 = vtanh.f32 %v362_v3  ;;  %v365_v51 = vadd.f32 %v3421_v63, %v3395_v50  ;;  %v356_v17 = vpop.f32.mrb[3].mxu0 }
 0x139   : > { %1535 = vbcast.lane.b32.xlu0 %v1525_v14, 272  ;;  %v372_v48 = vpop.f32.mrb[3].mxu1  ;;  %v381_v5 = vadd.f32 %v3425_v19, %v3395_v50 }
 0x13a   : > { %v373_v9 = vadd.f32 %v3395_v50, %v372_v48  ;;  %3498 = vtanh.f32 %v365_v51  ;;  %v4068_v48 = vpop.permute.xlu1 %1055 }
 0x13b   : > { %v4057_v45 = vpop.permute.xlu0 %1013  ;;  %3500 = vtanh.f32 %v381_v5  ;;  %5747 = vst [vmem:[#allocation55_spill] sm:$0xff] %v4068_v48 }
 0x13c   : > { %5743 = vst [vmem:[#allocation51_spill] sm:$0xff] %v4057_v45  ;;  %3502 = vtanh.f32 %v373_v9 }
 0x13d   : > { %1546 = vbcast.lane.b32.xlu0 %v1544_v20, 256 }
 0x13e   : > { %v4072_v9 = vpop.permute.xlu1 %1066 }
 0x13f   : > { %v4061_v14 = vpop.permute.xlu0 %1024  ;;  %5749 = vst [vmem:[#allocation57_spill] sm:$0xff] %v4072_v9 }
 0x140   : > { %5745 = vst [vmem:[#allocation53_spill] sm:$0xff] %v4061_v14 }
 0x141   : > { %1554 = vbcast.lane.b32.xlu0 %v1544_v20, 272 }
 0x142   : > { %v3497_v63 = vpop.eup %3496  ;;  %v4078_v48 = vpop.permute.xlu1 %1074 }
 0x143   : > { %v4066_v3 = vpop.permute.xlu0 %1032  ;;  %v401_v43 = vmul.f32 %v3497_v63, %v3402_v0  ;;  %5752 = vst [vmem:[#allocation60_spill] sm:$0xff] %v4078_v48  ;;  %v378_v63 = vadd.f32 %v3424_v61, %v3395_v50 }
 0x144   : > { %5746 = vst [vmem:[#allocation54_spill] sm:$0xff] %v4066_v3  ;;  %v3499_v51 = vpop.eup %3498 }
 0x145   : > { %1565 = vbcast.lane.b32.xlu0 %v1563_v24, 256  ;;  %411 = vadd.xlane.f32.xlu1 %v401_v43  ;;  %v402_v20 = vmul.f32 %v3499_v51, %v3402_v0  ;;  %v3501_v59 = vpop.eup %3500  ;;  %v354_v43 = vadd.f32 %v3395_v50, %v353_v54  ;;  %3504 = vtanh.f32 %v378_v63 }
 0x146   : > { %v3503_v5 = vpop.eup %3502  ;;  %v406_v41 = vmul.f32 %v3501_v59, %v3402_v0  ;;  %v4082_v51 = vpop.permute.xlu1 %1085 }
 0x147   : > { %v4070_v19 = vpop.permute.xlu0 %1043  ;;  %v404_v62 = vmul.f32 %v3503_v5, %v3402_v0  ;;  %5753 = vst [vmem:[#allocation61_spill] sm:$0xff] %v4082_v51  ;;  %3506 = vtanh.f32 %v354_v43  ;;  %v1582_v5 = vrot.slane %v3881_v11, %v4002_v6 }
 0x148   : > { %5748 = vst [vmem:[#allocation56_spill] sm:$0xff] %v4070_v19 }
 0x149   : > { %1573 = vbcast.lane.b32.xlu0 %v1563_v24, 272  ;;  %413 = vadd.xlane.f32.xlu1 %v402_v20  ;;  %v370_v20 = vadd.f32 %v3395_v50, %v369_v57  ;;  %v1601_v57 = vrot.slane %v3884_v12, %v4002_v6 }
 0x14a   : > { %v4088_v59 = vpop.permute.xlu1 %1093 }
 0x14b   : > { %v4074_v14 = vpop.permute.xlu0 %1051  ;;  %5754 = vst [vmem:[#allocation62_spill] sm:$0xff] %v4088_v59  ;;  %3508 = vtanh.f32 %v370_v20 }
 0x14c   : > { %5750 = vst [vmem:[#allocation58_spill] sm:$0xff] %v4074_v14 }
 0x14d   : > { %421 = vadd.xlane.f32.xlu1 %v406_v41  ;;  %v357_v41 = vadd.f32 %v3395_v50, %v356_v17 }
 0x14e   : > { %v4092_v54 = vpop.permute.xlu1 %1104 }
 0x14f   : > { %v4076_v3 = vpop.permute.xlu0 %1062  ;;  %v3505_v61 = vpop.eup %3504  ;;  %3510 = vtanh.f32 %v357_v41  ;;  %5755 = vst [vmem:[#allocation63_spill] sm:$0xff] %v4092_v54 }
 0x150   : > { %5751 = vst [vmem:[#allocation59_spill] sm:$0xff] %v4076_v3  ;;  %v405_v63 = vmul.f32 %v3505_v61, %v3402_v0  ;;  %v1620_v61 = vrot.slane %v3887_v13, %v4002_v6 }
 0x151   : > { %v3507_v48 = vpop.eup %3506 }
 0x152   : > { %v399_v43 = vmul.f32 %v3507_v48, %v3402_v0  ;;  %v4098_v17 = vpop.permute.xlu1 %1112 }
 0x153   : > { %v4080_v24 = vpop.permute.xlu0 %1070 }
 0x155   : > { %v3509_v59 = vpop.eup %3508 }
 0x156   : > { %v403_v20 = vmul.f32 %v3509_v59, %v3402_v0  ;;  %v4104_v54 = vpop.permute.xlu1 %1251 }
 0x157   : > { %v4084_v19 = vpop.permute.xlu0 %1081  ;;  %5756 = vst [vmem:[#allocation64_spill] sm:$0xff] %v4104_v54  ;;  %v3536_v54 = vld [vmem:[%s3849_s12] sm:$0xff] }
 0x159   : > { %v3511_v41 = vpop.eup %3510 }
 0x15a   : > { %v400_v9 = vmul.f32 %v3511_v41, %v3402_v0  ;;  %v4108_v48 = vpop.permute.xlu1 %1259 }
 0x15b   : > { %v4090_v3 = vpop.permute.xlu0 %1089  ;;  %5758 = vst [vmem:[#allocation66_spill] sm:$0xff] %v4108_v48 }
 0x15e   : > { %1588 = vbcast.lane.b32.xlu1 %v1582_v5, 264 }
 0x15f   : > { %v4094_v51 = vpop.permute.xlu0 %1100 }
 0x162   : > { %1596 = vbcast.lane.b32.xlu1 %v1582_v5, 280 }
 0x163   : > { %v4100_v50 = vpop.permute.xlu0 %1108 }
 0x166   : > { %1607 = vbcast.lane.b32.xlu1 %v1601_v57, 264 }
 0x167   : > { %v4106_v14 = vpop.permute.xlu0 %1247 }
 0x168   : > { %419 = vadd.xlane.f32.xlu0 %v405_v63  ;;  %5757 = vst [vmem:[#allocation65_spill] sm:$0xff] %v4106_v14 }
 0x16a   : > { %1615 = vbcast.lane.b32.xlu1 %v1601_v57, 280 }
 0x16b   : > { %v4110_v63 = vpop.permute.xlu0 %1255 }
 0x16c   : > { %407 = vadd.xlane.f32.xlu0 %v399_v43  ;;  %5759 = vst [vmem:[#allocation67_spill] sm:$0xff] %v4110_v63  ;;  %v4112_v43 = vpop.permute.xlu1 %1270 }
 0x16d   : > { %5760 = vst [vmem:[#allocation68_spill] sm:$0xff] %v4112_v43 }
 0x16e   : > { %1626 = vbcast.lane.b32.xlu1 %v1620_v61, 264 }
 0x16f   : > { %v4114_v59 = vpop.permute.xlu0 %1266 }
 0x170   : > { %415 = vadd.xlane.f32.xlu0 %v403_v20  ;;  %5761 = vst [vmem:[#allocation69_spill] sm:$0xff] %v4114_v59  ;;  %v4116_v40 = vpop.permute.xlu1 %1278 }
 0x171   : > { %5762 = vst [vmem:[#allocation70_spill] sm:$0xff] %v4116_v40 }
 0x172   : > { %1634 = vbcast.lane.b32.xlu1 %v1620_v61, 280 }
 0x173   : > { %v4118_v45 = vpop.permute.xlu0 %1274 }
 0x174   : > { %409 = vadd.xlane.f32.xlu0 %v400_v9  ;;  %5763 = vst [vmem:[#allocation71_spill] sm:$0xff] %v4118_v45  ;;  %v4120_v20 = vpop.permute.xlu1 %1289 }
 0x175   : > { %5764 = vst [vmem:[#allocation72_spill] sm:$0xff] %v4120_v20 }
 0x177   : > { %v4122_v0 = vpop.permute.xlu0 %1285 }
 0x178   : > { %5765 = vst [vmem:[#allocation73_spill] sm:$0xff] %v4122_v0  ;;  %v4124_v9 = vpop.permute.xlu1 %1297 }
 0x179   : > { %5766 = vst [vmem:[#allocation74_spill] sm:$0xff] %v4124_v9 }
 0x17b   : > { %v4126_v41 = vpop.permute.xlu0 %1293 }
 0x17c   : > { %5767 = vst [vmem:[#allocation75_spill] sm:$0xff] %v4126_v41  ;;  %v4128_v58 = vpop.permute.xlu1 %1308 }
 0x17d   : > { %5768 = vst [vmem:[#allocation76_spill] sm:$0xff] %v4128_v58 }
 0x17f   : > { %v4130_v35 = vpop.permute.xlu0 %1304 }
 0x180   : > { %5769 = vst [vmem:[#allocation77_spill] sm:$0xff] %v4130_v35  ;;  %v4132_v60 = vpop.permute.xlu1 %1316 }
 0x181   : > { %5770 = vst [vmem:[#allocation78_spill] sm:$0xff] %v4132_v60 }
 0x183   : > { %v4134_v55 = vpop.permute.xlu0 %1312 }
 0x184   : > { %5771 = vst [vmem:[#allocation79_spill] sm:$0xff] %v4134_v55  ;;  %v4138_v0 = vpop.permute.xlu1 %1327  ;;  %v4149_v55 = vsub.s32 4, %v3860_v1 }
 0x185   : > { %5772 = vst [vmem:[#allocation80_spill] sm:$0xff] %v4138_v0 }
 0x186   : > { %v1805_v0 = vrot.slane %v3866_v4, %v4149_v55 }
 0x187   : > { %v4140_v41 = vpop.permute.xlu0 %1323 }
 0x188   : > { %5773 = vst [vmem:[#allocation81_spill] sm:$0xff] %v4140_v41  ;;  %v4144_v35 = vpop.permute.xlu1 %1335 }
 0x189   : > { %5774 = vst [vmem:[#allocation82_spill] sm:$0xff] %v4144_v35 }
 0x18a   : > { %1584 = vbcast.lane.b32.xlu0 %v1582_v5, 256 }
 0x18e   : > { %1592 = vbcast.lane.b32.xlu0 %v1582_v5, 272  ;;  %v1639_v5 = vrot.slane %v3892_v15, %v4002_v6 }
 0x192   : > { %1603 = vbcast.lane.b32.xlu0 %v1601_v57, 256 }
 0x196   : > { %1611 = vbcast.lane.b32.xlu0 %v1601_v57, 272  ;;  %417 = vadd.xlane.f32.xlu1 %v404_v62  ;;  %v1658_v57 = vrot.slane %v3895_v16, %v4002_v6  ;;  %v4146_v62 = vpop.permute.xlu0 %1331 }
 0x197   : > { %5775 = vst [vmem:[#allocation83_spill] sm:$0xff] %v4146_v62  ;;  %v1824_v62 = vrot.slane %v3874_v8, %v4149_v55 }
 0x19a   : > { %1622 = vbcast.lane.b32.xlu0 %v1620_v61, 256  ;;  %v4155_v41 = vpop.permute.xlu0 %1342 }
 0x19b   : > { %5777 = vst [vmem:[#allocation85_spill] sm:$0xff] %v4155_v41 }
 0x19e   : > { %1630 = vbcast.lane.b32.xlu0 %v1620_v61, 272  ;;  %v4151_v61 = vpop.permute.xlu1 %1346  ;;  %v4159_v35 = vpop.permute.xlu0 %1350 }
 0x19f   : > { %5776 = vst [vmem:[#allocation84_spill] sm:$0xff] %v4151_v61 }
 0x1a2   : > { %1641 = vbcast.lane.b32.xlu0 %v1639_v5, 256  ;;  %v4157_v60 = vpop.permute.xlu1 %1354  ;;  %v4165_v61 = vpop.permute.xlu0 %1361 }
 0x1a3   : > { %5778 = vst [vmem:[#allocation86_spill] sm:$0xff] %v4157_v60 }
 0x1a6   : > { %1649 = vbcast.lane.b32.xlu0 %v1639_v5, 272  ;;  %v4163_v58 = vpop.permute.xlu1 %1365  ;;  %v4171_v60 = vpop.permute.xlu0 %1369 }
 0x1a7   : > { %1645 = vbcast.lane.b32.xlu1 %v1639_v5, 264  ;;  %5779 = vst [vmem:[#allocation87_spill] sm:$0xff] %v4163_v58 }
 0x1aa   : > { %1660 = vbcast.lane.b32.xlu0 %v1658_v57, 256  ;;  %v4169_v41 = vpop.permute.xlu1 %1373  ;;  %v4177_v58 = vpop.permute.xlu0 %1380 }
 0x1ab   : > { %1653 = vbcast.lane.b32.xlu1 %v1639_v5, 280  ;;  %v1843_v5 = vrot.slane %v3871_v7, %v4149_v55  ;;  %5780 = vst [vmem:[#allocation88_spill] sm:$0xff] %v4169_v41 }
 0x1ae   : > { %1668 = vbcast.lane.b32.xlu0 %v1658_v57, 272  ;;  %v4173_v9 = vpop.permute.xlu1 %1384  ;;  %v4181_v20 = vpop.permute.xlu0 %1388 }
 0x1af   : > { %1664 = vbcast.lane.b32.xlu1 %v1658_v57, 264  ;;  %5781 = vst [vmem:[#allocation89_spill] sm:$0xff] %v4173_v9  ;;  %5783 = vst [vmem:[#allocation91_spill] sm:$0xff] %v4181_v20  ;;  %v4471_v20 = vsub.s32 7, %v3860_v1 }
 0x1b2   : > { %1807 = vbcast.lane.b32.xlu0 %v1805_v0, 256  ;;  %v4179_v38 = vpop.permute.xlu1 %1392  ;;  %v4187_v9 = vpop.permute.xlu0 %1527 }
 0x1b3   : > { %1672 = vbcast.lane.b32.xlu1 %v1658_v57, 280  ;;  %v1862_v57 = vrot.slane %v3881_v11, %v4149_v55  ;;  %5782 = vst [vmem:[#allocation90_spill] sm:$0xff] %v4179_v38  ;;  %5785 = vst [vmem:[#allocation93_spill] sm:$0xff] %v4187_v9 }
 0x1b6   : > { %1815 = vbcast.lane.b32.xlu0 %v1805_v0, 272  ;;  %v4185_v41 = vpop.permute.xlu1 %1531  ;;  %v4193_v56 = vpop.permute.xlu0 %1535 }
 0x1b7   : > { %1811 = vbcast.lane.b32.xlu1 %v1805_v0, 264  ;;  %5784 = vst [vmem:[#allocation92_spill] sm:$0xff] %v4185_v41  ;;  %5787 = vst [vmem:[#allocation95_spill] sm:$0xff] %v4193_v56 }
 0x1ba   : > { %1826 = vbcast.lane.b32.xlu0 %v1824_v62, 256  ;;  %v4191_v31 = vpop.permute.xlu1 %1539  ;;  %v4199_v46 = vpop.permute.xlu0 %1546 }
 0x1bb   : > { %1819 = vbcast.lane.b32.xlu1 %v1805_v0, 280  ;;  %v1881_v0 = vrot.slane %v3884_v12, %v4149_v55  ;;  %5786 = vst [vmem:[#allocation94_spill] sm:$0xff] %v4191_v31  ;;  %5789 = vst [vmem:[#allocation97_spill] sm:$0xff] %v4199_v46 }
 0x1be   : > { %1834 = vbcast.lane.b32.xlu0 %v1824_v62, 272  ;;  %v4195_v45 = vpop.permute.xlu1 %1550  ;;  %v4203_v40 = vpop.permute.xlu0 %1554 }
 0x1bf   : > { %1830 = vbcast.lane.b32.xlu1 %v1824_v62, 264  ;;  %5788 = vst [vmem:[#allocation96_spill] sm:$0xff] %v4195_v45  ;;  %5791 = vst [vmem:[#allocation99_spill] sm:$0xff] %v4203_v40 }
 0x1c2   : > { %1845 = vbcast.lane.b32.xlu0 %v1843_v5, 256  ;;  %v4201_v52 = vpop.permute.xlu1 %1558  ;;  %v4212_v59 = vpop.permute.xlu0 %1565 }
 0x1c3   : > { %1838 = vbcast.lane.b32.xlu1 %v1824_v62, 280  ;;  %v1900_v62 = vrot.slane %v3887_v13, %v4149_v55  ;;  %5790 = vst [vmem:[#allocation98_spill] sm:$0xff] %v4201_v52  ;;  %5793 = vst [vmem:[#allocation101_spill] sm:$0xff] %v4212_v59  ;;  %v2104_v59 = vrot.slane %v3874_v8, %v4210_v53 }
 0x1c6   : > { %1853 = vbcast.lane.b32.xlu0 %v1843_v5, 272  ;;  %v4207_v29 = vpop.permute.xlu1 %1569  ;;  %v4218_v40 = vpop.permute.xlu0 %1573 }
 0x1c7   : > { %1849 = vbcast.lane.b32.xlu1 %v1843_v5, 264  ;;  %5792 = vst [vmem:[#allocation100_spill] sm:$0xff] %v4207_v29  ;;  %5795 = vst [vmem:[#allocation103_spill] sm:$0xff] %v4218_v40  ;;  %v2123_v40 = vrot.slane %v3871_v7, %v4210_v53  ;;  %v2142_v7 = vrot.slane %v3881_v11, %v4210_v53 }
 0x1ca   : > { %1864 = vbcast.lane.b32.xlu0 %v1862_v57, 256  ;;  %v4216_v52 = vpop.permute.xlu1 %1577 }
 0x1cb   : > { %1857 = vbcast.lane.b32.xlu1 %v1843_v5, 280  ;;  %v1919_v5 = vrot.slane %v3892_v15, %v4149_v55  ;;  %5794 = vst [vmem:[#allocation102_spill] sm:$0xff] %v4216_v52 }
 0x1ce   : > { %1872 = vbcast.lane.b32.xlu0 %v1862_v57, 272 }
 0x1cf   : > { %1868 = vbcast.lane.b32.xlu1 %v1862_v57, 264 }
 0x1d2   : > { %1883 = vbcast.lane.b32.xlu0 %v1881_v0, 256 }
 0x1d3   : > { %1876 = vbcast.lane.b32.xlu1 %v1862_v57, 280  ;;  %v1938_v57 = vrot.slane %v3895_v16, %v4149_v55 }
 0x1d6   : > { %1891 = vbcast.lane.b32.xlu0 %v1881_v0, 272 }
 0x1d7   : > { %1887 = vbcast.lane.b32.xlu1 %v1881_v0, 264 }
 0x1da   : > { %1902 = vbcast.lane.b32.xlu0 %v1900_v62, 256 }
 0x1db   : > { %1895 = vbcast.lane.b32.xlu1 %v1881_v0, 280  ;;  %v2085_v0 = vrot.slane %v3866_v4, %v4210_v53 }
 0x1de   : > { %1910 = vbcast.lane.b32.xlu0 %v1900_v62, 272 }
 0x1df   : > { %1906 = vbcast.lane.b32.xlu1 %v1900_v62, 264 }
 0x1e2   : > { %1921 = vbcast.lane.b32.xlu0 %v1919_v5, 256 }
 0x1e3   : > { %1914 = vbcast.lane.b32.xlu1 %v1900_v62, 280  ;;  %v4220_v62 = vpop.xlane.xlu1 %411 }
 0x1e6   : > { %1929 = vbcast.lane.b32.xlu0 %v1919_v5, 272 }
 0x1e7   : > { %1925 = vbcast.lane.b32.xlu1 %v1919_v5, 264  ;;  %v4228_v36 = vpop.xlane.xlu1 %413 }
 0x1ea   : > { %1940 = vbcast.lane.b32.xlu0 %v1938_v57, 256 }
 0x1eb   : > { %1933 = vbcast.lane.b32.xlu1 %v1919_v5, 280  ;;  %v4234_v52 = vpop.xlane.xlu1 %421 }
 0x1ee   : > { %1948 = vbcast.lane.b32.xlu0 %v1938_v57, 272 }
 0x1ef   : > { %1944 = vbcast.lane.b32.xlu1 %v1938_v57, 264  ;;  %v4240_v47 = vpop.permute.xlu1 %1588 }
 0x1f0   : > { %5797 = vst [vmem:[#allocation105_spill] sm:$0xff] %v4240_v47  ;;  %v5804_v47 = vlaneseq }
 0x1f2   : > { %2087 = vbcast.lane.b32.xlu0 %v2085_v0, 256 }
 0x1f3   : > { %1952 = vbcast.lane.b32.xlu1 %v1938_v57, 280  ;;  %v4244_v26 = vpop.permute.xlu1 %1596 }
 0x1f4   : > { %5799 = vst [vmem:[#allocation107_spill] sm:$0xff] %v4244_v26 }
 0x1f5   : > { %v4222_v29 = vpop.xlane.xlu0 %419 }
 0x1f6   : > { %2095 = vbcast.lane.b32.xlu0 %v2085_v0, 272 }
 0x1f7   : > { %2091 = vbcast.lane.b32.xlu1 %v2085_v0, 264  ;;  %v4252_v56 = vpop.permute.xlu1 %1607 }
 0x1f8   : > { %5802 = vst [vmem:[#allocation110_spill] sm:$0xff] %v4252_v56 }
 0x1f9   : > { %v4226_v46 = vpop.xlane.xlu0 %407 }
 0x1fa   : > { %2106 = vbcast.lane.b32.xlu0 %v2104_v59, 256 }
 0x1fb   : > { %2099 = vbcast.lane.b32.xlu1 %v2085_v0, 280 }
 0x1fd   : > { %v4230_v5 = vpop.xlane.xlu0 %415 }
 0x1fe   : > { %2114 = vbcast.lane.b32.xlu0 %v2104_v59, 272 }
 0x1ff   : > { %2110 = vbcast.lane.b32.xlu1 %v2104_v59, 264 }
 0x201   : > { %v4236_v45 = vpop.xlane.xlu0 %409 }
 0x202   : > { %2125 = vbcast.lane.b32.xlu0 %v2123_v40, 256 }
 0x203   : > { %2118 = vbcast.lane.b32.xlu1 %v2104_v59, 280  ;;  %v4257_v59 = vand.u32 127, %v5804_v47 }
 0x205   : > { %v4238_v57 = vpop.permute.xlu0 %1584  ;;  %5805 = vst [vmem:[#allocation112_spill] sm:$0xff] %v4257_v59 }
 0x206   : > { %5796 = vst [vmem:[#allocation104_spill] sm:$0xff] %v4238_v57  ;;  %2133 = vbcast.lane.b32.xlu0 %v2123_v40, 272 }
 0x207   : > { %2129 = vbcast.lane.b32.xlu1 %v2123_v40, 264 }
 0x209   : > { %v4242_v43 = vpop.permute.xlu0 %1592 }
 0x20a   : > { %5798 = vst [vmem:[#allocation106_spill] sm:$0xff] %v4242_v43  ;;  %v4259_v43 = vpop.permute.xlu1 %1615 }
 0x20b   : > { %2137 = vbcast.lane.b32.xlu1 %v2123_v40, 280  ;;  %5806 = vst [vmem:[#allocation113_spill] sm:$0xff] %v4259_v43  ;;  %v4265_v40 = vsub.s32 %v4257_v59, %v3860_v1 }
 0x20d   : > { %v4246_v49 = vpop.permute.xlu0 %1603  ;;  %5807 = vst [vmem:[#allocation114_spill] sm:$0xff] %v4265_v40  ;;  %v436_v47 = vrot.slane %v4226_v46, %v4265_v40  ;;  %v444_v43 = vrot.slane %v4220_v62, %v4265_v40  ;;  %v448_v63 = vrot.slane %v4228_v36, %v4265_v40 }
 0x20e   : > { %5800 = vst [vmem:[#allocation108_spill] sm:$0xff] %v4246_v49  ;;  %v2161_v49 = vrot.slane %v3884_v12, %v4210_v53  ;;  %v2180_v12 = vrot.slane %v3887_v13, %v4210_v53  ;;  %v452_v13 = vrot.slane %v4230_v5, %v4265_v40 }
 0x20f   : > { %2148 = vbcast.lane.b32.xlu1 %v2142_v7, 264 }
 0x211   : > { %v4250_v0 = vpop.permute.xlu0 %1611 }
 0x212   : > { %5801 = vst [vmem:[#allocation109_spill] sm:$0xff] %v4250_v0  ;;  %v440_v0 = vrot.slane %v4236_v45, %v4265_v40 }
 0x213   : > { %2156 = vbcast.lane.b32.xlu1 %v2142_v7, 280 }
 0x214   : > { %v466_v59 = vsel %vm465_vm1, %v440_v0, %v436_v47 }
 0x215   : > { %v4254_v57 = vpop.permute.xlu0 %1622 }
 0x216   : > { %5803 = vst [vmem:[#allocation111_spill] sm:$0xff] %v4254_v57  ;;  %v4271_v57 = vpop.permute.xlu1 %1626 }
 0x217   : > { %2167 = vbcast.lane.b32.xlu1 %v2161_v49, 264  ;;  %5808 = vst [vmem:[#allocation115_spill] sm:$0xff] %v4271_v57  ;;  %v468_v57 = vsel %vm467_vm2, %v444_v43, %v466_v59  ;;  %v2199_v43 = vrot.slane %v3892_v15, %v4210_v53 }
 0x218   : > { %v470_v33 = vsel %vm469_vm3, %v448_v63, %v468_v57  ;;  %v460_v63 = vrot.slane %v4222_v29, %v4265_v40 }
 0x219   : > { %v4267_v11 = vpop.permute.xlu0 %1630  ;;  %v472_v57 = vsel %vm471_vm4, %v452_v13, %v470_v33  ;;  %v2218_v33 = vrot.slane %v3895_v16, %v4210_v53 }
 0x21a   : > { %v4282_v26 = vpop.permute.xlu1 %1634 }
 0x21b   : > { %2175 = vbcast.lane.b32.xlu1 %v2161_v49, 280  ;;  %5809 = vst [vmem:[#allocation116_spill] sm:$0xff] %v4282_v26  ;;  %v464_v26 = vrot.slane %v4234_v52, %v4265_v40 }
 0x21d   : > { %v4280_v56 = vpop.permute.xlu0 %1641 }
 0x21f   : > { %2186 = vbcast.lane.b32.xlu1 %v2180_v12, 264 }
 0x221   : > { %v4290_v0 = vpop.permute.xlu0 %1649 }
 0x223   : > { %v4292_v47 = vpop.xlane.xlu1 %417  ;;  %2194 = vbcast.lane.b32.xlu1 %v2180_v12, 280 }
 0x224   : > { %v456_v59 = vrot.slane %v4292_v47, %v4265_v40 }
 0x225   : > { %v4306_v48 = vpop.permute.xlu0 %1660 }
 0x226   : > { %v474_v31 = vsel %vm473_vm5, %v456_v59, %v472_v57 }
 0x227   : > { %v476_v42 = vsel %vm475_vm6, %v460_v63, %v474_v31  ;;  %2205 = vbcast.lane.b32.xlu1 %v2199_v43, 264  ;;  %v4316_v31 = vsub.s32 6, %v3860_v1 }
 0x228   : > { %v478_v15 = vsel %vm477_vm7, %v464_v26, %v476_v42  ;;  %v3674_v26 = vmov 0  }
 0x229   : > { %v481_v22 = vsel %vm480_vm8, %v478_v15, -inf  ;;  %v4311_v13 = vpop.permute.xlu0 %1668  ;;  %v2365_v42 = vrot.slane %v3866_v4, %v4316_v31  ;;  %v2384_v16 = vrot.slane %v3874_v8, %v4316_v31  ;;  %3493 = vset.pattern.permute.xlu0 %v3674_v26  ;;  %3492 = vset.pattern.permute.xlu1 %v3674_v26 }
 0x22a   : > { %482 = vmax.xlane.f32.xlu0 %v481_v22  ;;  %5810 = vst [vmem:[#allocation117_spill] sm:$0xff] %v4311_v13 }
 0x22b   : > { %2213 = vbcast.lane.b32.xlu1 %v2199_v43, 280 }
 0x22d   : > { %v4313_v59 = vpop.permute.xlu0 %1807 }
 0x22e   : > { %5811 = vst [vmem:[#allocation118_spill] sm:$0xff] %v4313_v59 }
 0x22f   : > { %2224 = vbcast.lane.b32.xlu1 %v2218_v33, 264 }
 0x231   : > { %v4318_v63 = vpop.permute.xlu0 %1815 }
 0x232   : > { %5812 = vst [vmem:[#allocation119_spill] sm:$0xff] %v4318_v63 }
 0x233   : > { %2232 = vbcast.lane.b32.xlu1 %v2218_v33, 280 }
 0x235   : > { %v4322_v22 = vpop.permute.xlu0 %1826 }
 0x236   : > { %5813 = vst [vmem:[#allocation120_spill] sm:$0xff] %v4322_v22  ;;  %v4334_v22 = vpop.permute.xlu1 %1645 }
 0x237   : > { %2371 = vbcast.lane.b32.xlu1 %v2365_v42, 264  ;;  %5818 = vst [vmem:[#allocation125_spill] sm:$0xff] %v4334_v22 }
 0x239   : > { %v4326_v57 = vpop.permute.xlu0 %1834 }
 0x23a   : > { %5814 = vst [vmem:[#allocation121_spill] sm:$0xff] %v4326_v57  ;;  %v4338_v26 = vpop.permute.xlu1 %1653 }
 0x23b   : > { %2379 = vbcast.lane.b32.xlu1 %v2365_v42, 280  ;;  %5820 = vst [vmem:[#allocation127_spill] sm:$0xff] %v4338_v26 }
 0x23d   : > { %v4328_v15 = vpop.permute.xlu0 %1845 }
 0x23e   : > { %5815 = vst [vmem:[#allocation122_spill] sm:$0xff] %v4328_v15  ;;  %v4342_v57 = vpop.permute.xlu1 %1664 }
 0x23f   : > { %2390 = vbcast.lane.b32.xlu1 %v2384_v16, 264  ;;  %5822 = vst [vmem:[#allocation129_spill] sm:$0xff] %v4342_v57 }
 0x240   : > { %2144 = vbcast.lane.b32.xlu0 %v2142_v7, 256 }
 0x241   : > { %v4330_v4 = vpop.permute.xlu0 %1853 }
 0x242   : > { %5816 = vst [vmem:[#allocation123_spill] sm:$0xff] %v4330_v4 }
 0x243   : > { %2398 = vbcast.lane.b32.xlu1 %v2384_v16, 280 }
 0x244   : > { %2152 = vbcast.lane.b32.xlu0 %v2142_v7, 272 }
 0x245   : > { %v4332_v7 = vpop.permute.xlu0 %1864 }
 0x246   : > { %5817 = vst [vmem:[#allocation124_spill] sm:$0xff] %v4332_v7 }
 0x248   : > { %2163 = vbcast.lane.b32.xlu0 %v2161_v49, 256 }
 0x249   : > { %v4336_v8 = vpop.permute.xlu0 %1872 }
 0x24a   : > { %5819 = vst [vmem:[#allocation126_spill] sm:$0xff] %v4336_v8 }
 0x24c   : > { %2171 = vbcast.lane.b32.xlu0 %v2161_v49, 272 }
 0x24d   : > { %v4340_v49 = vpop.permute.xlu0 %1883 }
 0x24e   : > { %5821 = vst [vmem:[#allocation128_spill] sm:$0xff] %v4340_v49 }
 0x250   : > { %2182 = vbcast.lane.b32.xlu0 %v2180_v12, 256 }
 0x251   : > { %v4344_v15 = vpop.permute.xlu0 %1891 }
 0x252   : > { %5823 = vst [vmem:[#allocation130_spill] sm:$0xff] %v4344_v15 }
 0x254   : > { %2190 = vbcast.lane.b32.xlu0 %v2180_v12, 272  ;;  %v4346_v12 = vpop.permute.xlu1 %1672 }
 0x255   : > { %5824 = vst [vmem:[#allocation131_spill] sm:$0xff] %v4346_v12  ;;  %v4348_v7 = vpop.permute.xlu0 %1902 }
 0x256   : > { %5825 = vst [vmem:[#allocation132_spill] sm:$0xff] %v4348_v7 }
 0x258   : > { %2201 = vbcast.lane.b32.xlu0 %v2199_v43, 256 }
 0x259   : > { %v4352_v22 = vpop.permute.xlu0 %1910 }
 0x25c   : > { %2209 = vbcast.lane.b32.xlu0 %v2199_v43, 272  ;;  %v4350_v43 = vpop.permute.xlu1 %1811 }
 0x25d   : > { %5826 = vst [vmem:[#allocation133_spill] sm:$0xff] %v4350_v43 }
 0x260   : > { %2220 = vbcast.lane.b32.xlu0 %v2218_v33, 256  ;;  %v4354_v26 = vpop.permute.xlu1 %1819 }
 0x261   : > { %5827 = vst [vmem:[#allocation134_spill] sm:$0xff] %v4354_v26 }
 0x264   : > { %2228 = vbcast.lane.b32.xlu0 %v2218_v33, 272  ;;  %v4356_v33 = vpop.permute.xlu0 %1921  ;;  %v4358_v49 = vpop.permute.xlu1 %1830 }
 0x265   : > { %5828 = vst [vmem:[#allocation135_spill] sm:$0xff] %v4358_v49 }
 0x268   : > { %2367 = vbcast.lane.b32.xlu0 %v2365_v42, 256  ;;  %v4360_v57 = vpop.permute.xlu0 %1929  ;;  %v4362_v15 = vpop.permute.xlu1 %1838 }
 0x269   : > { %5829 = vst [vmem:[#allocation136_spill] sm:$0xff] %v4362_v15 }
 0x26c   : > { %2375 = vbcast.lane.b32.xlu0 %v2365_v42, 272  ;;  %v4364_v8 = vpop.permute.xlu0 %1940  ;;  %v4366_v42 = vpop.permute.xlu1 %1849 }
 0x26d   : > { %5830 = vst [vmem:[#allocation137_spill] sm:$0xff] %v4366_v42 }
 0x270   : > { %2386 = vbcast.lane.b32.xlu0 %v2384_v16, 256  ;;  %v4368_v7 = vpop.permute.xlu0 %1948  ;;  %v4370_v4 = vpop.permute.xlu1 %1857 }
 0x271   : > { %5831 = vst [vmem:[#allocation138_spill] sm:$0xff] %v4368_v7  ;;  %5832 = vst [vmem:[#allocation139_spill] sm:$0xff] %v4370_v4 }
 0x274   : > { %2394 = vbcast.lane.b32.xlu0 %v2384_v16, 272  ;;  %v4372_v16 = vpop.permute.xlu0 %2087  ;;  %v4374_v63 = vpop.permute.xlu1 %1868 }
 0x275   : > { %5833 = vst [vmem:[#allocation140_spill] sm:$0xff] %v4372_v16  ;;  %5834 = vst [vmem:[#allocation141_spill] sm:$0xff] %v4374_v63 }
 0x278   : > { %v4376_v26 = vpop.permute.xlu0 %2095  ;;  %v4378_v59 = vpop.permute.xlu1 %1876 }
 0x279   : > { %5835 = vst [vmem:[#allocation142_spill] sm:$0xff] %v4376_v26  ;;  %5836 = vst [vmem:[#allocation143_spill] sm:$0xff] %v4378_v59 }
 0x27c   : > { %v4380_v49 = vpop.permute.xlu0 %2106  ;;  %v4382_v44 = vpop.permute.xlu1 %1887 }
 0x27d   : > { %5837 = vst [vmem:[#allocation144_spill] sm:$0xff] %v4380_v49  ;;  %5838 = vst [vmem:[#allocation145_spill] sm:$0xff] %v4382_v44 }
 0x280   : > { %v4384_v15 = vpop.permute.xlu0 %2114  ;;  %v4386_v9 = vpop.permute.xlu1 %1895 }
 0x281   : > { %5839 = vst [vmem:[#allocation146_spill] sm:$0xff] %v4384_v15  ;;  %5840 = vst [vmem:[#allocation147_spill] sm:$0xff] %v4386_v9 }
 0x284   : > { %v4388_v42 = vpop.permute.xlu0 %2125  ;;  %v4390_v14 = vpop.permute.xlu1 %1906 }
 0x285   : > { %5841 = vst [vmem:[#allocation148_spill] sm:$0xff] %v4388_v42  ;;  %5842 = vst [vmem:[#allocation149_spill] sm:$0xff] %v4390_v14 }
 0x288   : > { %v4392_v4 = vpop.permute.xlu0 %2133  ;;  %v4394_v16 = vpop.permute.xlu1 %1914 }
 0x289   : > { %5843 = vst [vmem:[#allocation150_spill] sm:$0xff] %v4392_v4  ;;  %5844 = vst [vmem:[#allocation151_spill] sm:$0xff] %v4394_v16 }
 0x28c   : > { %v4404_v42 = vpop.permute.xlu1 %1925 }
 0x28d   : > { %5845 = vst [vmem:[#allocation152_spill] sm:$0xff] %v4404_v42  ;;  %v4440_v42 = vld [vmem:[%s3849_s12 + $0x28] sm:$0xff] }
 0x290   : > { %v4406_v16 = vpop.permute.xlu1 %1933 }
 0x291   : > { %5846 = vst [vmem:[#allocation153_spill] sm:$0xff] %v4406_v16 }
 0x294   : > { %v4408_v49 = vpop.permute.xlu1 %1944 }
 0x295   : > { %5847 = vst [vmem:[#allocation154_spill] sm:$0xff] %v4408_v49 }
 0x2b7   : > { %v4396_v63 = vpop.xlane.xlu0 %482 }
 0x2b8   : > { %v488_v59 = vrot.slane %v4396_v63, %v3863_v2  ;;  %v492_v44 = vrot.slane %v4396_v63, %v3918_v25  ;;  %v496_v7 = vrot.slane %v4396_v63, %v3937_v34  ;;  %v500_v32 = vrot.slane %v4396_v63, %v4002_v6 }
 0x2ba   : > { %v525_v15 = vsub.f32 %v4226_v46, %v488_v59  ;;  %v526_v9 = vsub.f32 %v4236_v45, %v492_v44  ;;  %v4416_v46 = vld [vmem:[%s3849_s12 + $0x10] sm:$0xff]  ;;  %v4421_v45 = vpop.permute.xlu1 %1952  ;;  %v528_v37 = vsub.f32 %v4228_v36, %v500_v32  ;;  %v512_v36 = vrot.slane %v4396_v63, %v4316_v31 }
 0x2bb   : > { %v2403_v44 = vrot.slane %v4416_v46, %v4316_v31  ;;  %5848 = vst [vmem:[#allocation155_spill] sm:$0xff] %v4421_v45  ;;  %v2645_v45 = vrot.slane %v3536_v54, %v4471_v20  ;;  %v516_v54 = vrot.slane %v4396_v63, %v4471_v20 }
 0x2bc   : > { %v533_v14 = vmul.f32 1.442695, %v525_v15  ;;  %v535_v4 = vmul.f32 1.442695, %v526_v9 }
 0x2be   : > { %3512 = vpow2.f32 %v533_v14  ;;  %v4424_v14 = vld [vmem:[%s3849_s12 + $0x18] sm:$0xff]  ;;  %v4428_v59 = vpop.permute.xlu1 %2091 }
 0x2bf   : > { %3514 = vpow2.f32 %v535_v4  ;;  %v2422_v9 = vrot.slane %v4424_v14, %v4316_v31  ;;  %5849 = vst [vmem:[#allocation156_spill] sm:$0xff] %v4428_v59  ;;  %v4433_v4 = vld [vmem:[%s3849_s12 + $0x20] sm:$0xff]  ;;  %v4447_v59 = vld [vmem:[%s3849_s12 + $0x30] sm:$0xff] }
 0x2c0   : > { %v2441_v16 = vrot.slane %v4433_v4, %v4316_v31 }
 0x2c2   : > { %v4430_v15 = vpop.permute.xlu1 %2099 }
 0x2c3   : > { %5850 = vst [vmem:[#allocation157_spill] sm:$0xff] %v4430_v15 }
 0x2c6   : > { %v4437_v49 = vpop.permute.xlu1 %2110 }
 0x2c7   : > { %5851 = vst [vmem:[#allocation158_spill] sm:$0xff] %v4437_v49 }
 0x2c8   : > { %v4410_v26 = vpop.eup %3512 }
 0x2c9   : > { %v4412_v43 = vpop.eup %3514  ;;  %558 = vperm.xlu1 %3492, %v4410_v26  }
 0x2ca   : > { %561 = vperm.xlu0 %3493, %v4412_v43   ;;  %v4444_v15 = vpop.permute.xlu1 %2118 }
 0x2cb   : > { %5852 = vst [vmem:[#allocation159_spill] sm:$0xff] %v4444_v15  ;;  %v4458_v15 = vld [vmem:[%s3849_s12 + $0x38] sm:$0xff] }
 0x2cc   : > { %v2498_v13 = vrot.slane %v4458_v15, %v4316_v31 }
 0x2cd   : > { %2409 = vbcast.lane.b32.xlu1 %v2403_v44, 264 }
 0x2ce   : > { %2405 = vbcast.lane.b32.xlu0 %v2403_v44, 256  ;;  %v4451_v49 = vpop.permute.xlu1 %2129 }
 0x2cf   : > { %5853 = vst [vmem:[#allocation160_spill] sm:$0xff] %v4451_v49  ;;  %v527_v49 = vsub.f32 %v4220_v62, %v496_v7  ;;  %v508_v62 = vrot.slane %v4396_v63, %v4210_v53 }
 0x2d1   : > { %2417 = vbcast.lane.b32.xlu1 %v2403_v44, 280  ;;  %v537_v41 = vmul.f32 1.442695, %v527_v49  ;;  %v530_v49 = vsub.f32 %v4292_v47, %v508_v62  ;;  %v532_v47 = vsub.f32 %v4234_v52, %v516_v54  ;;  %v2702_v54 = vrot.slane %v4424_v14, %v4471_v20 }
 0x2d2   : > { %2413 = vbcast.lane.b32.xlu0 %v2403_v44, 272  ;;  %v2460_v44 = vrot.slane %v4440_v42, %v4316_v31  ;;  %v2740_v14 = vrot.slane %v4440_v42, %v4471_v20  ;;  %v4537_v42 = vrot.slane %v4458_v15, %v4471_v20 }
 0x2d3   : > { %3516 = vpow2.f32 %v537_v41  ;;  %v531_v41 = vsub.f32 %v4222_v29, %v512_v36 }
 0x2d5   : > { %2428 = vbcast.lane.b32.xlu1 %v2422_v9, 264  ;;  %v545_v62 = vmul.f32 1.442695, %v531_v41 }
 0x2d6   : > { %2424 = vbcast.lane.b32.xlu0 %v2422_v9, 256 }
 0x2d9   : > { %2436 = vbcast.lane.b32.xlu1 %v2422_v9, 280 }
 0x2da   : > { %2432 = vbcast.lane.b32.xlu0 %v2422_v9, 272  ;;  %v2479_v9 = vrot.slane %v4447_v59, %v4316_v31 }
 0x2dd   : > { %2447 = vbcast.lane.b32.xlu1 %v2441_v16, 264 }
 0x2de   : > { %2443 = vbcast.lane.b32.xlu0 %v2441_v16, 256 }
 0x2e1   : > { %2455 = vbcast.lane.b32.xlu1 %v2441_v16, 280 }
 0x2e2   : > { %2451 = vbcast.lane.b32.xlu0 %v2441_v16, 272  ;;  %v4455_v16 = vpop.permute.xlu1 %2137 }
 0x2e3   : > { %5854 = vst [vmem:[#allocation161_spill] sm:$0xff] %v4455_v16 }
 0x2e5   : > { %2466 = vbcast.lane.b32.xlu1 %v2460_v44, 264 }
 0x2e6   : > { %2462 = vbcast.lane.b32.xlu0 %v2460_v44, 256  ;;  %v4468_v16 = vpop.permute.xlu1 %2148 }
 0x2e7   : > { %5855 = vst [vmem:[#allocation162_spill] sm:$0xff] %v4468_v16 }
 0x2e9   : > { %2474 = vbcast.lane.b32.xlu1 %v2460_v44, 280 }
 0x2ea   : > { %2470 = vbcast.lane.b32.xlu0 %v2460_v44, 272  ;;  %v504_v44 = vrot.slane %v4396_v63, %v4149_v55  ;;  %v4478_v32 = vpop.permute.xlu1 %2156 }
 0x2eb   : > { %5856 = vst [vmem:[#allocation163_spill] sm:$0xff] %v4478_v32 }
 0x2ec   : > { %v529_v7 = vsub.f32 %v4230_v5, %v504_v44  ;;  %v3537_v44 = vld [vmem:[%s3849_s12 + $0x8] sm:$0xff]  ;;  %s5608_s12 = scalar_lea.vmem %s5663_s5, %s3394_s28 }
 0x2ed   : > { %2485 = vbcast.lane.b32.xlu1 %v2479_v9, 264  ;;  %v2664_v32 = vrot.slane %v3537_v44, %v4471_v20 }
 0x2ee   : > { %2481 = vbcast.lane.b32.xlu0 %v2479_v9, 256  ;;  %v541_v1 = vmul.f32 1.442695, %v529_v7  ;;  %v4486_v5 = vpop.permute.xlu1 %2167  ;;  %v2683_v7 = vrot.slane %v4416_v46, %v4471_v20 }
 0x2ef   : > { %5857 = vst [vmem:[#allocation164_spill] sm:$0xff] %v4486_v5 }
 0x2f1   : > { %2493 = vbcast.lane.b32.xlu1 %v2479_v9, 280 }
 0x2f2   : > { %2489 = vbcast.lane.b32.xlu0 %v2479_v9, 272  ;;  %v539_v9 = vmul.f32 1.442695, %v528_v37  ;;  %v543_v37 = vmul.f32 1.442695, %v530_v49  ;;  %v4496_v29 = vpop.permute.xlu1 %2175 }
 0x2f3   : > { %5858 = vst [vmem:[#allocation165_spill] sm:$0xff] %v4496_v29 }
 0x2f4   : > { %3518 = vpow2.f32 %v539_v9 }
 0x2f5   : > { %2504 = vbcast.lane.b32.xlu1 %v2498_v13, 264  ;;  %3520 = vpow2.f32 %v541_v1  ;;  %v547_v1 = vmul.f32 1.442695, %v532_v47 }
 0x2f6   : > { %2500 = vbcast.lane.b32.xlu0 %v2498_v13, 256  ;;  %3522 = vpow2.f32 %v543_v37  ;;  %v4504_v52 = vpop.permute.xlu1 %2186  ;;  %v2721_v37 = vrot.slane %v4433_v4, %v4471_v20  ;;  %v2759_v4 = vrot.slane %v4447_v59, %v4471_v20 }
 0x2f7   : > { %3524 = vpow2.f32 %v545_v62  ;;  %5859 = vst [vmem:[#allocation166_spill] sm:$0xff] %v4504_v52 }
 0x2f8   : > { %3526 = vpow2.f32 %v547_v1 }
 0x2f9   : > { %2512 = vbcast.lane.b32.xlu1 %v2498_v13, 280 }
 0x2fa   : > { %2508 = vbcast.lane.b32.xlu0 %v2498_v13, 272  ;;  %v4488_v13 = vpop.eup %3516  ;;  %v4511_v49 = vpop.permute.xlu1 %2194 }
 0x2fb   : > { %5860 = vst [vmem:[#allocation167_spill] sm:$0xff] %v4511_v49 }
 0x2fd   : > { %2651 = vbcast.lane.b32.xlu1 %v2645_v45, 264 }
 0x2fe   : > { %2647 = vbcast.lane.b32.xlu0 %v2645_v45, 256  ;;  %v4494_v63 = vpop.eup %3518  ;;  %v4519_v41 = vpop.permute.xlu1 %2205 }
 0x2ff   : > { %5861 = vst [vmem:[#allocation168_spill] sm:$0xff] %v4519_v41 }
 0x301   : > { %2659 = vbcast.lane.b32.xlu1 %v2645_v45, 280 }
 0x302   : > { %2655 = vbcast.lane.b32.xlu0 %v2645_v45, 272  ;;  %v4499_v45 = vpop.eup %3520  ;;  %v4523_v44 = vpop.permute.xlu1 %2213 }
 0x303   : > { %v4506_v9 = vpop.eup %3522  ;;  %5862 = vst [vmem:[#allocation169_spill] sm:$0xff] %v4523_v44 }
 0x304   : > { %v4509_v36 = vpop.eup %3524 }
 0x305   : > { %564 = vperm.xlu1 %3492, %v4488_v13   ;;  %v4516_v46 = vpop.eup %3526 }
 0x306   : > { %2666 = vbcast.lane.b32.xlu0 %v2664_v32, 256  ;;  %v4527_v47 = vpop.permute.xlu1 %2224 }
 0x307   : > { %5863 = vst [vmem:[#allocation170_spill] sm:$0xff] %v4527_v47 }
 0x309   : > { %567 = vperm.xlu1 %3492, %v4494_v63  }
 0x30a   : > { %2674 = vbcast.lane.b32.xlu0 %v2664_v32, 272  ;;  %v4529_v62 = vpop.permute.xlu1 %2232 }
 0x30b   : > { %5864 = vst [vmem:[#allocation171_spill] sm:$0xff] %v4529_v62 }
 0x30d   : > { %570 = vperm.xlu1 %3492, %v4499_v45  }
 0x30e   : > { %2685 = vbcast.lane.b32.xlu0 %v2683_v7, 256  ;;  %v4533_v1 = vpop.permute.xlu1 %2371 }
 0x30f   : > { %5865 = vst [vmem:[#allocation172_spill] sm:$0xff] %v4533_v1 }
 0x311   : > { %573 = vperm.xlu1 %3492, %v4506_v9  }
 0x312   : > { %2693 = vbcast.lane.b32.xlu0 %v2683_v7, 272 }
 0x315   : > { %576 = vperm.xlu1 %3492, %v4509_v36  }
 0x316   : > { %2704 = vbcast.lane.b32.xlu0 %v2702_v54, 256 }
 0x319   : > { %579 = vperm.xlu1 %3492, %v4516_v46  }
 0x31a   : > { %2712 = vbcast.lane.b32.xlu0 %v2702_v54, 272 }
 0x31d   : > { %2670 = vbcast.lane.b32.xlu1 %v2664_v32, 264 }
 0x31e   : > { %2723 = vbcast.lane.b32.xlu0 %v2721_v37, 256 }
 0x321   : > { %2678 = vbcast.lane.b32.xlu1 %v2664_v32, 280  ;;  %v4540_v32 = vpop.permute.xlu1 %2379 }
 0x322   : > { %2731 = vbcast.lane.b32.xlu0 %v2721_v37, 272  ;;  %5866 = vst [vmem:[#allocation173_spill] sm:$0xff] %v4540_v32 }
 0x325   : > { %2689 = vbcast.lane.b32.xlu1 %v2683_v7, 264  ;;  %v4545_v59 = vpop.permute.xlu1 %2390 }
 0x326   : > { %2742 = vbcast.lane.b32.xlu0 %v2740_v14, 256  ;;  %5868 = vst [vmem:[#allocation175_spill] sm:$0xff] %v4545_v59 }
 0x329   : > { %2697 = vbcast.lane.b32.xlu1 %v2683_v7, 280  ;;  %v4542_v7 = vpop.permute.xlu0 %2144  ;;  %v4549_v62 = vpop.permute.xlu1 %2398 }
 0x32a   : > { %2750 = vbcast.lane.b32.xlu0 %v2740_v14, 272  ;;  %5867 = vst [vmem:[#allocation174_spill] sm:$0xff] %v4542_v7  ;;  %5870 = vst [vmem:[#allocation177_spill] sm:$0xff] %v4549_v62 }
 0x32d   : > { %2708 = vbcast.lane.b32.xlu1 %v2702_v54, 264 }
 0x32e   : > { %2761 = vbcast.lane.b32.xlu0 %v2759_v4, 256 }
 0x331   : > { %2716 = vbcast.lane.b32.xlu1 %v2702_v54, 280  ;;  %v4547_v54 = vpop.permute.xlu0 %2152 }
 0x332   : > { %2769 = vbcast.lane.b32.xlu0 %v2759_v4, 272  ;;  %5869 = vst [vmem:[#allocation176_spill] sm:$0xff] %v4547_v54 }
 0x335   : > { %2727 = vbcast.lane.b32.xlu1 %v2721_v37, 264  ;;  %v4551_v15 = vpop.permute.xlu0 %2163 }
 0x336   : > { %2780 = vbcast.lane.b32.xlu0 %v4537_v42, 256  ;;  %5871 = vst [vmem:[#allocation178_spill] sm:$0xff] %v4551_v15 }
 0x339   : > { %2735 = vbcast.lane.b32.xlu1 %v2721_v37, 280  ;;  %v4553_v47 = vpop.permute.xlu0 %2171 }
 0x33a   : > { %2788 = vbcast.lane.b32.xlu0 %v4537_v42, 272  ;;  %5872 = vst [vmem:[#allocation179_spill] sm:$0xff] %v4553_v47 }
 0x33d   : > { %2746 = vbcast.lane.b32.xlu1 %v2740_v14, 264  ;;  %v4560_v41 = vpop.permute.xlu0 %2182 }
 0x33e   : > { %5875 = vst [vmem:[#allocation182_spill] sm:$0xff] %v4560_v41 }
 0x341   : > { %2754 = vbcast.lane.b32.xlu1 %v2740_v14, 280  ;;  %v4564_v14 = vpop.permute.xlu0 %2190 }
 0x345   : > { %2765 = vbcast.lane.b32.xlu1 %v2759_v4, 264  ;;  %v4570_v15 = vpop.permute.xlu0 %2201 }
 0x348   : > { %v559_v44 = vpop.permute.xlu1 %558 }
 0x349   : > { %2773 = vbcast.lane.b32.xlu1 %v2759_v4, 280  ;;  %v4574_v47 = vpop.permute.xlu0 %2209 }
 0x34c   : > { %v4555_v37 = vpop.permute.xlu1 %2409 }
 0x34d   : > { %5873 = vst [vmem:[#allocation180_spill] sm:$0xff] %v4555_v37  ;;  %2784 = vbcast.lane.b32.xlu1 %v4537_v42, 264  ;;  %v4580_v16 = vpop.permute.xlu0 %2220 }
 0x350   : > { %v4558_v49 = vpop.permute.xlu1 %2417 }
 0x351   : > { %5874 = vst [vmem:[#allocation181_spill] sm:$0xff] %v4558_v49 }
 0x354   : > { %v4562_v52 = vpop.permute.xlu1 %2428 }
 0x355   : > { %5876 = vst [vmem:[#allocation183_spill] sm:$0xff] %v4562_v52  ;;  %v4584_v52 = vpop.permute.xlu0 %2228 }
 0x356   : > { %5883 = vst [vmem:[#allocation190_spill] sm:$0xff] %v4584_v52 }
 0x358   : > { %v4566_v29 = vpop.permute.xlu1 %2436 }
 0x359   : > { %5877 = vst [vmem:[#allocation184_spill] sm:$0xff] %v4566_v29 }
 0x35c   : > { %v4568_v5 = vpop.permute.xlu1 %2447 }
 0x35d   : > { %5878 = vst [vmem:[#allocation185_spill] sm:$0xff] %v4568_v5  ;;  %v4590_v5 = vpop.permute.xlu0 %2367 }
 0x35e   : > { %5886 = vst [vmem:[#allocation193_spill] sm:$0xff] %v4590_v5 }
 0x360   : > { %v4572_v4 = vpop.permute.xlu1 %2455 }
 0x361   : > { %5879 = vst [vmem:[#allocation186_spill] sm:$0xff] %v4572_v4  ;;  %v4594_v4 = vpop.permute.xlu0 %2375 }
 0x362   : > { %5888 = vst [vmem:[#allocation195_spill] sm:$0xff] %v4594_v4 }
 0x364   : > { %v4576_v54 = vpop.permute.xlu1 %2466 }
 0x365   : > { %5880 = vst [vmem:[#allocation187_spill] sm:$0xff] %v4576_v54 }
 0x368   : > { %v4578_v7 = vpop.permute.xlu1 %2474 }
 0x369   : > { %5881 = vst [vmem:[#allocation188_spill] sm:$0xff] %v4578_v7  ;;  %v4600_v7 = vpop.permute.xlu0 %2386 }
 0x36a   : > { %5891 = vst [vmem:[#allocation198_spill] sm:$0xff] %v4600_v7 }
 0x36c   : > { %v4582_v41 = vpop.permute.xlu1 %2485 }
 0x36d   : > { %5882 = vst [vmem:[#allocation189_spill] sm:$0xff] %v4582_v41  ;;  %v4602_v41 = vpop.permute.xlu0 %2394 }
 0x36e   : > { %5892 = vst [vmem:[#allocation199_spill] sm:$0xff] %v4602_v41 }
 0x370   : > { %v4586_v49 = vpop.permute.xlu1 %2493 }
 0x371   : > { %5884 = vst [vmem:[#allocation191_spill] sm:$0xff] %v4586_v49  ;;  %v562_v49 = vpop.permute.xlu0 %561 }
 0x372   : > { %v588_v5 = vrot.slane %v562_v49, %v4265_v40 }
 0x374   : > { %v4588_v29 = vpop.permute.xlu1 %2504 }
 0x375   : > { %5885 = vst [vmem:[#allocation192_spill] sm:$0xff] %v4588_v29  ;;  %v584_v29 = vrot.slane %v559_v44, %v4265_v40 }
 0x377   : > { %v613_v7 = vsel %vm465_vm1, %v588_v5, %v584_v29  ;;  %v4621_v29 = vpop.permute.xlu0 %2405 }
 0x378   : > { %v4592_v37 = vpop.permute.xlu1 %2512  ;;  %5893 = vst [vmem:[#allocation200_spill] sm:$0xff] %v4621_v29 }
 0x379   : > { %5887 = vst [vmem:[#allocation194_spill] sm:$0xff] %v4592_v37 }
 0x37c   : > { %v4596_v62 = vpop.permute.xlu1 %2651 }
 0x37d   : > { %5889 = vst [vmem:[#allocation196_spill] sm:$0xff] %v4596_v62 }
 0x380   : > { %v4598_v54 = vpop.permute.xlu1 %2659 }
 0x381   : > { %5890 = vst [vmem:[#allocation197_spill] sm:$0xff] %v4598_v54 }
 0x384   : > { %v565_v59 = vpop.permute.xlu1 %564 }
 0x385   : > { %v592_v37 = vrot.slane %v565_v59, %v4265_v40 }
 0x387   : > { %v614_v41 = vsel %vm467_vm2, %v592_v37, %v613_v7 }
 0x388   : > { %v568_v52 = vpop.permute.xlu1 %567 }
 0x389   : > { %v596_v4 = vrot.slane %v568_v52, %v4265_v40 }
 0x38b   : > { %v615_v39 = vsel %vm469_vm3, %v596_v4, %v614_v41 }
 0x38c   : > { %v571_v32 = vpop.permute.xlu1 %570 }
 0x38d   : > { %v600_v62 = vrot.slane %v571_v32, %v4265_v40 }
 0x38f   : > { %v616_v44 = vsel %vm471_vm4, %v600_v62, %v615_v39 }
 0x390   : > { %v574_v1 = vpop.permute.xlu1 %573 }
 0x391   : > { %v604_v12 = vrot.slane %v574_v1, %v4265_v40  ;;  %v4623_v1 = vpop.permute.xlu0 %2413 }
 0x392   : > { %5894 = vst [vmem:[#allocation201_spill] sm:$0xff] %v4623_v1 }
 0x393   : > { %v617_v59 = vsel %vm473_vm5, %v604_v12, %v616_v44 }
 0x394   : > { %v577_v54 = vpop.permute.xlu1 %576 }
 0x395   : > { %v608_v18 = vrot.slane %v577_v54, %v4265_v40  ;;  %v4625_v41 = vpop.permute.xlu0 %2424 }
 0x396   : > { %5895 = vst [vmem:[#allocation202_spill] sm:$0xff] %v4625_v41 }
 0x397   : > { %v618_v32 = vsel %vm475_vm6, %v608_v18, %v617_v59 }
 0x398   : > { %v580_v49 = vpop.permute.xlu1 %579 }
 0x399   : > { %v612_v52 = vrot.slane %v580_v49, %v4265_v40  ;;  %v4627_v39 = vpop.permute.xlu0 %2432 }
 0x39a   : > { %5896 = vst [vmem:[#allocation203_spill] sm:$0xff] %v4627_v39 }
 0x39b   : > { %v619_v38 = vsel %vm477_vm7, %v612_v52, %v618_v32 }
 0x39c   : > { %v621_v5 = vsel %vm480_vm8, %v619_v38, 0.0  ;;  %v4633_v18 = vpop.permute.xlu1 %2670 }
 0x39d   : > { %622 = vadd.xlane.f32.xlu1 %v621_v5  ;;  %v4629_v12 = vpop.permute.xlu0 %2443  ;;  %5899 = vst [vmem:[#allocation206_spill] sm:$0xff] %v4633_v18 }
 0x39e   : > { %5897 = vst [vmem:[#allocation204_spill] sm:$0xff] %v4629_v12 }
 0x3a0   : > { %v4637_v38 = vpop.permute.xlu1 %2678 }
 0x3a1   : > { %v4631_v62 = vpop.permute.xlu0 %2451  ;;  %5901 = vst [vmem:[#allocation208_spill] sm:$0xff] %v4637_v38 }
 0x3a2   : > { %5898 = vst [vmem:[#allocation205_spill] sm:$0xff] %v4631_v62 }
 0x3a5   : > { %v4635_v7 = vpop.permute.xlu0 %2462 }
 0x3a6   : > { %5900 = vst [vmem:[#allocation207_spill] sm:$0xff] %v4635_v7 }
 0x3a9   : > { %v4639_v54 = vpop.permute.xlu0 %2470 }
 0x3ad   : > { %v4643_v37 = vpop.permute.xlu0 %2481 }
 0x3ae   : > { %2792 = vbcast.lane.b32.xlu1 %v4537_v42, 280  ;;  %v4641_v42 = vpop.permute.xlu1 %2689 }
 0x3af   : > { %5902 = vst [vmem:[#allocation209_spill] sm:$0xff] %v4641_v42 }
 0x3b1   : > { %v4647_v44 = vpop.permute.xlu0 %2489 }
 0x3b2   : > { %v4645_v4 = vpop.permute.xlu1 %2697 }
 0x3b3   : > { %5903 = vst [vmem:[#allocation210_spill] sm:$0xff] %v4645_v4 }
 0x3b5   : > { %v4651_v59 = vpop.permute.xlu0 %2500 }
 0x3b6   : > { %v4649_v49 = vpop.permute.xlu1 %2708 }
 0x3b7   : > { %5904 = vst [vmem:[#allocation211_spill] sm:$0xff] %v4649_v49 }
 0x3b9   : > { %v4655_v32 = vpop.permute.xlu0 %2508 }
 0x3ba   : > { %v4653_v52 = vpop.permute.xlu1 %2716  ;;  %5906 = vst [vmem:[#allocation213_spill] sm:$0xff] %v4655_v32 }
 0x3bb   : > { %5905 = vst [vmem:[#allocation212_spill] sm:$0xff] %v4653_v52 }
 0x3bd   : > { %v4659_v40 = vpop.permute.xlu0 %2647 }
 0x3be   : > { %v4657_v5 = vpop.permute.xlu1 %2727 }
 0x3bf   : > { %5907 = vst [vmem:[#allocation214_spill] sm:$0xff] %v4657_v5 }
 0x3c1   : > { %v4663_v62 = vpop.permute.xlu0 %2655 }
 0x3c2   : > { %v4661_v7 = vpop.permute.xlu1 %2735  ;;  %5909 = vst [vmem:[#allocation216_spill] sm:$0xff] %v4663_v62 }
 0x3c3   : > { %5908 = vst [vmem:[#allocation215_spill] sm:$0xff] %v4661_v7 }
 0x3c5   : > { %v4667_v39 = vpop.permute.xlu0 %2666 }
 0x3c6   : > { %v4665_v12 = vpop.permute.xlu1 %2746  ;;  %5911 = vst [vmem:[#allocation218_spill] sm:$0xff] %v4667_v39 }
 0x3c7   : > { %5910 = vst [vmem:[#allocation217_spill] sm:$0xff] %v4665_v12 }
 0x3c9   : > { %v4671_v49 = vpop.permute.xlu0 %2674 }
 0x3ca   : > { %v4669_v41 = vpop.permute.xlu1 %2754  ;;  %5913 = vst [vmem:[#allocation220_spill] sm:$0xff] %v4671_v49 }
 0x3cb   : > { %5912 = vst [vmem:[#allocation219_spill] sm:$0xff] %v4669_v41 }
 0x3cd   : > { %v4675_v52 = vpop.permute.xlu0 %2685 }
 0x3ce   : > { %v4673_v1 = vpop.permute.xlu1 %2765  ;;  %5915 = vst [vmem:[#allocation222_spill] sm:$0xff] %v4675_v52 }
 0x3cf   : > { %5914 = vst [vmem:[#allocation221_spill] sm:$0xff] %v4673_v1 }
 0x3d1   : > { %v4679_v5 = vpop.permute.xlu0 %2693 }
 0x3d2   : > { %v4677_v32 = vpop.permute.xlu1 %2773  ;;  %5917 = vst [vmem:[#allocation224_spill] sm:$0xff] %v4679_v5 }
 0x3d3   : > { %5916 = vst [vmem:[#allocation223_spill] sm:$0xff] %v4677_v32 }
 0x3d5   : > { %v4683_v7 = vpop.permute.xlu0 %2704 }
 0x3d6   : > { %v4681_v4 = vpop.permute.xlu1 %2784  ;;  %5919 = vst [vmem:[#allocation226_spill] sm:$0xff] %v4683_v7 }
 0x3d7   : > { %5918 = vst [vmem:[#allocation225_spill] sm:$0xff] %v4681_v4 }
 0x3d9   : > { %v4685_v12 = vpop.permute.xlu0 %2712 }
 0x3da   : > { %5920 = vst [vmem:[#allocation227_spill] sm:$0xff] %v4685_v12 }
 0x3dd   : > { %v4687_v42 = vpop.permute.xlu0 %2723 }
 0x3de   : > { %5921 = vst [vmem:[#allocation228_spill] sm:$0xff] %v4687_v42 }
 0x3e1   : > { %v4693_v5 = vpop.permute.xlu0 %2731 }
 0x3e2   : > { %5922 = vst [vmem:[#allocation229_spill] sm:$0xff] %v4693_v5 }
 0x3e5   : > { %v4741_v62 = vpop.permute.xlu0 %2742 }
 0x3e6   : > { %5927 = vst [vmem:[#allocation234_spill] sm:$0xff] %v4741_v62 }
 0x42a   : > { %v623_v29 = vpop.xlane.xlu1 %622 }
 0x42b   : > { %3528 = vrcp.f32 %v623_v29 }
 0x435   : > { %v3529_v41 = vpop.eup %3528 }
 0x436   : > { %v649_v49 = vrot.slane %v3529_v41, %v4210_v53  ;;  %v653_v1 = vrot.slane %v3529_v41, %v4316_v31  ;;  %v633_v52 = vrot.slane %v3529_v41, %v3918_v25  ;;  %v629_v32 = vrot.slane %v3529_v41, %v3863_v2 }
 0x437   : > { %v637_v12 = vrot.slane %v3529_v41, %v3937_v34  ;;  %v641_v7 = vrot.slane %v3529_v41, %v4002_v6 }
 0x438   : > { %v4696_v4 = vmul.f32 %v4506_v9, %v649_v49  ;;  %v4699_v29 = vmul.f32 %v4412_v43, %v633_v52  ;;  %v4703_v42 = vmul.f32 %v4410_v26, %v629_v32  ;;  %v4719_v43 = vmul.f32 %v4509_v36, %v653_v1 }
 0x439   : > { %v645_v49 = vrot.slane %v3529_v41, %v4149_v55  ;;  %v4733_v39 = vmul.f32 %v4488_v13, %v637_v12  ;;  %v657_v1 = vrot.slane %v3529_v41, %v4471_v20  ;;  %v4739_v18 = vmul.f32 %v4494_v63, %v641_v7 }
 0x43a   : > { %5923 = vst [vmem:[#allocation230_spill] sm:$0xff] %v4699_v29  ;;  %v4708_v38 = vrot.slane %v4696_v4, %v3863_v2  ;;  %v4712_v5 = vrot.slane %v4696_v4, %v3918_v25  ;;  %v4716_v9 = vrot.slane %v4696_v4, %v3937_v34  ;;  %5925 = vst [vmem:[#allocation232_spill] sm:$0xff] %v4719_v43  ;;  %3197 = vperm.xlu1 %3492, %v4699_v29  }
 0x43b   : > { %v4724_v26 = vrot.slane %v4696_v4, %v4002_v6  ;;  %3194 = vperm.xlu0 %3493, %v4703_v42   ;;  %v4753_v13 = vrot.slane %v4719_v43, %v3937_v34  ;;  %v4760_v63 = vrot.slane %v4696_v4, %v4149_v55  ;;  %v4764_v41 = vmul.f32 %v4499_v45, %v645_v49 }
 0x43c   : > { %5924 = vst [vmem:[#allocation231_spill] sm:$0xff] %v4716_v9  ;;  %v920_v52 = vmul.f32 %v4018_v21, %v4708_v38  ;;  %v1168_v32 = vmul.f32 %v4080_v24, %v4712_v5  ;;  %v1448_v36 = vmul.f32 %v4159_v35, %v4716_v9  ;;  %v4745_v21 = vrot.slane %v4719_v43, %v3863_v2 }
 0x43d   : > { %5926 = vst [vmem:[#allocation233_spill] sm:$0xff] %v4724_v26  ;;  %v4749_v24 = vrot.slane %v4719_v43, %v3918_v25  ;;  %v1728_v35 = vmul.f32 %v4267_v11, %v4724_v26  ;;  %v4776_v11 = vrot.slane %v4696_v4, %v4210_v53  ;;  %v4779_v62 = vmul.f32 %v4516_v46, %v657_v1  ;;  %v2751_v26 = vpop.permute.xlu0 %2750 }
 0x43e   : > { %v1200_v29 = vadd.f32 %v1168_v32, %v920_v52  ;;  %3200 = vperm.xlu1 %3492, %v4733_v39   ;;  %v922_v7 = vmul.f32 %v4022_v23, %v4745_v21  ;;  %v4772_v32 = vrot.slane %v4719_v43, %v4002_v6  ;;  %v924_v23 = vmul.f32 %v4028_v27, %v4745_v21 }
 0x43f   : > { %3203 = vperm.xlu0 %3493, %v4739_v18   ;;  %v1170_v52 = vmul.f32 %v4084_v19, %v4749_v24  ;;  %5928 = vst [vmem:[#allocation235_spill] sm:$0xff] %v4779_v62  ;;  %v2008_v19 = vmul.f32 %v4352_v22, %v4760_v63  ;;  %v4794_v1 = vrot.slane %v4719_v43, %v4149_v55 }
 0x440   : > { %v1480_v12 = vadd.f32 %v1448_v36, %v1200_v29  ;;  %v1450_v29 = vmul.f32 %v4165_v61, %v4753_v13  ;;  %v1172_v36 = vmul.f32 %v4090_v3, %v4749_v24  ;;  %v1730_v46 = vmul.f32 %v4280_v56, %v4772_v32 }
 0x441   : > { %v1202_v49 = vadd.f32 %v1170_v52, %v922_v7  ;;  %v1452_v27 = vmul.f32 %v4171_v60, %v4753_v13  ;;  %v4800_v22 = vrot.slane %v4779_v62, %v3863_v2  ;;  %v2288_v3 = vmul.f32 %v4564_v14, %v4776_v11 }
 0x442   : > { %v1760_v45 = vadd.f32 %v1728_v35, %v1480_v12  ;;  %3206 = vperm.xlu1 %3492, %v4764_v41   ;;  %v1204_v35 = vadd.f32 %v1172_v36, %v924_v23  ;;  %v4806_v12 = vrot.slane %v4696_v4, %v4316_v31  ;;  %v4810_v7 = vrot.slane %v4779_v62, %v3918_v25 }
 0x443   : > { %v1482_v9 = vadd.f32 %v1450_v29, %v1202_v49  ;;  %v4815_v60 = vrot.slane %v4719_v43, %v4210_v53  ;;  %v926_v14 = vmul.f32 %v4030_v28, %v4800_v22  ;;  %v4827_v29 = vrot.slane %v4779_v62, %v3937_v34 }
 0x444   : > { %v2040_v61 = vadd.f32 %v2008_v19, %v1760_v45  ;;  %v1484_v52 = vadd.f32 %v1452_v27, %v1204_v35  ;;  %v1732_v45 = vmul.f32 %v4290_v0, %v4772_v32  ;;  %v1174_v49 = vmul.f32 %v4094_v51, %v4810_v7 }
 0x445   : > { %v1762_v56 = vadd.f32 %v1730_v46, %v1482_v9  ;;  %v2010_v9 = vmul.f32 %v4356_v33, %v4794_v1  ;;  %5929 = vst [vmem:[#allocation236_spill] sm:$0xff] %v4827_v29  ;;  %v2762_v46 = vpop.permute.xlu0 %2761  ;;  %v2012_v0 = vmul.f32 %v4360_v57, %v4794_v1  ;;  %v2568_v28 = vmul.f32 %v4639_v54, %v4806_v12 }
 0x446   : > { %3209 = vperm.xlu1 %3492, %v4696_v4   ;;  %v2320_v23 = vadd.f32 %v2288_v3, %v2040_v61  ;;  %v1764_v19 = vadd.f32 %v1732_v45, %v1484_v52  ;;  %v1206_v35 = vadd.f32 %v1174_v49, %v926_v14  ;;  %v4835_v33 = vrot.slane %v4696_v4, %v4471_v20 }
 0x447   : > { %v2042_v36 = vadd.f32 %v2010_v9, %v1762_v56  ;;  %v2290_v51 = vmul.f32 %v4570_v15, %v4815_v60  ;;  %v4841_v61 = vrot.slane %v4719_v43, %v4316_v31  ;;  %v4845_v27 = vrot.slane %v4719_v43, %v4471_v20 }
 0x448   : > { %v2044_v57 = vadd.f32 %v2012_v0, %v1764_v19  ;;  %v1454_v3 = vmul.f32 %v4177_v58, %v4827_v29  ;;  %v4851_v54 = vrot.slane %v4779_v62, %v4002_v6  ;;  %v2600_v4 = vadd.f32 %v2568_v28, %v2320_v23 }
 0x449   : > { %5930 = vst [vmem:[#allocation237_spill] sm:$0xff] %v4845_v27  ;;  %v4855_v15 = vrot.slane %v4779_v62, %v4149_v55  ;;  %v2322_v56 = vadd.f32 %v2290_v51, %v2042_v36  ;;  %v2292_v52 = vmul.f32 %v4574_v47, %v4815_v60  ;;  %v4861_v14 = vrot.slane %v4779_v62, %v4210_v53  ;;  %v2770_v0 = vpop.permute.xlu0 %2769 }
 0x44a   : > { %5931 = vst [vmem:[#allocation238_spill] sm:$0xff] %v4851_v54  ;;  %v1486_v45 = vadd.f32 %v1454_v3, %v1206_v35  ;;  %v2848_v58 = vmul.f32 %v2751_v26, %v4835_v33  ;;  %v4866_v9 = vrot.slane %v4779_v62, %v4316_v31  ;;  %v929_v49 = vmul.f32 %v4006_v10, %v4800_v22 }
 0x44b   : > { %5932 = vst [vmem:[#allocation239_spill] sm:$0xff] %v4855_v15  ;;  %5933 = vst [vmem:[#allocation240_spill] sm:$0xff] %v4861_v14  ;;  %v1177_v23 = vmul.f32 %v4098_v17, %v4810_v7  ;;  %v2570_v47 = vmul.f32 %v4643_v37, %v4841_v61  ;;  %v2850_v19 = vmul.f32 %v2762_v46, %v4845_v27 }
 0x44c   : > { %5934 = vst [vmem:[#allocation241_spill] sm:$0xff] %v4866_v9  ;;  %v2324_v36 = vadd.f32 %v2292_v52, %v2044_v57  ;;  %v1734_v26 = vmul.f32 %v4306_v48, %v4851_v54  ;;  %v4877_v35 = vadd.f32 %v2848_v58, %v2600_v4  ;;  %v2572_v28 = vmul.f32 %v4647_v44, %v4841_v61  ;;  %v5939_v58 = vld [vmem:[#allocation14_spill] sm:$0xff] }
 0x44d   : > { %v2852_v10 = vmul.f32 %v2770_v0, %v4845_v27  ;;  %v2014_v17 = vmul.f32 %v4364_v8, %v4855_v15  ;;  %v2602_v51 = vadd.f32 %v2570_v47, %v2322_v56  ;;  %v2294_v37 = vmul.f32 %v4580_v16, %v4861_v14 }
 0x44e   : > { %5935 = vst [vmem:[#allocation242_spill] sm:$0xff] %v4877_v35  ;;  %v1766_v3 = vadd.f32 %v1734_v26, %v1486_v45  ;;  %v4888_v46 = vrot.slane %v4779_v62, %v4471_v20  ;;  %v4892_v48 = vmul.f32 %v4651_v59, %v4866_v9  ;;  %v1209_v57 = vadd.f32 %v1177_v23, %v929_v49  ;;  %v5938_v59 = vld [vmem:[#allocation90_spill] sm:$0xff]  ;;  %v5940_v23 = vld [vmem:[#allocation37_spill] sm:$0xff]  ;;  %v5942_v26 = vld [vmem:[#allocation131_spill] sm:$0xff] }
 0x44f   : > { %v677_v44 = vrot.slane %v4703_v42, %v3863_v2  ;;  %v933_v8 = vrot.slane %v4703_v42, %v3918_v25  ;;  %v2604_v4 = vadd.f32 %v2572_v28, %v2324_v36  ;;  %v928_v56 = vmul.f32 %v4034_v30, %v4800_v22  ;;  %v5943_v28 = vld [vmem:[#allocation155_spill] sm:$0xff]  ;;  %v5957_v9 = vld [vmem:[#allocation156_spill] sm:$0xff] }
 0x450   : > { %5936 = vst [vmem:[#allocation243_spill] sm:$0xff] %v4888_v46  ;;  %5937 = vst [vmem:[#allocation244_spill] sm:$0xff] %v4892_v48  ;;  %v1176_v16 = vmul.f32 %v4100_v50, %v4810_v7  ;;  %v1213_v52 = vrot.slane %v4703_v42, %v3937_v34  ;;  %v1457_v45 = vmul.f32 %v5938_v59, %v4827_v29  ;;  %v5945_v48 = vld [vmem:[#allocation64_spill] sm:$0xff] }
 0x451   : > { %v899_v49 = vmul.f32 %v5939_v58, %v677_v44  ;;  %v1147_v47 = vmul.f32 %v5940_v23, %v933_v8  ;;  %v4910_v0 = vrot.slane %v4703_v42, %v4002_v6  ;;  %v4912_v36 = vadd.f32 %v2850_v19, %v2602_v51 }
 0x452   : > { %v2046_v30 = vadd.f32 %v2014_v17, %v1766_v3  ;;  %v1737_v50 = vmul.f32 %v5942_v26, %v4851_v54  ;;  %v4918_v43 = vmul.f32 %v5943_v28, %v4855_v15  ;;  %v1489_v62 = vadd.f32 %v1457_v45, %v1209_v57  ;;  %v5947_v17 = vld [vmem:[#allocation91_spill] sm:$0xff]  ;;  %v5948_v57 = vld [vmem:[#allocation92_spill] sm:$0xff] }
 0x453   : > { %5941 = vst [vmem:[#allocation90_spill] sm:$0xff] %v4912_v36  ;;  %v1179_v59 = vadd.f32 %v1147_v47, %v899_v49  ;;  %v1427_v58 = vmul.f32 %v5945_v48, %v1213_v52  ;;  %v4923_v23 = vrot.slane %v4703_v42, %v4149_v55  ;;  %v4925_v46 = vadd.f32 %v2852_v10, %v2604_v4  ;;  %v5949_v49 = vld [vmem:[#allocation12_spill] sm:$0xff]  ;;  %v5950_v47 = vld [vmem:[#allocation43_spill] sm:$0xff]  ;;  %v5952_v4 = vld [vmem:[#allocation138_spill] sm:$0xff] }
 0x454   : > { %5944 = vst [vmem:[#allocation14_spill] sm:$0xff] %v4918_v43  ;;  %v1208_v19 = vadd.f32 %v1176_v16, %v928_v56  ;;  %v1456_v51 = vmul.f32 %v5947_v17, %v4827_v29  ;;  %v4931_v3 = vrot.slane %v4703_v42, %v4210_v53  ;;  %v1707_v45 = vmul.f32 %v5948_v57, %v4910_v0  ;;  %v5951_v43 = vld [vmem:[#allocation117_spill] sm:$0xff] }
 0x455   : > { %5946 = vst [vmem:[#allocation37_spill] sm:$0xff] %v4925_v46  ;;  %v1459_v26 = vadd.f32 %v1427_v58, %v1179_v59  ;;  %v898_v48 = vmul.f32 %v5949_v49, %v677_v44  ;;  %v1146_v28 = vmul.f32 %v5950_v47, %v933_v8  ;;  %v4939_v10 = vmul.f32 %v5951_v43, %v4851_v54  ;;  %v5953_v17 = vld [vmem:[#allocation133_spill] sm:$0xff] }
 0x456   : > { %v4943_v56 = vmul.f32 %v5952_v4, %v4855_v15  ;;  %v4947_v16 = vrot.slane %v4703_v42, %v4316_v31  ;;  %v4951_v59 = vrot.slane %v4703_v42, %v4471_v20  ;;  %v1987_v57 = vmul.f32 %v5953_v17, %v4923_v23  ;;  %v5954_v47 = vld [vmem:[#allocation65_spill] sm:$0xff] }
 0x457   : > { %v1739_v58 = vadd.f32 %v1707_v45, %v1459_v26  ;;  %v1178_v49 = vadd.f32 %v1146_v28, %v898_v48  ;;  %v1426_v43 = vmul.f32 %v5954_v47, %v1213_v52  ;;  %v4956_v46 = vadd.f32 %v2294_v37, %v2046_v30  ;;  %v5958_v42 = vld [vmem:[#allocation93_spill] sm:$0xff]  ;;  %v5959_v45 = vld [vmem:[#allocation18_spill] sm:$0xff]  ;;  %v5960_v48 = vld [vmem:[#allocation172_spill] sm:$0xff] }
 0x458   : > { %v4958_v35 = vadd.f32 %v1737_v50, %v1489_v62  ;;  %v4960_v4 = vadd.f32 %v1456_v51, %v1208_v19  ;;  %v2267_v14 = vmul.f32 %v5957_v9, %v4931_v3  ;;  %v1706_v26 = vmul.f32 %v5958_v42, %v4910_v0  ;;  %v5961_v37 = vld [vmem:[#allocation196_spill] sm:$0xff]  ;;  %v5962_v62 = vld [vmem:[#allocation118_spill] sm:$0xff]  ;;  %v5963_v19 = vld [vmem:[#allocation39_spill] sm:$0xff] }
 0x459   : > { %5955 = vst [vmem:[#allocation131_spill] sm:$0xff] %v4956_v46  ;;  %v2019_v15 = vadd.f32 %v1987_v57, %v1739_v58  ;;  %v1458_v36 = vadd.f32 %v1426_v43, %v1178_v49  ;;  %v901_v54 = vmul.f32 %v5959_v45, %v677_v44  ;;  %v2547_v28 = vmul.f32 %v5960_v48, %v4947_v16  ;;  %v5964_v58 = vld [vmem:[#allocation140_spill] sm:$0xff]  ;;  %v5965_v49 = vld [vmem:[#allocation193_spill] sm:$0xff]  ;;  %v5966_v45 = vld [vmem:[#allocation66_spill] sm:$0xff] }
 0x45a   : > { %5956 = vst [vmem:[#allocation155_spill] sm:$0xff] %v4958_v35  ;;  %v2827_v30 = vmul.f32 %v5961_v37, %v4951_v59  ;;  %v1986_v50 = vmul.f32 %v5962_v62, %v4923_v23  ;;  %v1149_v51 = vmul.f32 %v5963_v19, %v933_v8  ;;  %v2266_v57 = vmul.f32 %v5964_v58, %v4931_v3  ;;  %v5967_v37 = vld [vmem:[#allocation16_spill] sm:$0xff]  ;;  %v5968_v19 = vld [vmem:[#allocation94_spill] sm:$0xff] }
 0x45b   : > { %v2299_v17 = vadd.f32 %v2267_v14, %v2019_v15  ;;  %v1738_v9 = vadd.f32 %v1706_v26, %v1458_v36  ;;  %v2546_v47 = vmul.f32 %v5965_v49, %v4947_v16  ;;  %v2826_v43 = vmul.f32 %v4659_v40, %v4951_v59  ;;  %v5969_v14 = vld [vmem:[#allocation44_spill] sm:$0xff]  ;;  %v5970_v58 = vld [vmem:[#allocation134_spill] sm:$0xff]  ;;  %v5971_v49 = vld [vmem:[#allocation157_spill] sm:$0xff] }
 0x45c   : > { %v1181_v42 = vadd.f32 %v1149_v51, %v901_v54  ;;  %v1429_v48 = vmul.f32 %v5966_v45, %v1213_v52  ;;  %v900_v35 = vmul.f32 %v5967_v37, %v677_v44  ;;  %v1709_v15 = vmul.f32 %v5968_v19, %v4910_v0  ;;  %v5972_v40 = vld [vmem:[#allocation173_spill] sm:$0xff] }
 0x45d   : > { %v2579_v46 = vadd.f32 %v2547_v28, %v2299_v17  ;;  %v2018_v62 = vadd.f32 %v1986_v50, %v1738_v9  ;;  %v1148_v36 = vmul.f32 %v5969_v14, %v933_v8  ;;  %v1989_v29 = vmul.f32 %v5970_v58, %v4923_v23  ;;  %v5973_v28 = vld [vmem:[#allocation67_spill] sm:$0xff]  ;;  %v5974_v9 = vld [vmem:[#allocation197_spill] sm:$0xff]  ;;  %v5975_v8 = vld [vmem:[#allocation230_spill] sm:$0xff] }
 0x45e   : > { %v1461_v26 = vadd.f32 %v1429_v48, %v1181_v42  ;;  %v2269_v27 = vmul.f32 %v5971_v49, %v4931_v3  ;;  %v2549_v54 = vmul.f32 %v5972_v40, %v4947_v16  ;;  %v1428_v50 = vmul.f32 %v5973_v28, %v1213_v52  ;;  %v5976_v58 = vld [vmem:[#allocation95_spill] sm:$0xff]  ;;  %v5981_v28 = vld [vmem:[#allocation68_spill] sm:$0xff] }
 0x45f   : > { %v2859_v51 = vadd.f32 %v2827_v30, %v2579_v46  ;;  %v2298_v45 = vadd.f32 %v2266_v57, %v2018_v62  ;;  %v1180_v44 = vadd.f32 %v1148_v36, %v900_v35  ;;  %v2829_v37 = vmul.f32 %v5974_v9, %v4951_v59  ;;  %v5977_v30 = vld [vmem:[#allocation22_spill] sm:$0xff]  ;;  %v5978_v62 = vld [vmem:[#allocation40_spill] sm:$0xff] }
 0x460   : > { %v1741_v17 = vadd.f32 %v1709_v15, %v1461_v26  ;;  %v681_v42 = vrot.slane %v5975_v8, %v3863_v2  ;;  %v937_v48 = vrot.slane %v5975_v8, %v3918_v25  ;;  %v1708_v46 = vmul.f32 %v5976_v58, %v4910_v0  ;;  %v5982_v9 = vld [vmem:[#allocation20_spill] sm:$0xff] }
 0x461   : > { %2926 = vperm.xlu1 %3492, %v2859_v51   ;;  %v2578_v19 = vadd.f32 %v2546_v47, %v2298_v45  ;;  %v1460_v14 = vadd.f32 %v1428_v50, %v1180_v44  ;;  %v5002_v35 = vrot.slane %v5975_v8, %v3937_v34  ;;  %v5008_v36 = vrot.slane %v5975_v8, %v4002_v6  ;;  %v5979_v47 = vld [vmem:[#allocation119_spill] sm:$0xff] }
 0x462   : > { %v2021_v52 = vadd.f32 %v1989_v29, %v1741_v17  ;;  %v903_v57 = vmul.f32 %v5977_v30, %v681_v42  ;;  %v1151_v15 = vmul.f32 %v5978_v62, %v937_v48  ;;  %v1988_v40 = vmul.f32 %v5979_v47, %v4923_v23  ;;  %v5980_v29 = vld [vmem:[#allocation142_spill] sm:$0xff] }
 0x463   : > { %v2858_v26 = vadd.f32 %v2826_v43, %v2578_v19  ;;  %v1740_v49 = vadd.f32 %v1708_v46, %v1460_v14  ;;  %v5014_v0 = vrot.slane %v5975_v8, %v4149_v55  ;;  %v2268_v45 = vmul.f32 %v5980_v29, %v4931_v3  ;;  %v5983_v3 = vld [vmem:[#allocation96_spill] sm:$0xff]  ;;  %v5984_v46 = vld [vmem:[#allocation46_spill] sm:$0xff] }
 0x464   : > { %v2301_v51 = vadd.f32 %v2269_v27, %v2021_v52  ;;  %v1183_v44 = vadd.f32 %v1151_v15, %v903_v57  ;;  %v1431_v50 = vmul.f32 %v5981_v28, %v5002_v35  ;;  %v5022_v43 = vrot.slane %v5975_v8, %v4210_v53  ;;  %v5985_v57 = vld [vmem:[#allocation195_spill] sm:$0xff]  ;;  %v5988_v28 = vld [vmem:[#allocation216_spill] sm:$0xff] }
 0x465   : > { %2923 = vperm.xlu0 %3493, %v2858_v26   ;;  %v2020_v17 = vadd.f32 %v1988_v40, %v1740_v49  ;;  %v5026_v23 = vrot.slane %v5975_v8, %v4316_v31  ;;  %v902_v19 = vmul.f32 %v5982_v9, %v681_v42  ;;  %v1711_v58 = vmul.f32 %v5983_v3, %v5008_v36  ;;  %v5986_v15 = vld [vmem:[#allocation135_spill] sm:$0xff] }
 0x466   : > { %v2581_v27 = vadd.f32 %v2549_v54, %v2301_v51  ;;  %v1463_v14 = vadd.f32 %v1431_v50, %v1183_v44  ;;  %v1150_v52 = vmul.f32 %v5984_v46, %v937_v48  ;;  %v2548_v62 = vmul.f32 %v5985_v57, %v4947_v16  ;;  %v5987_v51 = vld [vmem:[#allocation69_spill] sm:$0xff]  ;;  %v5989_v50 = vld [vmem:[#allocation158_spill] sm:$0xff] }
 0x467   : > { %v2300_v30 = vadd.f32 %v2268_v45, %v2020_v17  ;;  %v1991_v26 = vmul.f32 %v5986_v15, %v5014_v0  ;;  %v5038_v49 = vrot.slane %v5975_v8, %v4471_v20  ;;  %v1430_v29 = vmul.f32 %v5987_v51, %v5002_v35  ;;  %v5990_v17 = vld [vmem:[#allocation175_spill] sm:$0xff]  ;;  %v5993_v46 = vld [vmem:[#allocation206_spill] sm:$0xff]  ;;  %v5995_v57 = vld [vmem:[#allocation41_spill] sm:$0xff] }
 0x468   : > { %v2861_v47 = vadd.f32 %v2829_v37, %v2581_v27  ;;  %v1743_v40 = vadd.f32 %v1711_v58, %v1463_v14  ;;  %v1182_v54 = vadd.f32 %v1150_v52, %v902_v19  ;;  %v2828_v45 = vmul.f32 %v5988_v28, %v4951_v59  ;;  %v5991_v37 = vld [vmem:[#allocation97_spill] sm:$0xff]  ;;  %v5994_v59 = vld [vmem:[#allocation120_spill] sm:$0xff] }
 0x469   : > { %v2580_v44 = vadd.f32 %v2548_v62, %v2300_v30  ;;  %v2271_v16 = vmul.f32 %v5989_v50, %v5022_v43  ;;  %v2551_v9 = vmul.f32 %v5990_v17, %v5026_v23  ;;  %v1710_v27 = vmul.f32 %v5991_v37, %v5008_v36  ;;  %v5992_v19 = vld [vmem:[#allocation25_spill] sm:$0xff]  ;;  %v6000_v17 = vld [vmem:[#allocation24_spill] sm:$0xff] }
 0x46a   : > { %2932 = vperm.xlu1 %3492, %v2861_v47   ;;  %v2023_v3 = vadd.f32 %v1991_v26, %v1743_v40  ;;  %v1462_v8 = vadd.f32 %v1430_v29, %v1182_v54  ;;  %v905_v14 = vmul.f32 %v5992_v19, %v681_v42  ;;  %v2831_v52 = vmul.f32 %v5993_v46, %v5038_v49  ;;  %v5996_v47 = vld [vmem:[#allocation144_spill] sm:$0xff]  ;;  %v5997_v40 = vld [vmem:[#allocation198_spill] sm:$0xff] }
 0x46b   : > { %v2860_v58 = vadd.f32 %v2828_v45, %v2580_v44  ;;  %v1990_v30 = vmul.f32 %v5994_v59, %v5014_v0  ;;  %v1153_v62 = vmul.f32 %v5995_v57, %v937_v48  ;;  %v2270_v26 = vmul.f32 %v5996_v47, %v5022_v43  ;;  %v5998_v29 = vld [vmem:[#allocation218_spill] sm:$0xff]  ;;  %v6003_v57 = vld [vmem:[#allocation136_spill] sm:$0xff]  ;;  %v6004_v47 = vld [vmem:[#allocation159_spill] sm:$0xff] }
 0x46c   : > { %v2303_v15 = vadd.f32 %v2271_v16, %v2023_v3  ;;  %v1742_v51 = vadd.f32 %v1710_v27, %v1462_v8  ;;  %v2550_v54 = vmul.f32 %v5997_v40, %v5026_v23  ;;  %v2830_v44 = vmul.f32 %v5998_v29, %v5038_v49  ;;  %v5999_v45 = vld [vmem:[#allocation70_spill] sm:$0xff]  ;;  %v6002_v8 = vld [vmem:[#allocation48_spill] sm:$0xff] }
 0x46d   : > { %2929 = vperm.xlu0 %3493, %v2860_v58   ;;  %v1185_v28 = vadd.f32 %v1153_v62, %v905_v14  ;;  %v1433_v50 = vmul.f32 %v5999_v45, %v5002_v35  ;;  %v904_v37 = vmul.f32 %v6000_v17, %v681_v42  ;;  %v6001_v16 = vld [vmem:[#allocation98_spill] sm:$0xff]  ;;  %v1152_v27 = vmul.f32 %v6002_v8, %v937_v48  ;;  %v6005_v14 = vld [vmem:[#allocation177_spill] sm:$0xff] }
 0x46e   : > { %v2583_v19 = vadd.f32 %v2551_v9, %v2303_v15  ;;  %v2022_v46 = vadd.f32 %v1990_v30, %v1742_v51  ;;  %v1713_v3 = vmul.f32 %v6001_v16, %v5008_v36  ;;  %v1993_v58 = vmul.f32 %v6003_v57, %v5014_v0  ;;  %v6006_v9 = vld [vmem:[#allocation71_spill] sm:$0xff]  ;;  %v6007_v51 = vld [vmem:[#allocation208_spill] sm:$0xff] }
 0x46f   : > { %v1465_v59 = vadd.f32 %v1433_v50, %v1185_v28  ;;  %v2273_v40 = vmul.f32 %v6004_v47, %v5022_v43  ;;  %v2553_v62 = vmul.f32 %v6005_v14, %v5026_v23  ;;  %v1184_v42 = vadd.f32 %v1152_v27, %v904_v37 }
 0x470   : > { %v2863_v29 = vadd.f32 %v2831_v52, %v2583_v19  ;;  %v2302_v45 = vadd.f32 %v2270_v26, %v2022_v46  ;;  %v1432_v30 = vmul.f32 %v6006_v9, %v5002_v35  ;;  %v2833_v48 = vmul.f32 %v6007_v51, %v5038_v49  ;;  %v6008_v52 = vld [vmem:[#allocation99_spill] sm:$0xff] }
 0x471   : > { %v1745_v15 = vadd.f32 %v1713_v3, %v1465_v59  ;;  %v685_v28 = vrot.slane %v4733_v39, %v3863_v2  ;;  %v941_v50 = vrot.slane %v4733_v39, %v3918_v25  ;;  %v1712_v26 = vmul.f32 %v6008_v52, %v5008_v36  ;;  %v6009_v19 = vld [vmem:[#allocation27_spill] sm:$0xff]  ;;  %v6010_v3 = vld [vmem:[#allocation42_spill] sm:$0xff]  ;;  %v6016_v52 = vld [vmem:[#allocation49_spill] sm:$0xff] }
 0x472   : > { %2938 = vperm.xlu1 %3492, %v2863_v29   ;;  %v2582_v17 = vadd.f32 %v2550_v54, %v2302_v45  ;;  %v1464_v16 = vadd.f32 %v1432_v30, %v1184_v42  ;;  %v5086_v37 = vrot.slane %v4733_v39, %v3937_v34  ;;  %v5092_v27 = vrot.slane %v4733_v39, %v4002_v6  ;;  %v6011_v54 = vld [vmem:[#allocation121_spill] sm:$0xff]  ;;  %v6013_v42 = vld [vmem:[#allocation72_spill] sm:$0xff] }
 0x473   : > { %v2025_v35 = vadd.f32 %v1993_v58, %v1745_v15  ;;  %v907_v46 = vmul.f32 %v6009_v19, %v685_v28  ;;  %v1155_v8 = vmul.f32 %v6010_v3, %v941_v50  ;;  %v1992_v47 = vmul.f32 %v6011_v54, %v5014_v0  ;;  %v6012_v58 = vld [vmem:[#allocation146_spill] sm:$0xff]  ;;  %v6014_v15 = vld [vmem:[#allocation13_spill] sm:$0xff]  ;;  %v6017_v19 = vld [vmem:[#allocation199_spill] sm:$0xff] }
 0x474   : > { %v2862_v59 = vadd.f32 %v2830_v44, %v2582_v17  ;;  %v1744_v57 = vadd.f32 %v1712_v26, %v1464_v16  ;;  %v5098_v36 = vrot.slane %v4733_v39, %v4149_v55  ;;  %v2272_v29 = vmul.f32 %v6012_v58, %v5022_v43  ;;  %v6015_v43 = vld [vmem:[#allocation100_spill] sm:$0xff]  ;;  %v6018_v3 = vld [vmem:[#allocation137_spill] sm:$0xff] }
 0x475   : > { %v2305_v14 = vadd.f32 %v2273_v40, %v2025_v35  ;;  %v1187_v45 = vadd.f32 %v1155_v8, %v907_v46  ;;  %v1435_v9 = vmul.f32 %v6013_v42, %v5086_v37  ;;  %v5106_v44 = vrot.slane %v4733_v39, %v4210_v53  ;;  %v6021_v42 = vld [vmem:[#allocation160_spill] sm:$0xff] }
 0x476   : > { %2935 = vperm.xlu0 %3493, %v2862_v59   ;;  %v2024_v30 = vadd.f32 %v1992_v47, %v1744_v57  ;;  %v5110_v0 = vrot.slane %v4733_v39, %v4316_v31  ;;  %v906_v51 = vmul.f32 %v6014_v15, %v685_v28  ;;  %v1715_v16 = vmul.f32 %v6015_v43, %v5092_v27  ;;  %v6019_v47 = vld [vmem:[#allocation73_spill] sm:$0xff] }
 0x477   : > { %v2585_v40 = vadd.f32 %v2553_v62, %v2305_v14  ;;  %v1467_v17 = vadd.f32 %v1435_v9, %v1187_v45  ;;  %v1154_v26 = vmul.f32 %v6016_v52, %v941_v50  ;;  %v2552_v46 = vmul.f32 %v6017_v19, %v5026_v23  ;;  %v6020_v45 = vld [vmem:[#allocation220_spill] sm:$0xff] }
 0x478   : > { %v2304_v35 = vadd.f32 %v2272_v29, %v2024_v30  ;;  %v1995_v8 = vmul.f32 %v6018_v3, %v5098_v36  ;;  %v5122_v59 = vrot.slane %v4733_v39, %v4471_v20  ;;  %v1434_v14 = vmul.f32 %v6019_v47, %v5086_v37  ;;  %v6022_v9 = vld [vmem:[#allocation180_spill] sm:$0xff]  ;;  %v6030_v47 = vld [vmem:[#allocation222_spill] sm:$0xff] }
 0x479   : > { %v2865_v57 = vadd.f32 %v2833_v48, %v2585_v40  ;;  %v1747_v54 = vadd.f32 %v1715_v16, %v1467_v17  ;;  %v1186_v62 = vadd.f32 %v1154_v26, %v906_v51  ;;  %v2832_v29 = vmul.f32 %v6020_v45, %v5038_v49  ;;  %v6023_v48 = vld [vmem:[#allocation101_spill] sm:$0xff]  ;;  %v6024_v51 = vld [vmem:[#allocation30_spill] sm:$0xff] }
 0x47a   : > { %v2584_v58 = vadd.f32 %v2552_v46, %v2304_v35  ;;  %v2275_v23 = vmul.f32 %v6021_v42, %v5106_v44  ;;  %v2555_v30 = vmul.f32 %v6022_v9, %v5110_v0  ;;  %v1714_v40 = vmul.f32 %v6023_v48, %v5092_v27  ;;  %v6025_v16 = vld [vmem:[#allocation209_spill] sm:$0xff]  ;;  %v6026_v49 = vld [vmem:[#allocation122_spill] sm:$0xff] }
 0x47b   : > { %2944 = vperm.xlu1 %3492, %v2865_v57   ;;  %v2027_v15 = vadd.f32 %v1995_v8, %v1747_v54  ;;  %v1466_v39 = vadd.f32 %v1434_v14, %v1186_v62  ;;  %v909_v17 = vmul.f32 %v6024_v51, %v685_v28  ;;  %v2835_v52 = vmul.f32 %v6025_v16, %v5122_v59  ;;  %v6027_v35 = vld [vmem:[#allocation45_spill] sm:$0xff]  ;;  %v6028_v57 = vld [vmem:[#allocation148_spill] sm:$0xff]  ;;  %v6031_v45 = vld [vmem:[#allocation74_spill] sm:$0xff] }
 0x47c   : > { %v2864_v43 = vadd.f32 %v2832_v29, %v2584_v58  ;;  %v1994_v26 = vmul.f32 %v6026_v49, %v5098_v36  ;;  %v1157_v19 = vmul.f32 %v6027_v35, %v941_v50  ;;  %v2274_v8 = vmul.f32 %v6028_v57, %v5106_v44  ;;  %v6029_v54 = vld [vmem:[#allocation200_spill] sm:$0xff]  ;;  %v6032_v42 = vld [vmem:[#allocation29_spill] sm:$0xff]  ;;  %v6035_v49 = vld [vmem:[#allocation139_spill] sm:$0xff] }
 0x47d   : > { %v2307_v46 = vadd.f32 %v2275_v23, %v2027_v15  ;;  %v1746_v3 = vadd.f32 %v1714_v40, %v1466_v39  ;;  %v2554_v62 = vmul.f32 %v6029_v54, %v5110_v0  ;;  %v2834_v14 = vmul.f32 %v6030_v47, %v5122_v59  ;;  %v6033_v23 = vld [vmem:[#allocation102_spill] sm:$0xff]  ;;  %v6034_v39 = vld [vmem:[#allocation51_spill] sm:$0xff]  ;;  %v6036_v35 = vld [vmem:[#allocation161_spill] sm:$0xff] }
 0x47e   : > { %2941 = vperm.xlu0 %3493, %v2864_v43   ;;  %v1189_v58 = vadd.f32 %v1157_v19, %v909_v17  ;;  %v1437_v29 = vmul.f32 %v6031_v45, %v5086_v37  ;;  %v908_v9 = vmul.f32 %v6032_v42, %v685_v28  ;;  %v1717_v15 = vmul.f32 %v6033_v23, %v5092_v27  ;;  %v6037_v17 = vld [vmem:[#allocation181_spill] sm:$0xff]  ;;  %v6042_v23 = vld [vmem:[#allocation47_spill] sm:$0xff] }
 0x47f   : > { %v2587_v48 = vadd.f32 %v2555_v30, %v2307_v46  ;;  %v2026_v51 = vadd.f32 %v1994_v26, %v1746_v3  ;;  %v1156_v40 = vmul.f32 %v6034_v39, %v941_v50  ;;  %v1997_v43 = vmul.f32 %v6035_v49, %v5098_v36  ;;  %v6038_v30 = vld [vmem:[#allocation75_spill] sm:$0xff]  ;;  %v6039_v3 = vld [vmem:[#allocation210_spill] sm:$0xff] }
 0x480   : > { %v1469_v16 = vadd.f32 %v1437_v29, %v1189_v58  ;;  %v2277_v57 = vmul.f32 %v6036_v35, %v5106_v44  ;;  %v2557_v19 = vmul.f32 %v6037_v17, %v5110_v0  ;;  %v1436_v26 = vmul.f32 %v6038_v30, %v5086_v37 }
 0x481   : > { %v2867_v54 = vadd.f32 %v2835_v52, %v2587_v48  ;;  %v2306_v47 = vadd.f32 %v2274_v8, %v2026_v51  ;;  %v1188_v28 = vadd.f32 %v1156_v40, %v908_v9  ;;  %v2837_v50 = vmul.f32 %v6039_v3, %v5122_v59  ;;  %v6040_v52 = vld [vmem:[#allocation103_spill] sm:$0xff] }
 0x482   : > { %v1749_v46 = vadd.f32 %v1717_v15, %v1469_v16  ;;  %v689_v58 = vrot.slane %v4739_v18, %v3863_v2  ;;  %v945_v45 = vrot.slane %v4739_v18, %v3918_v25  ;;  %v1716_v8 = vmul.f32 %v6040_v52, %v5092_v27  ;;  %v6041_v48 = vld [vmem:[#allocation15_spill] sm:$0xff] }
 0x483   : > { %2950 = vperm.xlu1 %3492, %v2867_v54   ;;  %v2586_v29 = vadd.f32 %v2554_v62, %v2306_v47  ;;  %v1468_v42 = vadd.f32 %v1436_v26, %v1188_v28  ;;  %v5170_v9 = vrot.slane %v4739_v18, %v3937_v34  ;;  %v5176_v39 = vrot.slane %v4739_v18, %v4002_v6  ;;  %v6043_v62 = vld [vmem:[#allocation123_spill] sm:$0xff]  ;;  %v6045_v47 = vld [vmem:[#allocation76_spill] sm:$0xff] }
 0x484   : > { %v2029_v37 = vadd.f32 %v1997_v43, %v1749_v46  ;;  %v911_v51 = vmul.f32 %v6041_v48, %v689_v58  ;;  %v1159_v15 = vmul.f32 %v6042_v23, %v945_v45  ;;  %v1996_v49 = vmul.f32 %v6043_v62, %v5098_v36  ;;  %v6044_v43 = vld [vmem:[#allocation150_spill] sm:$0xff]  ;;  %v6046_v26 = vld [vmem:[#allocation32_spill] sm:$0xff]  ;;  %v6051_v62 = vld [vmem:[#allocation77_spill] sm:$0xff] }
 0x485   : > { %v2866_v40 = vadd.f32 %v2834_v14, %v2586_v29  ;;  %v1748_v16 = vadd.f32 %v1716_v8, %v1468_v42  ;;  %v5182_v27 = vrot.slane %v4739_v18, %v4149_v55  ;;  %v2276_v17 = vmul.f32 %v6044_v43, %v5106_v44  ;;  %v6047_v44 = vld [vmem:[#allocation105_spill] sm:$0xff]  ;;  %v6052_v43 = vld [vmem:[#allocation224_spill] sm:$0xff] }
 0x486   : > { %v2309_v35 = vadd.f32 %v2277_v57, %v2029_v37  ;;  %v1191_v54 = vadd.f32 %v1159_v15, %v911_v51  ;;  %v1439_v28 = vmul.f32 %v6045_v47, %v5170_v9  ;;  %v5190_v14 = vrot.slane %v4739_v18, %v4210_v53  ;;  %v6048_v42 = vld [vmem:[#allocation53_spill] sm:$0xff]  ;;  %v6054_v47 = vld [vmem:[#allocation183_spill] sm:$0xff] }
 0x487   : > { %2947 = vperm.xlu0 %3493, %v2866_v40   ;;  %v2028_v30 = vadd.f32 %v1996_v49, %v1748_v16  ;;  %v5194_v36 = vrot.slane %v4739_v18, %v4316_v31  ;;  %v910_v46 = vmul.f32 %v6046_v26, %v689_v58  ;;  %v1719_v29 = vmul.f32 %v6047_v44, %v5176_v39  ;;  %v6049_v37 = vld [vmem:[#allocation201_spill] sm:$0xff]  ;;  %v6057_v44 = vld [vmem:[#allocation211_spill] sm:$0xff] }
 0x488   : > { %v2589_v57 = vadd.f32 %v2557_v19, %v2309_v35  ;;  %v1471_v3 = vadd.f32 %v1439_v28, %v1191_v54  ;;  %v1158_v52 = vmul.f32 %v6048_v42, %v945_v45  ;;  %v2556_v48 = vmul.f32 %v6049_v37, %v5110_v0  ;;  %v6050_v51 = vld [vmem:[#allocation141_spill] sm:$0xff]  ;;  %v6053_v54 = vld [vmem:[#allocation162_spill] sm:$0xff] }
 0x489   : > { %v2308_v8 = vadd.f32 %v2276_v17, %v2028_v30  ;;  %v1999_v23 = vmul.f32 %v6050_v51, %v5182_v27  ;;  %v5206_v15 = vrot.slane %v4739_v18, %v4471_v20  ;;  %v1438_v49 = vmul.f32 %v6051_v62, %v5170_v9  ;;  %v6060_v51 = vld [vmem:[#allocation174_spill] sm:$0xff] }
 0x48a   : > { %v2869_v40 = vadd.f32 %v2837_v50, %v2589_v57  ;;  %v1751_v16 = vadd.f32 %v1719_v29, %v1471_v3  ;;  %v1190_v19 = vadd.f32 %v1158_v52, %v910_v46  ;;  %v2836_v17 = vmul.f32 %v6052_v43, %v5122_v59  ;;  %v6055_v50 = vld [vmem:[#allocation104_spill] sm:$0xff]  ;;  %v6056_v46 = vld [vmem:[#allocation17_spill] sm:$0xff]  ;;  %v6059_v52 = vld [vmem:[#allocation50_spill] sm:$0xff] }
 0x48b   : > { %v2588_v35 = vadd.f32 %v2556_v48, %v2308_v8  ;;  %v2279_v0 = vmul.f32 %v6053_v54, %v5190_v14  ;;  %v2559_v28 = vmul.f32 %v6054_v47, %v5194_v36  ;;  %v1718_v26 = vmul.f32 %v6055_v50, %v5176_v39  ;;  %v6058_v59 = vld [vmem:[#allocation124_spill] sm:$0xff] }
 0x48c   : > { %2956 = vperm.xlu1 %3492, %v2869_v40   ;;  %v2031_v30 = vadd.f32 %v1999_v23, %v1751_v16  ;;  %v1470_v18 = vadd.f32 %v1438_v49, %v1190_v19  ;;  %v913_v57 = vmul.f32 %v6056_v46, %v689_v58  ;;  %v2839_v29 = vmul.f32 %v6057_v44, %v5206_v15  ;;  %v6061_v40 = vld [vmem:[#allocation202_spill] sm:$0xff]  ;;  %v6067_v44 = vld [vmem:[#allocation143_spill] sm:$0xff] }
 0x48d   : > { %v2868_v3 = vadd.f32 %v2836_v17, %v2588_v35  ;;  %v1998_v42 = vmul.f32 %v6058_v59, %v5182_v27  ;;  %v1161_v8 = vmul.f32 %v6059_v52, %v945_v45  ;;  %v2278_v23 = vmul.f32 %v6060_v51, %v5190_v14  ;;  %v6062_v19 = vld [vmem:[#allocation226_spill] sm:$0xff]  ;;  %v6068_v59 = vld [vmem:[#allocation163_spill] sm:$0xff] }
 0x48e   : > { %v2311_v37 = vadd.f32 %v2279_v0, %v2031_v30  ;;  %v1750_v48 = vadd.f32 %v1718_v26, %v1470_v18  ;;  %v2558_v16 = vmul.f32 %v6061_v40, %v5194_v36  ;;  %v2838_v62 = vmul.f32 %v6062_v19, %v5206_v15  ;;  %v6063_v35 = vld [vmem:[#allocation78_spill] sm:$0xff]  ;;  %v6065_v0 = vld [vmem:[#allocation107_spill] sm:$0xff] }
 0x48f   : > { %2953 = vperm.xlu0 %3493, %v2868_v3   ;;  %v1193_v49 = vadd.f32 %v1161_v8, %v913_v57  ;;  %v1441_v43 = vmul.f32 %v6063_v35, %v5170_v9  ;;  %v6064_v17 = vld [vmem:[#allocation34_spill] sm:$0xff]  ;;  %v1721_v30 = vmul.f32 %v6065_v0, %v5176_v39  ;;  %v2001_v3 = vmul.f32 %v6067_v44, %v5182_v27  ;;  %v6069_v57 = vld [vmem:[#allocation184_spill] sm:$0xff] }
 0x490   : > { %v912_v54 = vmul.f32 %v6064_v17, %v689_v58  ;;  %v2591_v47 = vadd.f32 %v2559_v28, %v2311_v37  ;;  %v2030_v50 = vadd.f32 %v1998_v42, %v1750_v48  ;;  %v6066_v18 = vld [vmem:[#allocation54_spill] sm:$0xff]  ;;  %v2281_v52 = vmul.f32 %v6068_v59, %v5190_v14  ;;  %v6070_v28 = vld [vmem:[#allocation79_spill] sm:$0xff]  ;;  %v6071_v48 = vld [vmem:[#allocation212_spill] sm:$0xff] }
 0x491   : > { %v1160_v26 = vmul.f32 %v6066_v18, %v945_v45  ;;  %v1473_v46 = vadd.f32 %v1441_v43, %v1193_v49  ;;  %v2561_v8 = vmul.f32 %v6069_v57, %v5194_v36  ;;  %v1440_v42 = vmul.f32 %v6070_v28, %v5170_v9  ;;  %v6081_v28 = vld [vmem:[#allocation56_spill] sm:$0xff] }
 0x492   : > { %v2871_v51 = vadd.f32 %v2839_v29, %v2591_v47  ;;  %v2310_v40 = vadd.f32 %v2278_v23, %v2030_v50  ;;  %v2841_v45 = vmul.f32 %v6071_v48, %v5206_v15  ;;  %v693_v19 = vrot.slane %v4764_v41, %v3863_v2  ;;  %v6072_v29 = vld [vmem:[#allocation106_spill] sm:$0xff]  ;;  %v6074_v50 = vld [vmem:[#allocation52_spill] sm:$0xff]  ;;  %v6082_v48 = vld [vmem:[#allocation145_spill] sm:$0xff] }
 0x493   : > { %v1192_v58 = vadd.f32 %v1160_v26, %v912_v54  ;;  %v1753_v37 = vadd.f32 %v1721_v30, %v1473_v46  ;;  %v949_v49 = vrot.slane %v4764_v41, %v3918_v25  ;;  %v1720_v23 = vmul.f32 %v6072_v29, %v5176_v39  ;;  %v6073_v54 = vld [vmem:[#allocation19_spill] sm:$0xff]  ;;  %v6076_v26 = vld [vmem:[#allocation176_spill] sm:$0xff] }
 0x494   : > { %2962 = vperm.xlu1 %3492, %v2871_v51   ;;  %v2590_v35 = vadd.f32 %v2558_v16, %v2310_v40  ;;  %v5254_v17 = vrot.slane %v4764_v41, %v3937_v34  ;;  %v915_v47 = vmul.f32 %v6073_v54, %v693_v19  ;;  %v5260_v2 = vrot.slane %v4764_v41, %v4002_v6  ;;  %v6075_v16 = vld [vmem:[#allocation126_spill] sm:$0xff]  ;;  %v6079_v51 = vld [vmem:[#allocation35_spill] sm:$0xff] }
 0x495   : > { %v1472_v43 = vadd.f32 %v1440_v42, %v1192_v58  ;;  %v2033_v9 = vadd.f32 %v2001_v3, %v1753_v37  ;;  %v1163_v0 = vmul.f32 %v6074_v50, %v949_v49  ;;  %v2000_v18 = vmul.f32 %v6075_v16, %v5182_v27  ;;  %v6077_v3 = vld [vmem:[#allocation80_spill] sm:$0xff]  ;;  %v6080_v58 = vld [vmem:[#allocation110_spill] sm:$0xff]  ;;  %v6084_v50 = vld [vmem:[#allocation227_spill] sm:$0xff] }
 0x496   : > { %v2870_v25 = vadd.f32 %v2838_v62, %v2590_v35  ;;  %v5266_v39 = vrot.slane %v4764_v41, %v4149_v55  ;;  %v2280_v46 = vmul.f32 %v6076_v26, %v5190_v14  ;;  %v1443_v59 = vmul.f32 %v6077_v3, %v5254_v17  ;;  %v6078_v62 = vld [vmem:[#allocation203_spill] sm:$0xff]  ;;  %v6087_v16 = vld [vmem:[#allocation21_spill] sm:$0xff] }
 0x497   : > { %v1752_v30 = vadd.f32 %v1720_v23, %v1472_v43  ;;  %v2313_v34 = vadd.f32 %v2281_v52, %v2033_v9  ;;  %v1195_v44 = vadd.f32 %v1163_v0, %v915_v47  ;;  %v2560_v57 = vmul.f32 %v6078_v62, %v5194_v36  ;;  %v6083_v23 = vld [vmem:[#allocation81_spill] sm:$0xff] }
 0x498   : > { %2959 = vperm.xlu0 %3493, %v2870_v25   ;;  %v5276_v27 = vrot.slane %v4764_v41, %v4210_v53  ;;  %v914_v55 = vmul.f32 %v6079_v51, %v693_v19  ;;  %v1723_v14 = vmul.f32 %v6080_v58, %v5260_v2  ;;  %v1162_v42 = vmul.f32 %v6081_v28, %v949_v49  ;;  %v6088_v26 = vld [vmem:[#allocation185_spill] sm:$0xff]  ;;  %v6094_v58 = vld [vmem:[#allocation82_spill] sm:$0xff]  ;;  %v6095_v28 = vld [vmem:[#allocation36_spill] sm:$0xff] }
 0x499   : > { %v2032_v6 = vadd.f32 %v2000_v18, %v1752_v30  ;;  %v2593_v40 = vadd.f32 %v2561_v8, %v2313_v34  ;;  %v1475_v52 = vadd.f32 %v1443_v59, %v1195_v44  ;;  %v2003_v35 = vmul.f32 %v6082_v48, %v5266_v39  ;;  %v6090_v44 = vld [vmem:[#allocation55_spill] sm:$0xff] }
 0x49a   : > { %v5286_v36 = vrot.slane %v4764_v41, %v4316_v31  ;;  %v5290_v53 = vrot.slane %v4764_v41, %v4471_v20  ;;  %v1194_v29 = vadd.f32 %v1162_v42, %v914_v55  ;;  %v1442_v9 = vmul.f32 %v6083_v23, %v5254_v17  ;;  %v6085_v31 = vld [vmem:[#allocation164_spill] sm:$0xff] }
 0x49b   : > { %v2312_v37 = vadd.f32 %v2280_v46, %v2032_v6  ;;  %v2873_v43 = vadd.f32 %v2841_v45, %v2593_v40  ;;  %v1755_v8 = vadd.f32 %v1723_v14, %v1475_v52  ;;  %v5296_v54 = vadd.f32 %v4939_v10, %v4960_v4  ;;  %v6086_v45 = vld [vmem:[#allocation108_spill] sm:$0xff]  ;;  %v6089_v4 = vld [vmem:[#allocation214_spill] sm:$0xff] }
 0x49c   : > { %v2840_v0 = vmul.f32 %v6084_v50, %v5206_v15  ;;  %v2283_v25 = vmul.f32 %v6085_v31, %v5276_v27  ;;  %v1474_v41 = vadd.f32 %v1442_v9, %v1194_v29  ;;  %v1722_v30 = vmul.f32 %v6086_v45, %v5260_v2  ;;  %v6091_v6 = vld [vmem:[#allocation128_spill] sm:$0xff]  ;;  %v6098_v9 = vld [vmem:[#allocation113_spill] sm:$0xff]  ;;  %v6099_v50 = vld [vmem:[#allocation147_spill] sm:$0xff] }
 0x49d   : > { %v2592_v47 = vadd.f32 %v2560_v57, %v2312_v37  ;;  %2968 = vperm.xlu1 %3492, %v2873_v43   ;;  %v2035_v20 = vadd.f32 %v2003_v35, %v1755_v8  ;;  %v917_v18 = vmul.f32 %v6087_v16, %v693_v19  ;;  %v2563_v10 = vmul.f32 %v6088_v26, %v5286_v36  ;;  %v6092_v57 = vld [vmem:[#allocation178_spill] sm:$0xff]  ;;  %v6093_v55 = vld [vmem:[#allocation204_spill] sm:$0xff]  ;;  %v6100_v31 = vld [vmem:[#allocation165_spill] sm:$0xff] }
 0x49e   : > { %v2843_v46 = vmul.f32 %v6089_v4, %v5290_v53  ;;  %v1165_v15 = vmul.f32 %v6090_v44, %v949_v49  ;;  %v1754_v59 = vadd.f32 %v1722_v30, %v1474_v41  ;;  %v2002_v62 = vmul.f32 %v6091_v6, %v5266_v39  ;;  %v6096_v35 = vld [vmem:[#allocation228_spill] sm:$0xff]  ;;  %v6097_v8 = vld [vmem:[#allocation58_spill] sm:$0xff]  ;;  %v6101_v45 = vld [vmem:[#allocation83_spill] sm:$0xff] }
 0x49f   : > { %v2872_v34 = vadd.f32 %v2840_v0, %v2592_v47  ;;  %v2315_v3 = vadd.f32 %v2283_v25, %v2035_v20  ;;  %v2282_v51 = vmul.f32 %v6092_v57, %v5276_v27  ;;  %v2562_v40 = vmul.f32 %v6093_v55, %v5286_v36  ;;  %v6108_v55 = vld [vmem:[#allocation231_spill] sm:$0xff] }
 0x4a0   : > { %v1197_v52 = vadd.f32 %v1165_v15, %v917_v18  ;;  %v1445_v14 = vmul.f32 %v6094_v58, %v5254_v17  ;;  %v916_v42 = vmul.f32 %v6095_v28, %v693_v19  ;;  %v2034_v48 = vadd.f32 %v2002_v62, %v1754_v59  ;;  %v6102_v18 = vld [vmem:[#allocation186_spill] sm:$0xff]  ;;  %v6105_v15 = vld [vmem:[#allocation215_spill] sm:$0xff]  ;;  %v6106_v59 = vld [vmem:[#allocation109_spill] sm:$0xff] }
 0x4a1   : > { %2965 = vperm.xlu0 %3493, %v2872_v34   ;;  %v2595_v37 = vadd.f32 %v2563_v10, %v2315_v3  ;;  %v2842_v43 = vmul.f32 %v6096_v35, %v5290_v53  ;;  %v1164_v29 = vmul.f32 %v6097_v8, %v949_v49  ;;  %v1725_v47 = vmul.f32 %v6098_v9, %v5260_v2  ;;  %v6103_v34 = vld [vmem:[#allocation23_spill] sm:$0xff]  ;;  %v6104_v10 = vld [vmem:[#allocation57_spill] sm:$0xff]  ;;  %v6107_v62 = vld [vmem:[#allocation130_spill] sm:$0xff] }
 0x4a2   : > { %v1477_v23 = vadd.f32 %v1445_v14, %v1197_v52  ;;  %v2005_v0 = vmul.f32 %v6099_v50, %v5266_v39  ;;  %v2285_v25 = vmul.f32 %v6100_v31, %v5276_v27  ;;  %v2314_v41 = vadd.f32 %v2282_v51, %v2034_v48  ;;  %v6109_v52 = vld [vmem:[#allocation84_spill] sm:$0xff]  ;;  %v6112_v48 = vld [vmem:[#allocation115_spill] sm:$0xff]  ;;  %v6115_v50 = vld [vmem:[#allocation205_spill] sm:$0xff] }
 0x4a3   : > { %v2875_v20 = vadd.f32 %v2843_v46, %v2595_v37  ;;  %v1196_v19 = vadd.f32 %v1164_v29, %v916_v42  ;;  %v1444_v30 = vmul.f32 %v6101_v45, %v5254_v17  ;;  %v2565_v49 = vmul.f32 %v6102_v18, %v5286_v36  ;;  %v6110_v42 = vld [vmem:[#allocation179_spill] sm:$0xff]  ;;  %v6111_v37 = vld [vmem:[#allocation233_spill] sm:$0xff]  ;;  %v6119_v18 = vld [vmem:[#allocation166_spill] sm:$0xff] }
 0x4a4   : > { %v1757_v16 = vadd.f32 %v1725_v47, %v1477_v23  ;;  %v919_v26 = vmul.f32 %v6103_v34, %v4708_v38  ;;  %v1167_v4 = vmul.f32 %v6104_v10, %v4712_v5  ;;  %v2594_v44 = vadd.f32 %v2562_v40, %v2314_v41  ;;  %v6114_v9 = vld [vmem:[#allocation59_spill] sm:$0xff]  ;;  %v6118_v45 = vld [vmem:[#allocation85_spill] sm:$0xff] }
 0x4a5   : > { %2974 = vperm.xlu1 %3492, %v2875_v20   ;;  %v2845_v46 = vmul.f32 %v6105_v15, %v5290_v53  ;;  %v1476_v3 = vadd.f32 %v1444_v30, %v1196_v19  ;;  %v1724_v6 = vmul.f32 %v6106_v59, %v5260_v2  ;;  %v2004_v57 = vmul.f32 %v6107_v62, %v5266_v39  ;;  %v6113_v2 = vld [vmem:[#allocation38_spill] sm:$0xff] }
 0x4a6   : > { %v2037_v17 = vadd.f32 %v2005_v0, %v1757_v16  ;;  %v1199_v51 = vadd.f32 %v1167_v4, %v919_v26  ;;  %v1447_v58 = vmul.f32 %v6109_v52, %v6108_v55  ;;  %v2874_v14 = vadd.f32 %v2842_v43, %v2594_v44  ;;  %v6116_v0 = vld [vmem:[#allocation229_spill] sm:$0xff]  ;;  %v6120_v26 = vld [vmem:[#allocation111_spill] sm:$0xff]  ;;  %v6125_v52 = vld [vmem:[#allocation132_spill] sm:$0xff] }
 0x4a7   : > { %v1756_v28 = vadd.f32 %v1724_v6, %v1476_v3  ;;  %v2284_v40 = vmul.f32 %v6110_v42, %v5276_v27  ;;  %v1727_v35 = vmul.f32 %v6112_v48, %v6111_v37  ;;  %v918_v23 = vmul.f32 %v6113_v2, %v4708_v38  ;;  %v6117_v27 = vld [vmem:[#allocation149_spill] sm:$0xff] }
 0x4a8   : > { %v2317_v8 = vadd.f32 %v2285_v25, %v2037_v17  ;;  %v1479_v29 = vadd.f32 %v1447_v58, %v1199_v51  ;;  %v1166_v39 = vmul.f32 %v6114_v9, %v4712_v5  ;;  %2971 = vperm.xlu0 %3493, %v2874_v14   ;;  %v2564_v43 = vmul.f32 %v6115_v50, %v5286_v36  ;;  %v6121_v36 = vld [vmem:[#allocation28_spill] sm:$0xff]  ;;  %v6122_v3 = vld [vmem:[#allocation61_spill] sm:$0xff]  ;;  %v6123_v17 = vld [vmem:[#allocation187_spill] sm:$0xff] }
 0x4a9   : > { %v2036_v47 = vadd.f32 %v2004_v57, %v1756_v28  ;;  %v2844_v31 = vmul.f32 %v6116_v0, %v5290_v53  ;;  %v2007_v20 = vmul.f32 %v6117_v27, %v4760_v63  ;;  %v1446_v30 = vmul.f32 %v6118_v45, %v6108_v55  ;;  %v5366_v53 = vpop.permute.xlu0 %2780  ;;  %v6124_v57 = vld [vmem:[#allocation217_spill] sm:$0xff]  ;;  %v5386_v27 = vpop.permute.xlu1 %2792 }
 0x4aa   : > { %v2597_v41 = vadd.f32 %v2565_v49, %v2317_v8  ;;  %v1759_v25 = vadd.f32 %v1727_v35, %v1479_v29  ;;  %v1198_v19 = vadd.f32 %v1166_v39, %v918_v23  ;;  %v2287_v34 = vmul.f32 %v6119_v18, %v4776_v11  ;;  %v6127_v35 = vld [vmem:[#allocation182_spill] sm:$0xff]  ;;  %v6128_v29 = vld [vmem:[#allocation125_spill] sm:$0xff] }
 0x4ab   : > { %v2316_v16 = vadd.f32 %v2284_v40, %v2036_v47  ;;  %v1726_v10 = vmul.f32 %v6120_v26, %v6111_v37  ;;  %v923_v4 = vmul.f32 %v6121_v36, %v4745_v21  ;;  %v1171_v59 = vmul.f32 %v6122_v3, %v4749_v24  ;;  %v6129_v23 = vld [vmem:[#allocation26_spill] sm:$0xff]  ;;  %v6136_v36 = vld [vmem:[#allocation33_spill] sm:$0xff] }
 0x4ac   : > { %v2877_v44 = vadd.f32 %v2845_v46, %v2597_v41  ;;  %v2039_v15 = vadd.f32 %v2007_v20, %v1759_v25  ;;  %v1478_v49 = vadd.f32 %v1446_v30, %v1198_v19  ;;  %v2567_v62 = vmul.f32 %v6123_v17, %v4806_v12  ;;  %v6126_v46 = vld [vmem:[#allocation87_spill] sm:$0xff]  ;;  %v6132_v25 = vld [vmem:[#allocation152_spill] sm:$0xff]  ;;  %v6134_v26 = vld [vmem:[#allocation234_spill] sm:$0xff] }
 0x4ad   : > { %v2596_v6 = vadd.f32 %v2564_v43, %v2316_v16  ;;  %v2847_v51 = vmul.f32 %v6124_v57, %v4835_v33  ;;  %v2006_v58 = vmul.f32 %v6125_v52, %v4760_v63  ;;  %v1203_v42 = vadd.f32 %v1171_v59, %v923_v4  ;;  %v6130_v43 = vld [vmem:[#allocation60_spill] sm:$0xff]  ;;  %v6131_v20 = vld [vmem:[#allocation207_spill] sm:$0xff]  ;;  %v5398_v30 = vpop.permute.xlu0 %2788  ;;  %v6139_v17 = vld [vmem:[#allocation189_spill] sm:$0xff] }
 0x4ae   : > { %2980 = vperm.xlu1 %3492, %v2877_v44   ;;  %v2319_v14 = vadd.f32 %v2287_v34, %v2039_v15  ;;  %v1758_v28 = vadd.f32 %v1726_v10, %v1478_v49  ;;  %v1451_v40 = vmul.f32 %v6126_v46, %v4753_v13  ;;  %v2286_v8 = vmul.f32 %v6127_v35, %v4776_v11  ;;  %v6137_v44 = vld [vmem:[#allocation63_spill] sm:$0xff]  ;;  %v6138_v59 = vld [vmem:[#allocation116_spill] sm:$0xff]  ;;  %v6140_v57 = vld [vmem:[#allocation237_spill] sm:$0xff] }
 0x4af   : > { %v2876_v48 = vadd.f32 %v2844_v31, %v2596_v6  ;;  %v1731_v2 = vmul.f32 %v6128_v29, %v4772_v32  ;;  %v921_v9 = vmul.f32 %v6129_v23, %v4708_v38  ;;  %v1169_v0 = vmul.f32 %v6130_v43, %v4712_v5  ;;  %v6133_v38 = vld [vmem:[#allocation86_spill] sm:$0xff] }
 0x4b0   : > { %v2599_v39 = vadd.f32 %v2567_v62, %v2319_v14  ;;  %v2038_v47 = vadd.f32 %v2006_v58, %v1758_v28  ;;  %v1483_v50 = vadd.f32 %v1451_v40, %v1203_v42  ;;  %v5390_v31 = vadd.f32 %v4943_v56, %v5296_v54  ;;  %v6135_v54 = vld [vmem:[#allocation168_spill] sm:$0xff]  ;;  %v6143_v28 = vld [vmem:[#allocation89_spill] sm:$0xff]  ;;  %v6149_v43 = vld [vmem:[#allocation90_spill] sm:$0xff] }
 0x4b1   : > { %2977 = vperm.xlu0 %3493, %v2876_v48   ;;  %v2566_v41 = vmul.f32 %v6131_v20, %v4806_v12  ;;  %v2011_v19 = vmul.f32 %v6132_v25, %v4794_v1  ;;  %v1449_v45 = vmul.f32 %v6133_v38, %v6108_v55  ;;  %v1201_v34 = vadd.f32 %v1169_v0, %v921_v9  ;;  %v6142_v14 = vld [vmem:[#allocation236_spill] sm:$0xff]  ;;  %v6144_v48 = vld [vmem:[#allocation151_spill] sm:$0xff] }
 0x4b2   : > { %v2879_v16 = vadd.f32 %v2847_v51, %v2599_v39  ;;  %v2318_v5 = vadd.f32 %v2286_v8, %v2038_v47  ;;  %v1763_v18 = vadd.f32 %v1731_v2, %v1483_v50  ;;  %v2846_v56 = vmul.f32 %v6134_v26, %v4835_v33  ;;  %v6141_v51 = vld [vmem:[#allocation221_spill] sm:$0xff]  ;;  %v6147_v9 = vld [vmem:[#allocation31_spill] sm:$0xff]  ;;  %v6148_v47 = vld [vmem:[#allocation62_spill] sm:$0xff] }
 0x4b3   : > { %v2291_v10 = vmul.f32 %v6135_v54, %v4815_v60  ;;  %v927_v4 = vmul.f32 %v6136_v36, %v4800_v22  ;;  %v1175_v15 = vmul.f32 %v6137_v44, %v4810_v7  ;;  %v1481_v3 = vadd.f32 %v1449_v45, %v1201_v34  ;;  %v6146_v2 = vld [vmem:[#allocation129_spill] sm:$0xff]  ;;  %v6150_v20 = vld [vmem:[#allocation167_spill] sm:$0xff]  ;;  %v6153_v45 = vld [vmem:[#allocation154_spill] sm:$0xff] }
 0x4b4   : > { %2986 = vperm.xlu1 %3492, %v2879_v16   ;;  %v2598_v55 = vadd.f32 %v2566_v41, %v2318_v5  ;;  %v2043_v49 = vadd.f32 %v2011_v19, %v1763_v18  ;;  %v1729_v6 = vmul.f32 %v6138_v59, %v6111_v37  ;;  %v2571_v62 = vmul.f32 %v6139_v17, %v4841_v61  ;;  %v6145_v37 = vld [vmem:[#allocation238_spill] sm:$0xff]  ;;  %v6152_v38 = vld [vmem:[#allocation239_spill] sm:$0xff]  ;;  %v6157_v36 = vld [vmem:[#allocation241_spill] sm:$0xff] }
 0x4b5   : > { %v2851_v52 = vmul.f32 %v6141_v51, %v6140_v57  ;;  %v1207_v58 = vadd.f32 %v1175_v15, %v927_v4  ;;  %v1455_v22 = vmul.f32 %v6143_v28, %v6142_v14  ;;  %v2009_v35 = vmul.f32 %v6144_v48, %v4760_v63  ;;  %v6151_v63 = vld [vmem:[#allocation188_spill] sm:$0xff]  ;;  %v6156_v54 = vld [vmem:[#allocation170_spill] sm:$0xff]  ;;  %v6163_v17 = vld [vmem:[#allocation243_spill] sm:$0xff] }
 0x4b6   : > { %v2878_v46 = vadd.f32 %v2846_v56, %v2598_v55  ;;  %v2323_v7 = vadd.f32 %v2291_v10, %v2043_v49  ;;  %v1761_v40 = vadd.f32 %v1729_v6, %v1481_v3  ;;  %v1735_v23 = vmul.f32 %v6146_v2, %v6145_v37  ;;  %v6155_v56 = vld [vmem:[#allocation240_spill] sm:$0xff]  ;;  %v6159_v55 = vld [vmem:[#allocation127_spill] sm:$0xff]  ;;  %v6160_v3 = vld [vmem:[#allocation114_spill] sm:$0xff] }
 0x4b7   : > { %v1487_v29 = vadd.f32 %v1455_v22, %v1207_v58  ;;  %v925_v39 = vmul.f32 %v6147_v9, %v4745_v21  ;;  %v1173_v50 = vmul.f32 %v6148_v47, %v4749_v24  ;;  %v2289_v41 = vmul.f32 %v6150_v20, %v4776_v11  ;;  %v6154_v21 = vld [vmem:[#allocation88_spill] sm:$0xff]  ;;  %v6161_v6 = vld [vmem:[#allocation242_spill] sm:$0xff] }
 0x4b8   : > { %2983 = vperm.xlu0 %3493, %v2878_v46   ;;  %2995 = vperm.xlu1 %3492, %v6149_v43   ;;  %v2041_v0 = vadd.f32 %v2009_v35, %v1761_v40  ;;  %v2569_v25 = vmul.f32 %v6151_v63, %v4806_v12  ;;  %v2015_v16 = vmul.f32 %v6153_v45, %v6152_v38  ;;  %v6158_v4 = vld [vmem:[#allocation192_spill] sm:$0xff]  ;;  %v6165_v46 = vld [vmem:[#allocation153_spill] sm:$0xff]  ;;  %v6172_v45 = vld [vmem:[#allocation155_spill] sm:$0xff] }
 0x4b9   : > { %v3198_v42 = vpop.permute.xlu1 %3197  ;;  %v1767_v19 = vadd.f32 %v1735_v23, %v1487_v29  ;;  %v1205_v5 = vadd.f32 %v1173_v50, %v925_v39  ;;  %v1453_v18 = vmul.f32 %v6154_v21, %v4753_v13  ;;  %v2603_v24 = vadd.f32 %v2571_v62, %v2323_v7  ;;  %v6162_v13 = vld [vmem:[#allocation37_spill] sm:$0xff]  ;;  %v6167_v39 = vld [vmem:[#allocation131_spill] sm:$0xff]  ;;  %v6168_v47 = vld [vmem:[#allocation244_spill] sm:$0xff] }
 0x4ba   : > { %v3195_v8 = vpop.permute.xlu0 %3194  ;;  %v2321_v26 = vadd.f32 %v2289_v41, %v2041_v0  ;;  %v2295_v10 = vmul.f32 %v6156_v54, %v6155_v56  ;;  %v2575_v11 = vmul.f32 %v6158_v4, %v6157_v36  ;;  %v1733_v49 = vmul.f32 %v6159_v55, %v4772_v32  ;;  %v6164_v62 = vld [vmem:[#allocation225_spill] sm:$0xff] }
 0x4bb   : > { %v2047_v15 = vadd.f32 %v2015_v16, %v1767_v19  ;;  %v1485_v12 = vadd.f32 %v1453_v18, %v1205_v5  ;;  %v3224_v59 = vrot.slane %v3198_v42, %v6160_v3  ;;  %v2855_v51 = vmul.f32 %v6164_v62, %v6163_v17  ;;  %v6173_v16 = vld [vmem:[#allocation14_spill] sm:$0xff]  ;;  %v6176_v4 = vld [vmem:[#allocation213_spill] sm:$0xff] }
 0x4bc   : > { %2989 = vperm.xlu0 %3493, %v6161_v6   ;;  %3001 = vperm.xlu1 %3492, %v6162_v13   ;;  %v3220_v58 = vrot.slane %v3195_v8, %v6160_v3  ;;  %v2013_v7 = vmul.f32 %v6165_v46, %v4794_v1  ;;  %v2883_v42 = vadd.f32 %v2851_v52, %v2603_v24  ;;  %v6166_v8 = vld [vmem:[#allocation169_spill] sm:$0xff]  ;;  %v6169_v1 = vld [vmem:[#allocation190_spill] sm:$0xff]  ;;  %v6170_v52 = vld [vmem:[#allocation219_spill] sm:$0xff] }
 0x4bd   : > { %v3201_v34 = vpop.permute.xlu1 %3200  ;;  %v2327_v28 = vadd.f32 %v2295_v10, %v2047_v15  ;;  %v1765_v22 = vadd.f32 %v1733_v49, %v1485_v12  ;;  %v2601_v48 = vadd.f32 %v2569_v25, %v2321_v26  ;;  %v2293_v23 = vmul.f32 %v6166_v8, %v4815_v60  ;;  %v6171_v25 = vld [vmem:[#allocation191_spill] sm:$0xff] }
 0x4be   : > { %v3204_v44 = vpop.permute.xlu0 %3203  ;;  %v3228_v14 = vrot.slane %v3201_v34, %v6160_v3  ;;  %v3249_v35 = vsel %vm465_vm1, %v3224_v59, %v3220_v58  ;;  %v2606_v50 = vadd.f32 %v6168_v47, %v6167_v39  ;;  %v2296_v43 = vmul.f32 %v6169_v1, %v6155_v56  ;;  %v6174_v24 = vld [vmem:[#allocation223_spill] sm:$0xff] }
 0x4bf   : > { %v3232_v32 = vrot.slane %v3204_v44, %v6160_v3  ;;  %v2607_v37 = vadd.f32 %v2575_v11, %v2327_v28  ;;  %v2045_v2 = vadd.f32 %v2013_v7, %v1765_v22  ;;  %v2849_v0 = vmul.f32 %v6170_v52, %v4835_v33  ;;  %v6178_v6 = vld [vmem:[#allocation235_spill] sm:$0xff] }
 0x4c0   : > { %v3250_v9 = vsel %vm467_vm2, %v3228_v14, %v3249_v35  ;;  %2998 = vperm.xlu0 %3493, %v2883_v42   ;;  %v2573_v19 = vmul.f32 %v6171_v25, %v4841_v61  ;;  %v2049_v5 = vadd.f32 %v6173_v16, %v6172_v45  ;;  %v2328_v21 = vadd.f32 %v2296_v43, %v5390_v31  ;;  %v6175_v61 = vld [vmem:[#allocation171_spill] sm:$0xff] }
 0x4c1   : > { %v3207_v40 = vpop.permute.xlu1 %3206  ;;  %v3251_v20 = vsel %vm469_vm3, %v3232_v32, %v3250_v9  ;;  %v2887_v41 = vadd.f32 %v2855_v51, %v2607_v37  ;;  %v2325_v63 = vadd.f32 %v2293_v23, %v2045_v2  ;;  %v2881_v18 = vadd.f32 %v2849_v0, %v2601_v48  ;;  %v6179_v51 = vld [vmem:[#allocation232_spill] sm:$0xff]  ;;  %v6181_v0 = vld [vmem:[#allocation11_spill] sm:$0xff] }
 0x4c2   : > { %v3236_v29 = vrot.slane %v3207_v40, %v6160_v3  ;;  %v2853_v26 = vmul.f32 %v6174_v24, %v6140_v57  ;;  %v2854_v54 = vmul.f32 %v5366_v53, %v6163_v17  ;;  %v2297_v10 = vmul.f32 %v6175_v61, %v6155_v56  ;;  %v6177_v57 = vld [vmem:[#allocation194_spill] sm:$0xff] }
 0x4c3   : > { %3010 = vperm.xlu1 %3492, %v2887_v41   ;;  %v2605_v33 = vadd.f32 %v2573_v19, %v2325_v63  ;;  %v2576_v11 = vmul.f32 %v6176_v4, %v6157_v36  ;;  %v2577_v49 = vmul.f32 %v6177_v57, %v6157_v36  ;;  %v2856_v53 = vmul.f32 %v5398_v30, %v6163_v17 }
 0x4c4   : > { %v3252_v60 = vsel %vm471_vm4, %v3236_v29, %v3251_v20  ;;  %2992 = vperm.xlu0 %3493, %v2881_v18   ;;  %v2886_v15 = vadd.f32 %v2854_v54, %v2606_v50  ;;  %v2329_v12 = vadd.f32 %v2297_v10, %v2049_v5  ;;  %v2857_v13 = vmul.f32 %v5386_v27, %v6163_v17  ;;  %v6180_v50 = vld [vmem:[#allocation112_spill] sm:$0xff] }
 0x4c5   : > { %v3210_v38 = vpop.permute.xlu1 %3209  ;;  %v2885_v44 = vadd.f32 %v2853_v26, %v2605_v33  ;;  %v2608_v55 = vadd.f32 %v2576_v11, %v2328_v21  ;;  %v3022_v1 = vadd.s32 4294967288, %v6180_v50  ;;  %v3029_v43 = vadd.s32 4294967280, %v6180_v50 }
 0x4c6   : > { %v3240_v34 = vrot.slane %v3210_v38, %v6160_v3  ;;  %v2609_v56 = vadd.f32 %v2577_v49, %v2329_v12  ;;  %v3036_v41 = vadd.s32 4294967272, %v6180_v50 }
 0x4c7   : > { %3004 = vperm.xlu1 %3492, %v2885_v44   ;;  %v2888_v59 = vadd.f32 %v2856_v53, %v2608_v55  ;;  %v5506_v20 = vsub.s32 %v3022_v1, %v6181_v0  ;;  %v5512_v25 = vsub.s32 %v3029_v43, %v6181_v0 }
 0x4c8   : > { %v5477_v31 = vsel %vm473_vm5, %v3240_v34, %v3252_v60  ;;  %3007 = vperm.xlu0 %3493, %v2886_v15   ;;  %v2889_v62 = vadd.f32 %v2857_v13, %v2609_v56  ;;  %v5517_v45 = vsub.s32 %v3036_v41, %v6181_v0 }
 0x4cb   : > { %3215 = vperm.xlu1 %3492, %v6178_v6  }
 0x4cc   : > { %3013 = vperm.xlu0 %3493, %v2888_v59  }
 0x4d0   : > { %3016 = vperm.xlu0 %3493, %v2889_v62  }
 0x4d4   : > { %3212 = vperm.xlu0 %3493, %v6179_v51  }
 0x4e0   : > { %v2927_v58 = vpop.permute.xlu1 %2926 }
 0x4e1   : > { %v3026_v60 = vrot.slane %v2927_v58, %v5506_v20 }
 0x4e4   : > { %v2924_v14 = vpop.permute.xlu0 %2923 }
 0x4e5   : > { %v3021_v38 = vrot.slane %v2924_v14, %v6160_v3 }
 0x4e7   : > { %v3028_v4 = vsel %vm3027_vm9, %v3026_v60, %v3021_v38 }
 0x4e9   : > { %v5487_v28 = vpop.permute.xlu1 %2932 }
 0x4ea   : > { %v3040_v11 = vrot.slane %v5487_v28, %v5517_v45 }
 0x4ec   : > { %v2930_v36 = vpop.permute.xlu0 %2929 }
 0x4ed   : > { %v3033_v16 = vrot.slane %v2930_v36, %v5512_v25 }
 0x4ef   : > { %v3035_v15 = vsel %vm3034_vm10, %v3033_v16, %v3028_v4 }
 0x4f1   : > { %v2939_v22 = vpop.permute.xlu1 %2938 }
 0x4f2   : > { %v3050_v5 = vrot.slane %v2939_v22, %v5506_v20 }
 0x4f5   : > { %v2936_v30 = vpop.permute.xlu0 %2935 }
 0x4f6   : > { %v3046_v21 = vrot.slane %v2936_v30, %v6160_v3 }
 0x4f8   : > { %v3051_v12 = vsel %vm3027_vm9, %v3050_v5, %v3046_v21 }
 0x4fa   : > { %v5489_v46 = vpop.permute.xlu1 %2944 }
 0x4fb   : > { %v3060_v49 = vrot.slane %v5489_v46, %v5517_v45 }
 0x4fd   : > { %v2942_v7 = vpop.permute.xlu0 %2941 }
 0x4fe   : > { %v3055_v18 = vrot.slane %v2942_v7, %v5512_v25 }
 0x500   : > { %v3056_v53 = vsel %vm3034_vm10, %v3055_v18, %v3051_v12 }
 0x502   : > { %v2951_v32 = vpop.permute.xlu1 %2950 }
 0x503   : > { %v3069_v34 = vrot.slane %v2951_v32, %v5506_v20 }
 0x506   : > { %v2948_v40 = vpop.permute.xlu0 %2947 }
 0x507   : > { %v3065_v33 = vrot.slane %v2948_v40, %v6160_v3 }
 0x509   : > { %v3070_v56 = vsel %vm3027_vm9, %v3069_v34, %v3065_v33 }
 0x50b   : > { %v5491_v42 = vpop.permute.xlu1 %2956 }
 0x50c   : > { %v3079_v6 = vrot.slane %v5491_v42, %v5517_v45  ;;  %v3061_v42 = vsel %vm3041_vm11, %v3060_v49, %v3056_v53 }
 0x50e   : > { %v2954_v27 = vpop.permute.xlu0 %2953 }
 0x50f   : > { %v3074_v26 = vrot.slane %v2954_v27, %v5512_v25 }
 0x511   : > { %v3075_v13 = vsel %vm3034_vm10, %v3074_v26, %v3070_v56 }
 0x513   : > { %v2963_v17 = vpop.permute.xlu1 %2962 }
 0x514   : > { %v3088_v54 = vrot.slane %v2963_v17, %v5506_v20 }
 0x517   : > { %v2960_v48 = vpop.permute.xlu0 %2959 }
 0x518   : > { %v3084_v61 = vrot.slane %v2960_v48, %v6160_v3 }
 0x51a   : > { %v3089_v62 = vsel %vm3027_vm9, %v3088_v54, %v3084_v61 }
 0x51c   : > { %v5493_v35 = vpop.permute.xlu1 %2968 }
 0x51d   : > { %v3098_v14 = vrot.slane %v5493_v35, %v5517_v45  ;;  %v3080_v35 = vsel %vm3041_vm11, %v3079_v6, %v3075_v13 }
 0x520   : > { %v2966_v29 = vpop.permute.xlu0 %2965 }
 0x521   : > { %v3093_v44 = vrot.slane %v2966_v29, %v5512_v25 }
 0x523   : > { %v3094_v28 = vsel %vm3034_vm10, %v3093_v44, %v3089_v62 }
 0x524   : > { %v2975_v37 = vpop.permute.xlu1 %2974 }
 0x525   : > { %v3107_v55 = vrot.slane %v2975_v37, %v5506_v20 }
 0x527   : > { %v2972_v2 = vpop.permute.xlu0 %2971 }
 0x528   : > { %v3103_v57 = vrot.slane %v2972_v2, %v6160_v3 }
 0x52a   : > { %v3108_v46 = vsel %vm3027_vm9, %v3107_v55, %v3103_v57 }
 0x52d   : > { %v5495_v8 = vpop.permute.xlu1 %2980 }
 0x52e   : > { %v3117_v7 = vrot.slane %v5495_v8, %v5517_v45  ;;  %v3042_v8 = vsel %vm3041_vm11, %v3040_v11, %v3035_v15 }
 0x530   : > { %v2978_v23 = vpop.permute.xlu0 %2977 }
 0x531   : > { %v3112_v59 = vrot.slane %v2978_v23, %v5512_v25  ;;  %v3099_v23 = vsel %vm3041_vm11, %v3098_v14, %v3094_v28 }
 0x533   : > { %v5497_v9 = vpop.permute.xlu1 %2986  ;;  %v3113_v27 = vsel %vm3034_vm10, %v3112_v59, %v3108_v46 }
 0x534   : > { %v3126_v36 = vrot.slane %v5497_v9, %v5506_v20  ;;  %v3118_v50 = vsel %vm3041_vm11, %v3117_v7, %v3113_v27 }
 0x537   : > { %v5499_v39 = vpop.permute.xlu0 %2983  ;;  %v2996_v47 = vpop.permute.xlu1 %2995 }
 0x538   : > { %v3122_v22 = vrot.slane %v5499_v39, %v6160_v3  ;;  %v3141_v32 = vrot.slane %v2996_v47, %v6160_v3  ;;  %v3176_v47 = vsel %vm465_vm1, %v3061_v42, %v3042_v8 }
 0x53a   : > { %v3127_v9 = vsel %vm3027_vm9, %v3126_v36, %v3122_v22 }
 0x53b   : > { %v5503_v52 = vpop.permute.xlu0 %2989  ;;  %v5509_v63 = vpop.permute.xlu1 %3001 }
 0x53c   : > { %v3131_v40 = vrot.slane %v5503_v52, %v5512_v25  ;;  %v3150_v17 = vrot.slane %v5509_v63, %v5512_v25  ;;  %v3177_v52 = vsel %vm467_vm2, %v3080_v35, %v3176_v47 }
 0x53e   : > { %v3132_v1 = vsel %vm3034_vm10, %v3131_v40, %v3127_v9 }
 0x53f   : > { %v2999_v19 = vpop.permute.xlu0 %2998 }
 0x540   : > { %v3145_v51 = vrot.slane %v2999_v19, %v5506_v20  ;;  %v3178_v19 = vsel %vm469_vm3, %v3099_v23, %v3177_v52 }
 0x542   : > { %v5525_v24 = vpop.permute.xlu1 %3010  ;;  %v3146_v29 = vsel %vm3027_vm9, %v3145_v51, %v3141_v32 }
 0x543   : > { %v2993_v10 = vpop.permute.xlu0 %2992  ;;  %v3164_v0 = vrot.slane %v5525_v24, %v5506_v20  ;;  %v3151_v63 = vsel %vm3034_vm10, %v3150_v17, %v3146_v29 }
 0x544   : > { %v3136_v48 = vrot.slane %v2993_v10, %v5517_v45 }
 0x546   : > { %v3005_v30 = vpop.permute.xlu1 %3004  ;;  %v3137_v41 = vsel %vm3041_vm11, %v3136_v48, %v3132_v1 }
 0x547   : > { %v3008_v58 = vpop.permute.xlu0 %3007  ;;  %v3155_v37 = vrot.slane %v3005_v30, %v5517_v45 }
 0x548   : > { %v3160_v39 = vrot.slane %v3008_v58, %v6160_v3 }
 0x549   : > { %v3156_v60 = vsel %vm3041_vm11, %v3155_v37, %v3151_v63 }
 0x54a   : > { %v3165_v16 = vsel %vm3027_vm9, %v3164_v0, %v3160_v39  ;;  %v3216_v34 = vpop.permute.xlu1 %3215 }
 0x54b   : > { %v3014_v2 = vpop.permute.xlu0 %3013  ;;  %v3248_v54 = vrot.slane %v3216_v34, %v6160_v3 }
 0x54c   : > { %v3169_v43 = vrot.slane %v3014_v2, %v5512_v25  ;;  %v3179_v25 = vsel %vm471_vm4, %v3118_v50, %v3178_v19 }
 0x54d   : > { %v3180_v20 = vsel %vm473_vm5, %v3137_v41, %v3179_v25 }
 0x54e   : > { %v3170_v21 = vsel %vm3034_vm10, %v3169_v43, %v3165_v16  ;;  %v3181_v18 = vsel %vm475_vm6, %v3156_v60, %v3180_v20 }
 0x54f   : > { %v3017_v38 = vpop.permute.xlu0 %3016 }
 0x550   : > { %v3174_v5 = vrot.slane %v3017_v38, %v5517_v45 }
 0x552   : > { %v3175_v33 = vsel %vm3041_vm11, %v3174_v5, %v3170_v21 }
 0x553   : > { %v3182_v45 = vsel %vm477_vm7, %v3175_v33, %v3181_v18  ;;  %v3213_v24 = vpop.permute.xlu0 %3212 }
 0x554   : > { %v3244_v26 = vrot.slane %v3213_v24, %v6160_v3  ;;  %3184 = vst.msk [vmem:[%s258_s29] sm:$0xff] %vm306_vm0, %v3182_v45 }
 0x555   : > { %3609 = shalt.err (!%p3606_p9)
}
 0x556   : > { %s3610_s23 = scalar_lea.hbm %s5600_s17, 128  ;;  %s3614_s29 = scalar_lea.hbm %s5662_s4, 256 }
 0x557   : > { %p3611_p2 = scmp.ne.s32.totalorder %s5600_s17, %s3610_s23  ;;  %p3615_p11 = scmp.lt.u32.totalorder %s5600_s17, %s5662_s4 }
 0x558   : > { %p3616_p1 = scmp.lt.u32.totalorder %s3614_s29, %s3610_s23  ;;  %p3618_p6 = scmp.lt.u32.totalorder %s3610_s23, %s5600_s17 }
 0x559   : > { %p3612_p0 = pnand %p3611_p2, %p3797_p12 }
 0x55a   : > { %p3617_p4 = por %p3616_p1, %p3615_p11 }
 0x55b   : > { %p3613_p5 = pneg %p3612_p0 }
 0x55c   : > { %p3619_p8 = por %p3618_p6, %p3617_p4 }
 0x55e   : > { %p3620_p10 = pnand %p3619_p8, %p3613_p5 }
 0x560   : > { %3623 = shalt.err (!%p3620_p10)
}
 0x561   : > { %3436 = dma.vmem_to_hbm [thread:$0]  (%p3797_p12), %s5602_s13, 128, %s5600_s17, %s3259_s24   ;;  %v3254_v3 = vsel %vm475_vm6, %v3244_v26, %v5477_v31 }
 0x562   : > { %v3255_v61 = vsel %vm477_vm7, %v3248_v54, %v3254_v3 }
 0x563   : > { %3257 = vst.msk [vmem:[%s5608_s12] sm:$0xff] %vm480_vm8, %v3255_v61 }
 0x564 PF: > { %s3291_s16 = sand.u32 1, %s3654_s18   ;;  %p6182_p13 = scmp.ne.s32.totalorder %s5693_s25, 0 }
 0x565   : > { %p6183_p3 = scmp.ge.s32.totalorder %s3666_s21, 2  ;;  %s3292_s9 = scalar_lea.sflag [#allocation4], %s3291_s16 }
 0x567   : > { %p3447_p7 = pnand %p6183_p3, %p6182_p13 }
 0x569   : > { %3649 = dma.done.wait (!%p3447_p7), %s3292_s9, 128  }
 0x56a   : > { %3651 = vsyncadd (!%p3447_p7), %s3292_s9, 4294967168  ;;  %p20_p12 = scmp.ge.s32.totalorder %s3762_s30, 4   ;;  %s6184_s18 = smov %s3658_s19 }
 0x56b   : > { %s6185_s19 = smov %s3662_s20  ;;  %s6186_s20 = smov %s3793_s8 }
 0x56c   : > { %s6187_s21 = smov %s3762_s30  ;;  %22 = sbr.rel (!%p20_p12) target bundleno = 6 (0x6), region = 97 }
 0x573   :  { %3304 = vsyncpa [#allocation3], 1 }
 0x574   :  { %3306 = vsyncpa [#allocation3 + $0x1], 1 }
 0x575   :  { %3307 = vsyncpa [#allocation6], 1 }
 0x576   :  { %3308 = vsyncpa [#allocation4], 1 }
 0x577   :  { %3310 = vsyncpa [#allocation4 + $0x1], 1 }

</bundles_post_ra>
